<compile_context>
chip_gen: v7x
topology: tpu7x:2x2x1
jax: 0.10.0
libtpu: 0.0.40
codegen_flags: <defaults>
</compile_context>

<pallas_src>
import math
import functools

import jax
import jax.numpy as jnp
from jax.experimental import pallas as pl
from jax.experimental.pallas import tpu as pltpu


# --------------------------------------------------------------------------------------
# Kernel
# --------------------------------------------------------------------------------------
def mha_flash_kernel(x_q_ref, x_kv_ref, mask_ref,
                     wq_ref, bq_ref, wkv_ref, bkv_ref, wo_ref, bo_ref,
                     gamma_ref, beta_ref,
                     out_ref,
                     q_scr, k_scr, v_scr, m_scr, l_scr, acc_scr,
                     *, n_heads, head_dim, q_tile, kv_tile, eps,
                     matmul_dtype, recip_approx):
    H = n_heads * head_dim
    qi = pl.program_id(1)          # query-tile index
    ki = pl.program_id(2)          # kv-tile index (innermost, "arbitrary")
    n_kv = pl.num_programs(2)

    # ---- K/V projection: done once per batch (during the qi == 0 sweep), cached
    #      head-major in VMEM scratch and reused by all later q-tiles. ----
    @pl.when(qi == 0)
    def _():
        x_kv = x_kv_ref[0]                                               # (tk, H) matmul dtype
        kv = jnp.dot(x_kv, wkv_ref[...],
                     preferred_element_type=jnp.float32) + bkv_ref[0]    # (tk, 2H) f32
        kv = kv.astype(matmul_dtype)
        k = kv[:, 0:H].reshape(kv_tile, n_heads, head_dim)
        v = kv[:, H:2 * H].reshape(kv_tile, n_heads, head_dim)
        off = pl.multiple_of(ki * kv_tile, kv_tile)
        k_scr[:, pl.ds(off, kv_tile), :] = pltpu.einshape("khd->hkd", k)
        v_scr[:, pl.ds(off, kv_tile), :] = pltpu.einshape("khd->hkd", v)

    # ---- Q projection (1/sqrt(d) pre-folded into wq/bq by the wrapper) + online-softmax
    #      state init: once per (batch, q-tile). ----
    @pl.when(ki == 0)
    def _():
        x_q = x_q_ref[0].astype(matmul_dtype)                            # (tq, H)
        q = jnp.dot(x_q, wq_ref[...],
                    preferred_element_type=jnp.float32) + bq_ref[0]      # (tq, H) f32
        q = q.astype(matmul_dtype).reshape(q_tile, n_heads, head_dim)
        q_scr[...] = pltpu.einshape("qhd->hqd", q)
        m_scr[...] = jnp.full(m_scr.shape, -jnp.inf, dtype=m_scr.dtype)
        l_scr[...] = jnp.zeros(l_scr.shape, dtype=l_scr.dtype)
        acc_scr[...] = jnp.zeros(acc_scr.shape, dtype=acc_scr.dtype)

    # ---- one (q-tile, kv-tile) online-softmax step, batched over all heads ----
    off = pl.multiple_of(ki * kv_tile, kv_tile)
    k_t = k_scr[:, pl.ds(off, kv_tile), :]                               # (h, tk, d)
    v_t = v_scr[:, pl.ds(off, kv_tile), :]
    s = jnp.einsum("hqd,hkd->hqk", q_scr[...], k_t,
                   preferred_element_type=jnp.float32)                   # (h, tq, tk) f32
    s = s + mask_ref[0].astype(jnp.float32)[None, :, :]                  # additive mask

    m_new = jnp.maximum(m_scr[...], jnp.max(s, axis=-1, keepdims=True))
    alpha = jnp.exp(m_scr[...] - m_new)
    p = jnp.exp(s - m_new)
    l_scr[...] = alpha * l_scr[...] + jnp.sum(p, axis=-1, keepdims=True)
    acc_scr[...] = alpha * acc_scr[...] + jnp.einsum(
        "hqk,hkd->hqd", p.astype(matmul_dtype), v_t,
        preferred_element_type=jnp.float32)
    m_scr[...] = m_new

    # ---- finalize: softmax normalization, head-merge + output dense, residual, LN ----
    @pl.when(ki == n_kv - 1)
    def _():
        ctx = acc_scr[...] * pl.reciprocal(l_scr[...], approx=recip_approx)   # (h,tq,d) f32
        # Small per-q-tile relayout, then a single K=H MXU contraction (keeps the 256-wide
        # MXU full; the fused multi-contracting-dim einsum may not lower in Mosaic).
        ctx = pltpu.einshape("hqd->qhd", ctx.astype(matmul_dtype)).reshape(q_tile, H)
        hidden = jnp.dot(ctx, wo_ref[...],
                         preferred_element_type=jnp.float32) + bo_ref[0]      # (tq, H)
        y = hidden + x_q_ref[0]                                               # residual (f32)
        mean = jnp.mean(y, axis=-1, keepdims=True)
        var = jnp.mean((y - mean) ** 2, axis=-1, keepdims=True)   # biased, like torch LN
        y_norm = (y - mean) * jax.lax.rsqrt(var + eps)
        out_ref[0] = (y_norm * gamma_ref[0] + beta_ref[0]).astype(out_ref.dtype)


# --------------------------------------------------------------------------------------
# Wrapper
# --------------------------------------------------------------------------------------
def _pick_tile(size, target, align):
    """Largest `align`-aligned divisor of `size` that is <= target (or `size` itself)."""
    if size <= target:
        return size
    t = (target // align) * align
    while t >= align:
        if size % t == 0:
            return t
        t -= align
    return size


def _pick_vmem_limit():
    """Per-generation scoped-VMEM cap: ~3/4 of physical, at most 100 MiB.
    v5e/v6e (128 MiB) -> 96 MiB; v7x (64 MiB) -> 48 MiB; conservative 48 MiB fallback."""
    try:
        cap = getattr(pltpu.get_tpu_info(), "vmem_capacity_bytes", None)
    except Exception:
        cap = None
    if not cap:
        return 48 * 1024 * 1024
    return int(min(cap * 3 // 4, 100 * 1024 * 1024))


def multi_head_attention(x, attention_mask, params, *, n_heads, eps,
                         matmul_dtype=jnp.bfloat16, recip_approx=True,
                         q_tile_target=256, kv_tile_target=512):
    """x: (B, S, H) f32; attention_mask: (B, S, S) f32 additive mask (broadcast over heads)."""
    B, S, H = x.shape
    head_dim = H // n_heads

    q_tile = _pick_tile(S, q_tile_target, 8)        # sublane-aligned (or full S)
    kv_tile = _pick_tile(S, kv_tile_target, 128)    # lane-aligned (or full S)
    assert S % q_tile == 0 and S % kv_tile == 0, "sequence must divide into tiles"
    n_q, n_kv = S // q_tile, S // kv_tile

    # Fold the 1/sqrt(head_dim) softmax scale into the Q projection (zero in-kernel cost).
    inv_sqrt_d = 1.0 / math.sqrt(head_dim)
    wq = (params["wq"] * inv_sqrt_d).astype(matmul_dtype)
    bq = params["bq"] * inv_sqrt_d                                     # stays f32
    wkv = jnp.concatenate([params["wk"], params["wv"]], axis=1).astype(matmul_dtype)
    bkv = jnp.concatenate([params["bk"], params["bv"]], axis=1)        # f32
    wo = params["wo"].astype(matmul_dtype)

    # Matmul-dtype copy of x for the K/V projection (halves its DMA bytes when bf16);
    # the f32 x is still streamed per q-tile for the residual / LayerNorm.
    x_kv = x.astype(matmul_dtype)
    # bf16 additive mask halves S^2 HBM traffic; kept f32 on the exact-f32 path.
    mask_dtype = jnp.float32 if matmul_dtype == jnp.float32 else jnp.bfloat16
    mask = attention_mask.astype(mask_dtype)

    kernel = functools.partial(
        mha_flash_kernel, n_heads=n_heads, head_dim=head_dim,
        q_tile=q_tile, kv_tile=kv_tile, eps=eps,
        matmul_dtype=matmul_dtype, recip_approx=recip_approx)

    def x_kv_index(b, qi, ki):
        # Only the qi == 0 sweep reads this operand; afterwards pin the block index so
        # the pipeline stops re-fetching unused x tiles from HBM.
        return (b, jnp.where(qi == 0, ki, 0), 0)

    def build(single_buffer_consts):
        const_kwargs = {"pipeline_mode": pl.Buffered(1)} if single_buffer_consts else {}

        def const_spec(shape):
            nd = len(shape)
            return pl.BlockSpec(shape, lambda b, qi, ki: (0,) * nd, **const_kwargs)

        grid_spec = pltpu.PrefetchScalarGridSpec(
            num_scalar_prefetch=0,
            grid=(B, n_q, n_kv),
            in_specs=[
                pl.BlockSpec((1, q_tile, H), lambda b, qi, ki: (b, qi, 0)),         # x f32, q-tile
                pl.BlockSpec((1, kv_tile, H), x_kv_index),                          # x matmul-dt, kv-tile
                pl.BlockSpec((1, q_tile, kv_tile), lambda b, qi, ki: (b, qi, ki)),  # mask tile
                const_spec((H, H)), const_spec((1, H)),           # wq (pre-scaled), bq
                const_spec((H, 2 * H)), const_spec((1, 2 * H)),   # fused wkv, bkv
                const_spec((H, H)), const_spec((1, H)),           # wo, bo
                const_spec((1, H)), const_spec((1, H)),           # gamma, beta
            ],
            out_specs=pl.BlockSpec((1, q_tile, H), lambda b, qi, ki: (b, qi, 0)),
            scratch_shapes=[
                pltpu.VMEM((n_heads, q_tile, head_dim), matmul_dtype),   # Q (head-major)
                pltpu.VMEM((n_heads, S, head_dim), matmul_dtype),        # K cache (full seq)
                pltpu.VMEM((n_heads, S, head_dim), matmul_dtype),        # V cache (full seq)
                pltpu.VMEM((n_heads, q_tile, 1), jnp.float32),           # online-softmax m
                pltpu.VMEM((n_heads, q_tile, 1), jnp.float32),           # online-softmax l
                pltpu.VMEM((n_heads, q_tile, head_dim), jnp.float32),    # output accumulator
            ],
        )
        return pl.pallas_call(
            kernel,
            out_shape=jax.ShapeDtypeStruct((B, S, H), jnp.float32),
            grid_spec=grid_spec,
            compiler_params=pltpu.CompilerParams(
                # Batch is megacore-parallel; q/kv axes stay "arbitrary" because the K/V
                # cache is filled during the qi == 0 sweep and reused by later q-tiles.
                dimension_semantics=("parallel", "arbitrary", "arbitrary"),
                vmem_limit_bytes=_pick_vmem_limit(),
            ),
        )

    args = (x, x_kv, mask, wq, bq, wkv, bkv, wo, params["bo"],
            params["gamma"], params["beta"])
    try:
        return build(single_buffer_consts=True)(*args)
    except Exception:
        # pl.Buffered(1) single-buffering of constant weights is best-effort VMEM relief;
        # fall back to default double-buffering if this JAX version rejects it.
        return build(single_buffer_consts=False)(*args)


# --------------------------------------------------------------------------------------
# Pure-JAX reference mirroring the PyTorch forward (eval mode), f32
# --------------------------------------------------------------------------------------
def reference_mha(x, mask, params, *, n_heads, eps):
    B, S, H = x.shape
    d = H // n_heads
    q = x @ params["wq"] + params["bq"][0]
    k = x @ params["wk"] + params["bk"][0]
    v = x @ params["wv"] + params["bv"][0]

    def split(t):  # (B,S,H) -> (B,heads,S,d)
        return t.reshape(B, S, n_heads, d).transpose(0, 2, 1, 3)

    qh, kh, vh = split(q), split(k), split(v)
    scores = jnp.einsum("bhqd,bhkd->bhqk", qh, kh) / math.sqrt(d)
    scores = scores + mask[:, None, :, :]
    probs = jax.nn.softmax(scores, axis=-1)
    ctx = jnp.einsum("bhqk,bhkd->bhqd", probs, vh)
    ctx = ctx.transpose(0, 2, 1, 3).reshape(B, S, H)
    hidden = ctx @ params["wo"] + params["bo"][0]
    y = hidden + x
    mean = jnp.mean(y, axis=-1, keepdims=True)
    var = jnp.mean((y - mean) ** 2, axis=-1, keepdims=True)
    return (y - mean) / jnp.sqrt(var + eps) * params["gamma"][0] + params["beta"][0]


if __name__ == "__main__":
    def make_params(key, H):
        ks = jax.random.split(key, 8)
        lin_w = lambda k: jax.random.normal(k, (H, H), jnp.float32) * 0.05
        lin_b = lambda k: jax.random.normal(k, (1, H), jnp.float32) * 0.05
        return {
            "wq": lin_w(ks[0]), "bq": lin_b(ks[1]),
            "wk": lin_w(ks[2]), "bk": lin_b(ks[3]),
            "wv": lin_w(ks[4]), "bv": lin_b(ks[5]),
            "wo": lin_w(ks[6]), "bo": lin_b(ks[7]),
            "gamma": jnp.ones((1, H), jnp.float32),
            "beta": jnp.zeros((1, H), jnp.float32),
        }

    n_heads, eps = 4, 1e-12
    root = jax.random.PRNGKey(0)
    k_params, k_x1, k_x2 = jax.random.split(root, 3)

    # ---------- test 1: small shapes (B=2, S=8, H=32), single tile ----------
    B, S, H = 2, 8, 32
    params = make_params(k_params, H)
    x = jax.random.normal(k_x1, (B, S, H), jnp.float32)
    mask = jnp.zeros((B, S, S), jnp.float32).at[1, :, -2:].set(-10000.0)
    ref = reference_mha(x, mask, params, n_heads=n_heads, eps=eps)

    out = multi_head_attention(x, mask, params, n_heads=n_heads, eps=eps,
                               matmul_dtype=jnp.float32, recip_approx=False)
    out = jax.block_until_ready(out)
    assert jnp.allclose(out, ref, atol=1e-4, rtol=1e-4), "f32 kernel mismatch (S=8)"

    out_bf16 = jax.block_until_ready(
        multi_head_attention(x, mask, params, n_heads=n_heads, eps=eps))
    assert jnp.allclose(out_bf16, ref, atol=5e-2, rtol=5e-2), "bf16 kernel mismatch (S=8)"

    # ---------- test 2: longer sequence exercising the flash tiling ----------
    B2, S2 = 2, 256
    x2 = jax.random.normal(k_x2, (B2, S2, H), jnp.float32)
    mask2 = jnp.zeros((B2, S2, S2), jnp.float32).at[1, :, -64:].set(-10000.0)
    ref2 = reference_mha(x2, mask2, params, n_heads=n_heads, eps=eps)

    out2 = multi_head_attention(x2, mask2, params, n_heads=n_heads, eps=eps,
                                matmul_dtype=jnp.float32, recip_approx=False,
                                q_tile_target=64, kv_tile_target=128)  # 4 q-tiles x 2 kv-tiles
    out2 = jax.block_until_ready(out2)
    assert jnp.allclose(out2, ref2, atol=5e-4, rtol=5e-4), "tiled f32 kernel mismatch (S=256)"

    out2_bf16 = jax.block_until_ready(
        multi_head_attention(x2, mask2, params, n_heads=n_heads, eps=eps,
                             q_tile_target=64, kv_tile_target=128))
    assert jnp.allclose(out2_bf16, ref2, atol=5e-2, rtol=5e-2), "tiled bf16 kernel mismatch (S=256)"

    print("KERNEL_OK")
</pallas_src>

<mosaic_0001>
module attributes {stable_mosaic.version = 11 : i64} {
  func.func @mha_flash_kernel(%arg0: i32, %arg1: i32, %arg2: i32, %arg3: memref<1x8x32xf32, #tpu.memory_space<vmem>>, %arg4: memref<1x8x32xf32, #tpu.memory_space<vmem>>, %arg5: memref<1x8x8xf32, #tpu.memory_space<vmem>>, %arg6: memref<32x32xf32, #tpu.memory_space<vmem>>, %arg7: memref<1x32xf32, #tpu.memory_space<vmem>>, %arg8: memref<32x64xf32, #tpu.memory_space<vmem>>, %arg9: memref<1x64xf32, #tpu.memory_space<vmem>>, %arg10: memref<32x32xf32, #tpu.memory_space<vmem>>, %arg11: memref<1x32xf32, #tpu.memory_space<vmem>>, %arg12: memref<1x32xf32, #tpu.memory_space<vmem>>, %arg13: memref<1x32xf32, #tpu.memory_space<vmem>>, %arg14: memref<1x8x32xf32, #tpu.memory_space<vmem>>, %arg15: memref<4x8x8xf32, #tpu.memory_space<vmem>>, %arg16: memref<4x8x8xf32, #tpu.memory_space<vmem>>, %arg17: memref<4x8x8xf32, #tpu.memory_space<vmem>>, %arg18: memref<4x8x1xf32, #tpu.memory_space<vmem>>, %arg19: memref<4x8x1xf32, #tpu.memory_space<vmem>>, %arg20: memref<4x8x8xf32, #tpu.memory_space<vmem>>) attributes {dimension_semantics = [#tpu.dimension_semantics<parallel>, #tpu.dimension_semantics<arbitrary>, #tpu.dimension_semantics<arbitrary>], iteration_bounds = array<i64: 2, 1, 1>, scalar_prefetch = 0 : i64, scratch_operands = 6 : i64, tpu.core_type = #tpu.core_type<tc>, window_params = [{transform_indices = @transform_0, window_bounds = array<i64: 1, 8, 32>}, {transform_indices = @transform_1, window_bounds = array<i64: 1, 8, 32>}, {transform_indices = @transform_2, window_bounds = array<i64: 1, 8, 8>}, {pipeline_mode = #tpu.pipeline_mode<synchronous>, transform_indices = @transform_3, window_bounds = array<i64: 32, 32>}, {pipeline_mode = #tpu.pipeline_mode<synchronous>, transform_indices = @transform_4, window_bounds = array<i64: 1, 32>}, {pipeline_mode = #tpu.pipeline_mode<synchronous>, transform_indices = @transform_5, window_bounds = array<i64: 32, 64>}, {pipeline_mode = #tpu.pipeline_mode<synchronous>, transform_indices = @transform_6, window_bounds = array<i64: 1, 64>}, {pipeline_mode = #tpu.pipeline_mode<synchronous>, transform_indices = @transform_7, window_bounds = array<i64: 32, 32>}, {pipeline_mode = #tpu.pipeline_mode<synchronous>, transform_indices = @transform_8, window_bounds = array<i64: 1, 32>}, {pipeline_mode = #tpu.pipeline_mode<synchronous>, transform_indices = @transform_9, window_bounds = array<i64: 1, 32>}, {pipeline_mode = #tpu.pipeline_mode<synchronous>, transform_indices = @transform_10, window_bounds = array<i64: 1, 32>}, {transform_indices = @transform_11, window_bounds = array<i64: 1, 8, 32>}]} {
    %c0_i32 = arith.constant 0 : i32
    %0 = arith.cmpi eq, %arg1, %c0_i32 : i32
    %1 = arith.extui %0 : i1 to i32
    %c0_i32_0 = arith.constant 0 : i32
    %2 = arith.cmpi ne, %1, %c0_i32_0 : i32
    scf.if %2 {
      %c0_38 = arith.constant 0 : index
      %c0_39 = arith.constant 0 : index
      %c0_40 = arith.constant 0 : index
      %45 = vector.load %arg4[%c0_38, %c0_39, %c0_40] : memref<1x8x32xf32, #tpu.memory_space<vmem>>, vector<1x8x32xf32>
      %46 = vector.shape_cast %45 : vector<1x8x32xf32> to vector<8x32xf32>
      %c0_41 = arith.constant 0 : index
      %c0_42 = arith.constant 0 : index
      %47 = vector.load %arg8[%c0_41, %c0_42] : memref<32x64xf32, #tpu.memory_space<vmem>>, vector<32x64xf32>
      %cst_43 = arith.constant dense<0.000000e+00> : vector<8x64xf32>
      %48 = tpu.matmul %46, %47, %cst_43 {dimension_numbers = #tpu.dot_dimension_numbers<[1], [0], [0], [1], [0, 0, 1, 1], [], []>} : vector<8x32xf32>, vector<32x64xf32>, vector<8x64xf32> -> vector<8x64xf32>
      %c0_44 = arith.constant 0 : index
      %c0_45 = arith.constant 0 : index
      %49 = vector.load %arg9[%c0_44, %c0_45] : memref<1x64xf32, #tpu.memory_space<vmem>>, vector<1x64xf32>
      %50 = vector.shape_cast %49 : vector<1x64xf32> to vector<64xf32>
      %51 = vector.shape_cast %50 : vector<64xf32> to vector<1x64xf32>
      %52 = vector.broadcast %51 : vector<1x64xf32> to vector<8x64xf32>
      %53 = arith.addf %48, %52 : vector<8x64xf32>
      %54 = vector.extract_strided_slice %53 {offsets = [0, 0], sizes = [8, 32], strides = [1, 1]} : vector<8x64xf32> to vector<8x32xf32>
      %55 = vector.shape_cast %54 : vector<8x32xf32> to vector<8x4x8xf32>
      %56 = vector.extract_strided_slice %53 {offsets = [0, 32], sizes = [8, 32], strides = [1, 1]} : vector<8x64xf32> to vector<8x32xf32>
      %57 = vector.shape_cast %56 : vector<8x32xf32> to vector<8x4x8xf32>
      %c8_i32_46 = arith.constant 8 : i32
      %58 = arith.muli %arg2, %c8_i32_46 : i32
      %59 = tpu.assume_multiple %58, 8 : i32
      %60 = tpu.transpose %55, [1, 0, 2] : vector<8x4x8xf32> -> vector<4x8x8xf32>
      %c0_47 = arith.constant 0 : index
      %61 = arith.index_cast %59 : i32 to index
      %c0_48 = arith.constant 0 : index
      %62 = vector.load %arg16[%c0_47, %61, %c0_48] : memref<4x8x8xf32, #tpu.memory_space<vmem>>, vector<4x8x8xf32>
      tpu.vector_store %arg16[%c0_47, %61, %c0_48], %60 {strides = array<i32>} : memref<4x8x8xf32, #tpu.memory_space<vmem>>, vector<4x8x8xf32>,
      %63 = tpu.transpose %57, [1, 0, 2] : vector<8x4x8xf32> -> vector<4x8x8xf32>
      %c0_49 = arith.constant 0 : index
      %64 = arith.index_cast %59 : i32 to index
      %c0_50 = arith.constant 0 : index
      %65 = vector.load %arg17[%c0_49, %64, %c0_50] : memref<4x8x8xf32, #tpu.memory_space<vmem>>, vector<4x8x8xf32>
      tpu.vector_store %arg17[%c0_49, %64, %c0_50], %63 {strides = array<i32>} : memref<4x8x8xf32, #tpu.memory_space<vmem>>, vector<4x8x8xf32>,
    } else {
    }
    %c0_i32_1 = arith.constant 0 : i32
    %3 = arith.cmpi eq, %arg2, %c0_i32_1 : i32
    %4 = arith.extui %3 : i1 to i32
    %c0_i32_2 = arith.constant 0 : i32
    %5 = arith.cmpi ne, %4, %c0_i32_2 : i32
    scf.if %5 {
      %c0_38 = arith.constant 0 : index
      %c0_39 = arith.constant 0 : index
      %c0_40 = arith.constant 0 : index
      %45 = vector.load %arg3[%c0_38, %c0_39, %c0_40] : memref<1x8x32xf32, #tpu.memory_space<vmem>>, vector<1x8x32xf32>
      %46 = vector.shape_cast %45 : vector<1x8x32xf32> to vector<8x32xf32>
      %c0_41 = arith.constant 0 : index
      %c0_42 = arith.constant 0 : index
      %47 = vector.load %arg6[%c0_41, %c0_42] : memref<32x32xf32, #tpu.memory_space<vmem>>, vector<32x32xf32>
      %cst_43 = arith.constant dense<0.000000e+00> : vector<8x32xf32>
      %48 = tpu.matmul %46, %47, %cst_43 {dimension_numbers = #tpu.dot_dimension_numbers<[1], [0], [0], [1], [0, 0, 1, 1], [], []>} : vector<8x32xf32>, vector<32x32xf32>, vector<8x32xf32> -> vector<8x32xf32>
      %c0_44 = arith.constant 0 : index
      %c0_45 = arith.constant 0 : index
      %49 = vector.load %arg7[%c0_44, %c0_45] : memref<1x32xf32, #tpu.memory_space<vmem>>, vector<1x32xf32>
      %50 = vector.shape_cast %49 : vector<1x32xf32> to vector<32xf32>
      %51 = vector.shape_cast %50 : vector<32xf32> to vector<1x32xf32>
      %52 = vector.broadcast %51 : vector<1x32xf32> to vector<8x32xf32>
      %53 = arith.addf %48, %52 : vector<8x32xf32>
      %54 = vector.shape_cast %53 : vector<8x32xf32> to vector<8x4x8xf32>
      %55 = tpu.transpose %54, [1, 0, 2] : vector<8x4x8xf32> -> vector<4x8x8xf32>
      %c0_46 = arith.constant 0 : index
      %c0_47 = arith.constant 0 : index
      %c0_48 = arith.constant 0 : index
      %56 = vector.load %arg15[%c0_46, %c0_47, %c0_48] : memref<4x8x8xf32, #tpu.memory_space<vmem>>, vector<4x8x8xf32>
      tpu.vector_store %arg15[%c0_46, %c0_47, %c0_48], %55 {strides = array<i32>} : memref<4x8x8xf32, #tpu.memory_space<vmem>>, vector<4x8x8xf32>,
      %cst_49 = arith.constant 0xFF800000 : f32
      %57 = vector.broadcast %cst_49 : f32 to vector<4x8x1xf32>
      %c0_50 = arith.constant 0 : index
      %c0_51 = arith.constant 0 : index
      %c0_52 = arith.constant 0 : index
      %58 = vector.load %arg18[%c0_50, %c0_51, %c0_52] : memref<4x8x1xf32, #tpu.memory_space<vmem>>, vector<4x8x1xf32>
      tpu.vector_store %arg18[%c0_50, %c0_51, %c0_52], %57 {strides = array<i32>} : memref<4x8x1xf32, #tpu.memory_space<vmem>>, vector<4x8x1xf32>,
      %cst_53 = arith.constant 0.000000e+00 : f32
      %59 = vector.broadcast %cst_53 : f32 to vector<4x8x1xf32>
      %c0_54 = arith.constant 0 : index
      %c0_55 = arith.constant 0 : index
      %c0_56 = arith.constant 0 : index
      %60 = vector.load %arg19[%c0_54, %c0_55, %c0_56] : memref<4x8x1xf32, #tpu.memory_space<vmem>>, vector<4x8x1xf32>
      tpu.vector_store %arg19[%c0_54, %c0_55, %c0_56], %59 {strides = array<i32>} : memref<4x8x1xf32, #tpu.memory_space<vmem>>, vector<4x8x1xf32>,
      %cst_57 = arith.constant 0.000000e+00 : f32
      %61 = vector.broadcast %cst_57 : f32 to vector<4x8x8xf32>
      %c0_58 = arith.constant 0 : index
      %c0_59 = arith.constant 0 : index
      %c0_60 = arith.constant 0 : index
      %62 = vector.load %arg20[%c0_58, %c0_59, %c0_60] : memref<4x8x8xf32, #tpu.memory_space<vmem>>, vector<4x8x8xf32>
      tpu.vector_store %arg20[%c0_58, %c0_59, %c0_60], %61 {strides = array<i32>} : memref<4x8x8xf32, #tpu.memory_space<vmem>>, vector<4x8x8xf32>,
    } else {
    }
    %c8_i32 = arith.constant 8 : i32
    %6 = arith.muli %arg2, %c8_i32 : i32
    %7 = tpu.assume_multiple %6, 8 : i32
    %c0 = arith.constant 0 : index
    %8 = arith.index_cast %7 : i32 to index
    %c0_3 = arith.constant 0 : index
    %9 = vector.load %arg16[%c0, %8, %c0_3] : memref<4x8x8xf32, #tpu.memory_space<vmem>>, vector<4x8x8xf32>
    %c0_4 = arith.constant 0 : index
    %10 = arith.index_cast %7 : i32 to index
    %c0_5 = arith.constant 0 : index
    %11 = vector.load %arg17[%c0_4, %10, %c0_5] : memref<4x8x8xf32, #tpu.memory_space<vmem>>, vector<4x8x8xf32>
    %c0_6 = arith.constant 0 : index
    %c0_7 = arith.constant 0 : index
    %c0_8 = arith.constant 0 : index
    %12 = vector.load %arg15[%c0_6, %c0_7, %c0_8] : memref<4x8x8xf32, #tpu.memory_space<vmem>>, vector<4x8x8xf32>
    "tpu.trace_start"() <{level = 10 : i32, message = "hqd,hkd->hqk"}> : () -> ()
    %cst = arith.constant dense<0.000000e+00> : vector<4x8x8xf32>
    %13 = tpu.matmul %12, %9, %cst {dimension_numbers = #tpu.dot_dimension_numbers<[2], [2], [1], [1], [0, 0, 0, 1, 1, 1], [0], [0]>} : vector<4x8x8xf32>, vector<4x8x8xf32>, vector<4x8x8xf32> -> vector<4x8x8xf32>
    "tpu.trace_stop"() : () -> ()
    %c0_9 = arith.constant 0 : index
    %c0_10 = arith.constant 0 : index
    %c0_11 = arith.constant 0 : index
    %14 = vector.load %arg5[%c0_9, %c0_10, %c0_11] : memref<1x8x8xf32, #tpu.memory_space<vmem>>, vector<1x8x8xf32>
    %15 = vector.shape_cast %14 : vector<1x8x8xf32> to vector<8x8xf32>
    %16 = vector.shape_cast %15 : vector<8x8xf32> to vector<1x8x8xf32>
    %17 = vector.broadcast %16 : vector<1x8x8xf32> to vector<4x8x8xf32>
    %18 = arith.addf %13, %17 : vector<4x8x8xf32>
    %c0_12 = arith.constant 0 : index
    %c0_13 = arith.constant 0 : index
    %c0_14 = arith.constant 0 : index
    %19 = vector.load %arg18[%c0_12, %c0_13, %c0_14] : memref<4x8x1xf32, #tpu.memory_space<vmem>>, vector<4x8x1xf32>
    %cst_15 = arith.constant dense<0xFF800000> : vector<4x8xf32>
    %20 = vector.multi_reduction <maximumf>, %18, %cst_15 [2] : vector<4x8x8xf32> to vector<4x8xf32>
    %21 = vector.shape_cast %20 : vector<4x8xf32> to vector<4x8x1xf32>
    %22 = arith.maximumf %19, %21 : vector<4x8x1xf32>
    %c0_16 = arith.constant 0 : index
    %c0_17 = arith.constant 0 : index
    %c0_18 = arith.constant 0 : index
    %23 = vector.load %arg18[%c0_16, %c0_17, %c0_18] : memref<4x8x1xf32, #tpu.memory_space<vmem>>, vector<4x8x1xf32>
    %24 = arith.subf %23, %22 : vector<4x8x1xf32>
    %25 = math.exp %24 : vector<4x8x1xf32>
    %26 = vector.broadcast %22 : vector<4x8x1xf32> to vector<4x8x8xf32>
    %27 = arith.subf %18, %26 : vector<4x8x8xf32>
    %28 = math.exp %27 : vector<4x8x8xf32>
    %c0_19 = arith.constant 0 : index
    %c0_20 = arith.constant 0 : index
    %c0_21 = arith.constant 0 : index
    %29 = vector.load %arg19[%c0_19, %c0_20, %c0_21] : memref<4x8x1xf32, #tpu.memory_space<vmem>>, vector<4x8x1xf32>
    %30 = arith.mulf %25, %29 : vector<4x8x1xf32>
    %cst_22 = arith.constant dense<0.000000e+00> : vector<4x8xf32>
    %31 = vector.multi_reduction <add>, %28, %cst_22 [2] : vector<4x8x8xf32> to vector<4x8xf32>
    %32 = vector.shape_cast %31 : vector<4x8xf32> to vector<4x8x1xf32>
    %33 = arith.addf %30, %32 : vector<4x8x1xf32>
    %c0_23 = arith.constant 0 : index
    %c0_24 = arith.constant 0 : index
    %c0_25 = arith.constant 0 : index
    %34 = vector.load %arg19[%c0_23, %c0_24, %c0_25] : memref<4x8x1xf32, #tpu.memory_space<vmem>>, vector<4x8x1xf32>
    tpu.vector_store %arg19[%c0_23, %c0_24, %c0_25], %33 {strides = array<i32>} : memref<4x8x1xf32, #tpu.memory_space<vmem>>, vector<4x8x1xf32>,
    %c0_26 = arith.constant 0 : index
    %c0_27 = arith.constant 0 : index
    %c0_28 = arith.constant 0 : index
    %35 = vector.load %arg20[%c0_26, %c0_27, %c0_28] : memref<4x8x8xf32, #tpu.memory_space<vmem>>, vector<4x8x8xf32>
    %36 = vector.broadcast %25 : vector<4x8x1xf32> to vector<4x8x8xf32>
    %37 = arith.mulf %36, %35 : vector<4x8x8xf32>
    "tpu.trace_start"() <{level = 10 : i32, message = "hqk,hkd->hqd"}> : () -> ()
    %cst_29 = arith.constant dense<0.000000e+00> : vector<4x8x8xf32>
    %38 = tpu.matmul %28, %11, %cst_29 {dimension_numbers = #tpu.dot_dimension_numbers<[2], [1], [1], [2], [0, 0, 0, 1, 1, 2], [0], [0]>} : vector<4x8x8xf32>, vector<4x8x8xf32>, vector<4x8x8xf32> -> vector<4x8x8xf32>
    "tpu.trace_stop"() : () -> ()
    %39 = arith.addf %37, %38 : vector<4x8x8xf32>
    %c0_30 = arith.constant 0 : index
    %c0_31 = arith.constant 0 : index
    %c0_32 = arith.constant 0 : index
    %40 = vector.load %arg20[%c0_30, %c0_31, %c0_32] : memref<4x8x8xf32, #tpu.memory_space<vmem>>, vector<4x8x8xf32>
    tpu.vector_store %arg20[%c0_30, %c0_31, %c0_32], %39 {strides = array<i32>} : memref<4x8x8xf32, #tpu.memory_space<vmem>>, vector<4x8x8xf32>,
    %c0_33 = arith.constant 0 : index
    %c0_34 = arith.constant 0 : index
    %c0_35 = arith.constant 0 : index
    %41 = vector.load %arg18[%c0_33, %c0_34, %c0_35] : memref<4x8x1xf32, #tpu.memory_space<vmem>>, vector<4x8x1xf32>
    tpu.vector_store %arg18[%c0_33, %c0_34, %c0_35], %22 {strides = array<i32>} : memref<4x8x1xf32, #tpu.memory_space<vmem>>, vector<4x8x1xf32>,
    %c0_i32_36 = arith.constant 0 : i32
    %42 = arith.cmpi eq, %arg2, %c0_i32_36 : i32
    %43 = arith.extui %42 : i1 to i32
    %c0_i32_37 = arith.constant 0 : i32
    %44 = arith.cmpi ne, %43, %c0_i32_37 : i32
    scf.if %44 {
      %c0_38 = arith.constant 0 : index
      %c0_39 = arith.constant 0 : index
      %c0_40 = arith.constant 0 : index
      %45 = vector.load %arg20[%c0_38, %c0_39, %c0_40] : memref<4x8x8xf32, #tpu.memory_space<vmem>>, vector<4x8x8xf32>
      %c0_41 = arith.constant 0 : index
      %c0_42 = arith.constant 0 : index
      %c0_43 = arith.constant 0 : index
      %46 = vector.load %arg19[%c0_41, %c0_42, %c0_43] : memref<4x8x1xf32, #tpu.memory_space<vmem>>, vector<4x8x1xf32>
      %47 = tpu.reciprocal %46 : vector<4x8x1xf32> -> vector<4x8x1xf32>
      %48 = vector.broadcast %47 : vector<4x8x1xf32> to vector<4x8x8xf32>
      %49 = arith.mulf %45, %48 : vector<4x8x8xf32>
      %50 = tpu.transpose %49, [1, 0, 2] : vector<4x8x8xf32> -> vector<8x4x8xf32>
      %51 = vector.shape_cast %50 : vector<8x4x8xf32> to vector<8x32xf32>
      %c0_44 = arith.constant 0 : index
      %c0_45 = arith.constant 0 : index
      %52 = vector.load %arg10[%c0_44, %c0_45] : memref<32x32xf32, #tpu.memory_space<vmem>>, vector<32x32xf32>
      %cst_46 = arith.constant dense<0.000000e+00> : vector<8x32xf32>
      %53 = tpu.matmul %51, %52, %cst_46 {dimension_numbers = #tpu.dot_dimension_numbers<[1], [0], [0], [1], [0, 0, 1, 1], [], []>} : vector<8x32xf32>, vector<32x32xf32>, vector<8x32xf32> -> vector<8x32xf32>
      %c0_47 = arith.constant 0 : index
      %c0_48 = arith.constant 0 : index
      %54 = vector.load %arg11[%c0_47, %c0_48] : memref<1x32xf32, #tpu.memory_space<vmem>>, vector<1x32xf32>
      %55 = vector.shape_cast %54 : vector<1x32xf32> to vector<32xf32>
      %56 = vector.shape_cast %55 : vector<32xf32> to vector<1x32xf32>
      %57 = vector.broadcast %56 : vector<1x32xf32> to vector<8x32xf32>
      %58 = arith.addf %53, %57 : vector<8x32xf32>
      %c0_49 = arith.constant 0 : index
      %c0_50 = arith.constant 0 : index
      %c0_51 = arith.constant 0 : index
      %59 = vector.load %arg3[%c0_49, %c0_50, %c0_51] : memref<1x8x32xf32, #tpu.memory_space<vmem>>, vector<1x8x32xf32>
      %60 = vector.shape_cast %59 : vector<1x8x32xf32> to vector<8x32xf32>
      %61 = arith.addf %58, %60 : vector<8x32xf32>
      %cst_52 = arith.constant dense<0.000000e+00> : vector<8xf32>
      %62 = vector.multi_reduction <add>, %61, %cst_52 [1] : vector<8x32xf32> to vector<8xf32>
      %63 = vector.shape_cast %62 : vector<8xf32> to vector<8x1xf32>
      %cst_53 = arith.constant 3.200000e+01 : f32
      %64 = vector.broadcast %cst_53 : f32 to vector<8x1xf32>
      %65 = arith.divf %63, %64 : vector<8x1xf32>
      %66 = vector.broadcast %65 : vector<8x1xf32> to vector<8x32xf32>
      %67 = arith.subf %61, %66 : vector<8x32xf32>
      %68 = arith.mulf %67, %67 : vector<8x32xf32>
      %cst_54 = arith.constant dense<0.000000e+00> : vector<8xf32>
      %69 = vector.multi_reduction <add>, %68, %cst_54 [1] : vector<8x32xf32> to vector<8xf32>
      %70 = vector.shape_cast %69 : vector<8xf32> to vector<8x1xf32>
      %cst_55 = arith.constant 3.200000e+01 : f32
      %71 = vector.broadcast %cst_55 : f32 to vector<8x1xf32>
      %72 = arith.divf %70, %71 : vector<8x1xf32>
      %73 = vector.broadcast %65 : vector<8x1xf32> to vector<8x32xf32>
      %74 = arith.subf %61, %73 : vector<8x32xf32>
      %cst_56 = arith.constant 9.99999996E-13 : f32
      %75 = vector.broadcast %cst_56 : f32 to vector<8x1xf32>
      %76 = arith.addf %72, %75 : vector<8x1xf32>
      %77 = math.rsqrt %76 : vector<8x1xf32>
      %78 = vector.broadcast %77 : vector<8x1xf32> to vector<8x32xf32>
      %79 = arith.mulf %74, %78 : vector<8x32xf32>
      %c0_57 = arith.constant 0 : index
      %c0_58 = arith.constant 0 : index
      %80 = vector.load %arg12[%c0_57, %c0_58] : memref<1x32xf32, #tpu.memory_space<vmem>>, vector<1x32xf32>
      %81 = vector.shape_cast %80 : vector<1x32xf32> to vector<32xf32>
      %82 = vector.shape_cast %81 : vector<32xf32> to vector<1x32xf32>
      %83 = vector.broadcast %82 : vector<1x32xf32> to vector<8x32xf32>
      %84 = arith.mulf %79, %83 : vector<8x32xf32>
      %c0_59 = arith.constant 0 : index
      %c0_60 = arith.constant 0 : index
      %85 = vector.load %arg13[%c0_59, %c0_60] : memref<1x32xf32, #tpu.memory_space<vmem>>, vector<1x32xf32>
      %86 = vector.shape_cast %85 : vector<1x32xf32> to vector<32xf32>
      %87 = vector.shape_cast %86 : vector<32xf32> to vector<1x32xf32>
      %88 = vector.broadcast %87 : vector<1x32xf32> to vector<8x32xf32>
      %89 = arith.addf %84, %88 : vector<8x32xf32>
      %c0_61 = arith.constant 0 : index
      %c0_62 = arith.constant 0 : index
      %c0_63 = arith.constant 0 : index
      %90 = vector.load %arg14[%c0_61, %c0_62, %c0_63] : memref<1x8x32xf32, #tpu.memory_space<vmem>>, vector<1x8x32xf32>
      %91 = vector.shape_cast %90 : vector<1x8x32xf32> to vector<8x32xf32>
      %92 = vector.shape_cast %89 : vector<8x32xf32> to vector<1x8x32xf32>
      tpu.vector_store %arg14[%c0_61, %c0_62, %c0_63], %92 {strides = array<i32>} : memref<1x8x32xf32, #tpu.memory_space<vmem>>, vector<1x8x32xf32>,
    } else {
    }
    return
  }
  func.func @transform_0(%arg0: i32, %arg1: i32, %arg2: i32) -> (i32, i32, i32) {
    %c0_i32 = arith.constant 0 : i32
    %c0_i32_0 = arith.constant 0 : i32
    return %arg0, %arg1, %c0_i32 : i32, i32, i32
  }
  func.func @transform_1(%arg0: i32, %arg1: i32, %arg2: i32) -> (i32, i32, i32) {
    %c0_i32 = arith.constant 0 : i32
    %0 = arith.cmpi eq, %arg1, %c0_i32 : i32
    %c0_i32_0 = arith.constant 0 : i32
    %1 = arith.select %0, %arg2, %c0_i32_0 : i32
    %c0_i32_1 = arith.constant 0 : i32
    %c0_i32_2 = arith.constant 0 : i32
    return %arg0, %1, %c0_i32_1 : i32, i32, i32
  }
  func.func @transform_2(%arg0: i32, %arg1: i32, %arg2: i32) -> (i32, i32, i32) {
    %c0_i32 = arith.constant 0 : i32
    return %arg0, %arg1, %arg2 : i32, i32, i32
  }
  func.func @transform_3(%arg0: i32, %arg1: i32, %arg2: i32) -> (i32, i32) {
    %c0_i32 = arith.constant 0 : i32
    %c0_i32_0 = arith.constant 0 : i32
    %c0_i32_1 = arith.constant 0 : i32
    return %c0_i32, %c0_i32_0 : i32, i32
  }
  func.func @transform_4(%arg0: i32, %arg1: i32, %arg2: i32) -> (i32, i32) {
    %c0_i32 = arith.constant 0 : i32
    %c0_i32_0 = arith.constant 0 : i32
    %c0_i32_1 = arith.constant 0 : i32
    return %c0_i32, %c0_i32_0 : i32, i32
  }
  func.func @transform_5(%arg0: i32, %arg1: i32, %arg2: i32) -> (i32, i32) {
    %c0_i32 = arith.constant 0 : i32
    %c0_i32_0 = arith.constant 0 : i32
    %c0_i32_1 = arith.constant 0 : i32
    return %c0_i32, %c0_i32_0 : i32, i32
  }
  func.func @transform_6(%arg0: i32, %arg1: i32, %arg2: i32) -> (i32, i32) {
    %c0_i32 = arith.constant 0 : i32
    %c0_i32_0 = arith.constant 0 : i32
    %c0_i32_1 = arith.constant 0 : i32
    return %c0_i32, %c0_i32_0 : i32, i32
  }
  func.func @transform_7(%arg0: i32, %arg1: i32, %arg2: i32) -> (i32, i32) {
    %c0_i32 = arith.constant 0 : i32
    %c0_i32_0 = arith.constant 0 : i32
    %c0_i32_1 = arith.constant 0 : i32
    return %c0_i32, %c0_i32_0 : i32, i32
  }
  func.func @transform_8(%arg0: i32, %arg1: i32, %arg2: i32) -> (i32, i32) {
    %c0_i32 = arith.constant 0 : i32
    %c0_i32_0 = arith.constant 0 : i32
    %c0_i32_1 = arith.constant 0 : i32
    return %c0_i32, %c0_i32_0 : i32, i32
  }
  func.func @transform_9(%arg0: i32, %arg1: i32, %arg2: i32) -> (i32, i32) {
    %c0_i32 = arith.constant 0 : i32
    %c0_i32_0 = arith.constant 0 : i32
    %c0_i32_1 = arith.constant 0 : i32
    return %c0_i32, %c0_i32_0 : i32, i32
  }
  func.func @transform_10(%arg0: i32, %arg1: i32, %arg2: i32) -> (i32, i32) {
    %c0_i32 = arith.constant 0 : i32
    %c0_i32_0 = arith.constant 0 : i32
    %c0_i32_1 = arith.constant 0 : i32
    return %c0_i32, %c0_i32_0 : i32, i32
  }
  func.func @transform_11(%arg0: i32, %arg1: i32, %arg2: i32) -> (i32, i32, i32) {
    %c0_i32 = arith.constant 0 : i32
    %c0_i32_0 = arith.constant 0 : i32
    return %arg0, %arg1, %c0_i32 : i32, i32, i32
  }
}

module attributes {stable_mosaic.version = 11 : i64} {
  func.func @mha_flash_kernel(%arg0: i32, %arg1: i32, %arg2: i32, %arg3: memref<1x8x32xf32, #tpu.memory_space<vmem>>, %arg4: memref<1x8x32xf32, #tpu.memory_space<vmem>>, %arg5: memref<1x8x8xf32, #tpu.memory_space<vmem>>, %arg6: memref<32x32xf32, #tpu.memory_space<vmem>>, %arg7: memref<1x32xf32, #tpu.memory_space<vmem>>, %arg8: memref<32x64xf32, #tpu.memory_space<vmem>>, %arg9: memref<1x64xf32, #tpu.memory_space<vmem>>, %arg10: memref<32x32xf32, #tpu.memory_space<vmem>>, %arg11: memref<1x32xf32, #tpu.memory_space<vmem>>, %arg12: memref<1x32xf32, #tpu.memory_space<vmem>>, %arg13: memref<1x32xf32, #tpu.memory_space<vmem>>, %arg14: memref<1x8x32xf32, #tpu.memory_space<vmem>>, %arg15: memref<4x8x8xf32, #tpu.memory_space<vmem>>, %arg16: memref<4x8x8xf32, #tpu.memory_space<vmem>>, %arg17: memref<4x8x8xf32, #tpu.memory_space<vmem>>, %arg18: memref<4x8x1xf32, #tpu.memory_space<vmem>>, %arg19: memref<4x8x1xf32, #tpu.memory_space<vmem>>, %arg20: memref<4x8x8xf32, #tpu.memory_space<vmem>>) attributes {dimension_semantics = [#tpu.dimension_semantics<parallel>, #tpu.dimension_semantics<arbitrary>, #tpu.dimension_semantics<arbitrary>], iteration_bounds = array<i64: 2, 1, 1>, scalar_prefetch = 0 : i64, scratch_operands = 6 : i64, tpu.core_type = #tpu.core_type<tc>, window_params = [{transform_indices = @transform_0, window_bounds = array<i64: 1, 8, 32>}, {transform_indices = @transform_1, window_bounds = array<i64: 1, 8, 32>}, {transform_indices = @transform_2, window_bounds = array<i64: 1, 8, 8>}, {pipeline_mode = #tpu.pipeline_mode<synchronous>, transform_indices = @transform_3, window_bounds = array<i64: 32, 32>}, {pipeline_mode = #tpu.pipeline_mode<synchronous>, transform_indices = @transform_4, window_bounds = array<i64: 1, 32>}, {pipeline_mode = #tpu.pipeline_mode<synchronous>, transform_indices = @transform_5, window_bounds = array<i64: 32, 64>}, {pipeline_mode = #tpu.pipeline_mode<synchronous>, transform_indices = @transform_6, window_bounds = array<i64: 1, 64>}, {pipeline_mode = #tpu.pipeline_mode<synchronous>, transform_indices = @transform_7, window_bounds = array<i64: 32, 32>}, {pipeline_mode = #tpu.pipeline_mode<synchronous>, transform_indices = @transform_8, window_bounds = array<i64: 1, 32>}, {pipeline_mode = #tpu.pipeline_mode<synchronous>, transform_indices = @transform_9, window_bounds = array<i64: 1, 32>}, {pipeline_mode = #tpu.pipeline_mode<synchronous>, transform_indices = @transform_10, window_bounds = array<i64: 1, 32>}, {transform_indices = @transform_11, window_bounds = array<i64: 1, 8, 32>}]} {
    %c0_i32 = arith.constant 0 : i32
    %0 = arith.cmpi eq, %arg1, %c0_i32 : i32
    %1 = arith.extui %0 : i1 to i32
    %c0_i32_0 = arith.constant 0 : i32
    %2 = arith.cmpi ne, %1, %c0_i32_0 : i32
    scf.if %2 {
      %c0_38 = arith.constant 0 : index
      %c0_39 = arith.constant 0 : index
      %c0_40 = arith.constant 0 : index
      %45 = vector.load %arg4[%c0_38, %c0_39, %c0_40] : memref<1x8x32xf32, #tpu.memory_space<vmem>>, vector<1x8x32xf32>
      %46 = vector.shape_cast %45 : vector<1x8x32xf32> to vector<8x32xf32>
      %c0_41 = arith.constant 0 : index
      %c0_42 = arith.constant 0 : index
      %47 = vector.load %arg8[%c0_41, %c0_42] : memref<32x64xf32, #tpu.memory_space<vmem>>, vector<32x64xf32>
      %cst_43 = arith.constant dense<0.000000e+00> : vector<8x64xf32>
      %48 = tpu.matmul %46, %47, %cst_43 {dimension_numbers = #tpu.dot_dimension_numbers<[1], [0], [0], [1], [0, 0, 1, 1], [], []>} : vector<8x32xf32>, vector<32x64xf32>, vector<8x64xf32> -> vector<8x64xf32>
      %c0_44 = arith.constant 0 : index
      %c0_45 = arith.constant 0 : index
      %49 = vector.load %arg9[%c0_44, %c0_45] : memref<1x64xf32, #tpu.memory_space<vmem>>, vector<1x64xf32>
      %50 = vector.shape_cast %49 : vector<1x64xf32> to vector<64xf32>
      %51 = vector.shape_cast %50 : vector<64xf32> to vector<1x64xf32>
      %52 = vector.broadcast %51 : vector<1x64xf32> to vector<8x64xf32>
      %53 = arith.addf %48, %52 : vector<8x64xf32>
      %54 = vector.extract_strided_slice %53 {offsets = [0, 0], sizes = [8, 32], strides = [1, 1]} : vector<8x64xf32> to vector<8x32xf32>
      %55 = vector.shape_cast %54 : vector<8x32xf32> to vector<8x4x8xf32>
      %56 = vector.extract_strided_slice %53 {offsets = [0, 32], sizes = [8, 32], strides = [1, 1]} : vector<8x64xf32> to vector<8x32xf32>
      %57 = vector.shape_cast %56 : vector<8x32xf32> to vector<8x4x8xf32>
      %c8_i32_46 = arith.constant 8 : i32
      %58 = arith.muli %arg2, %c8_i32_46 : i32
      %59 = tpu.assume_multiple %58, 8 : i32
      %60 = tpu.transpose %55, [1, 0, 2] : vector<8x4x8xf32> -> vector<4x8x8xf32>
      %c0_47 = arith.constant 0 : index
      %61 = arith.index_cast %59 : i32 to index
      %c0_48 = arith.constant 0 : index
      %62 = vector.load %arg16[%c0_47, %61, %c0_48] : memref<4x8x8xf32, #tpu.memory_space<vmem>>, vector<4x8x8xf32>
      tpu.vector_store %arg16[%c0_47, %61, %c0_48], %60 {strides = array<i32>} : memref<4x8x8xf32, #tpu.memory_space<vmem>>, vector<4x8x8xf32>,
      %63 = tpu.transpose %57, [1, 0, 2] : vector<8x4x8xf32> -> vector<4x8x8xf32>
      %c0_49 = arith.constant 0 : index
      %64 = arith.index_cast %59 : i32 to index
      %c0_50 = arith.constant 0 : index
      %65 = vector.load %arg17[%c0_49, %64, %c0_50] : memref<4x8x8xf32, #tpu.memory_space<vmem>>, vector<4x8x8xf32>
      tpu.vector_store %arg17[%c0_49, %64, %c0_50], %63 {strides = array<i32>} : memref<4x8x8xf32, #tpu.memory_space<vmem>>, vector<4x8x8xf32>,
    } else {
    }
    %c0_i32_1 = arith.constant 0 : i32
    %3 = arith.cmpi eq, %arg2, %c0_i32_1 : i32
    %4 = arith.extui %3 : i1 to i32
    %c0_i32_2 = arith.constant 0 : i32
    %5 = arith.cmpi ne, %4, %c0_i32_2 : i32
    scf.if %5 {
      %c0_38 = arith.constant 0 : index
      %c0_39 = arith.constant 0 : index
      %c0_40 = arith.constant 0 : index
      %45 = vector.load %arg3[%c0_38, %c0_39, %c0_40] : memref<1x8x32xf32, #tpu.memory_space<vmem>>, vector<1x8x32xf32>
      %46 = vector.shape_cast %45 : vector<1x8x32xf32> to vector<8x32xf32>
      %c0_41 = arith.constant 0 : index
      %c0_42 = arith.constant 0 : index
      %47 = vector.load %arg6[%c0_41, %c0_42] : memref<32x32xf32, #tpu.memory_space<vmem>>, vector<32x32xf32>
      %cst_43 = arith.constant dense<0.000000e+00> : vector<8x32xf32>
      %48 = tpu.matmul %46, %47, %cst_43 {dimension_numbers = #tpu.dot_dimension_numbers<[1], [0], [0], [1], [0, 0, 1, 1], [], []>} : vector<8x32xf32>, vector<32x32xf32>, vector<8x32xf32> -> vector<8x32xf32>
      %c0_44 = arith.constant 0 : index
      %c0_45 = arith.constant 0 : index
      %49 = vector.load %arg7[%c0_44, %c0_45] : memref<1x32xf32, #tpu.memory_space<vmem>>, vector<1x32xf32>
      %50 = vector.shape_cast %49 : vector<1x32xf32> to vector<32xf32>
      %51 = vector.shape_cast %50 : vector<32xf32> to vector<1x32xf32>
      %52 = vector.broadcast %51 : vector<1x32xf32> to vector<8x32xf32>
      %53 = arith.addf %48, %52 : vector<8x32xf32>
      %54 = vector.shape_cast %53 : vector<8x32xf32> to vector<8x4x8xf32>
      %55 = tpu.transpose %54, [1, 0, 2] : vector<8x4x8xf32> -> vector<4x8x8xf32>
      %c0_46 = arith.constant 0 : index
      %c0_47 = arith.constant 0 : index
      %c0_48 = arith.constant 0 : index
      %56 = vector.load %arg15[%c0_46, %c0_47, %c0_48] : memref<4x8x8xf32, #tpu.memory_space<vmem>>, vector<4x8x8xf32>
      tpu.vector_store %arg15[%c0_46, %c0_47, %c0_48], %55 {strides = array<i32>} : memref<4x8x8xf32, #tpu.memory_space<vmem>>, vector<4x8x8xf32>,
      %cst_49 = arith.constant 0xFF800000 : f32
      %57 = vector.broadcast %cst_49 : f32 to vector<4x8x1xf32>
      %c0_50 = arith.constant 0 : index
      %c0_51 = arith.constant 0 : index
      %c0_52 = arith.constant 0 : index
      %58 = vector.load %arg18[%c0_50, %c0_51, %c0_52] : memref<4x8x1xf32, #tpu.memory_space<vmem>>, vector<4x8x1xf32>
      tpu.vector_store %arg18[%c0_50, %c0_51, %c0_52], %57 {strides = array<i32>} : memref<4x8x1xf32, #tpu.memory_space<vmem>>, vector<4x8x1xf32>,
      %cst_53 = arith.constant 0.000000e+00 : f32
      %59 = vector.broadcast %cst_53 : f32 to vector<4x8x1xf32>
      %c0_54 = arith.constant 0 : index
      %c0_55 = arith.constant 0 : index
      %c0_56 = arith.constant 0 : index
      %60 = vector.load %arg19[%c0_54, %c0_55, %c0_56] : memref<4x8x1xf32, #tpu.memory_space<vmem>>, vector<4x8x1xf32>
      tpu.vector_store %arg19[%c0_54, %c0_55, %c0_56], %59 {strides = array<i32>} : memref<4x8x1xf32, #tpu.memory_space<vmem>>, vector<4x8x1xf32>,
      %cst_57 = arith.constant 0.000000e+00 : f32
      %61 = vector.broadcast %cst_57 : f32 to vector<4x8x8xf32>
      %c0_58 = arith.constant 0 : index
      %c0_59 = arith.constant 0 : index
      %c0_60 = arith.constant 0 : index
      %62 = vector.load %arg20[%c0_58, %c0_59, %c0_60] : memref<4x8x8xf32, #tpu.memory_space<vmem>>, vector<4x8x8xf32>
      tpu.vector_store %arg20[%c0_58, %c0_59, %c0_60], %61 {strides = array<i32>} : memref<4x8x8xf32, #tpu.memory_space<vmem>>, vector<4x8x8xf32>,
    } else {
    }
    %c8_i32 = arith.constant 8 : i32
    %6 = arith.muli %arg2, %c8_i32 : i32
    %7 = tpu.assume_multiple %6, 8 : i32
    %c0 = arith.constant 0 : index
    %8 = arith.index_cast %7 : i32 to index
    %c0_3 = arith.constant 0 : index
    %9 = vector.load %arg16[%c0, %8, %c0_3] : memref<4x8x8xf32, #tpu.memory_space<vmem>>, vector<4x8x8xf32>
    %c0_4 = arith.constant 0 : index
    %10 = arith.index_cast %7 : i32 to index
    %c0_5 = arith.constant 0 : index
    %11 = vector.load %arg17[%c0_4, %10, %c0_5] : memref<4x8x8xf32, #tpu.memory_space<vmem>>, vector<4x8x8xf32>
    %c0_6 = arith.constant 0 : index
    %c0_7 = arith.constant 0 : index
    %c0_8 = arith.constant 0 : index
    %12 = vector.load %arg15[%c0_6, %c0_7, %c0_8] : memref<4x8x8xf32, #tpu.memory_space<vmem>>, vector<4x8x8xf32>
    "tpu.trace_start"() <{level = 10 : i32, message = "hqd,hkd->hqk"}> : () -> ()
    %cst = arith.constant dense<0.000000e+00> : vector<4x8x8xf32>
    %13 = tpu.matmul %12, %9, %cst {dimension_numbers = #tpu.dot_dimension_numbers<[2], [2], [1], [1], [0, 0, 0, 1, 1, 1], [0], [0]>} : vector<4x8x8xf32>, vector<4x8x8xf32>, vector<4x8x8xf32> -> vector<4x8x8xf32>
    "tpu.trace_stop"() : () -> ()
    %c0_9 = arith.constant 0 : index
    %c0_10 = arith.constant 0 : index
    %c0_11 = arith.constant 0 : index
    %14 = vector.load %arg5[%c0_9, %c0_10, %c0_11] : memref<1x8x8xf32, #tpu.memory_space<vmem>>, vector<1x8x8xf32>
    %15 = vector.shape_cast %14 : vector<1x8x8xf32> to vector<8x8xf32>
    %16 = vector.shape_cast %15 : vector<8x8xf32> to vector<1x8x8xf32>
    %17 = vector.broadcast %16 : vector<1x8x8xf32> to vector<4x8x8xf32>
    %18 = arith.addf %13, %17 : vector<4x8x8xf32>
    %c0_12 = arith.constant 0 : index
    %c0_13 = arith.constant 0 : index
    %c0_14 = arith.constant 0 : index
    %19 = vector.load %arg18[%c0_12, %c0_13, %c0_14] : memref<4x8x1xf32, #tpu.memory_space<vmem>>, vector<4x8x1xf32>
    %cst_15 = arith.constant dense<0xFF800000> : vector<4x8xf32>
    %20 = vector.multi_reduction <maximumf>, %18, %cst_15 [2] : vector<4x8x8xf32> to vector<4x8xf32>
    %21 = vector.shape_cast %20 : vector<4x8xf32> to vector<4x8x1xf32>
    %22 = arith.maximumf %19, %21 : vector<4x8x1xf32>
    %c0_16 = arith.constant 0 : index
    %c0_17 = arith.constant 0 : index
    %c0_18 = arith.constant 0 : index
    %23 = vector.load %arg18[%c0_16, %c0_17, %c0_18] : memref<4x8x1xf32, #tpu.memory_space<vmem>>, vector<4x8x1xf32>
    %24 = arith.subf %23, %22 : vector<4x8x1xf32>
    %25 = math.exp %24 : vector<4x8x1xf32>
    %26 = vector.broadcast %22 : vector<4x8x1xf32> to vector<4x8x8xf32>
    %27 = arith.subf %18, %26 : vector<4x8x8xf32>
    %28 = math.exp %27 : vector<4x8x8xf32>
    %c0_19 = arith.constant 0 : index
    %c0_20 = arith.constant 0 : index
    %c0_21 = arith.constant 0 : index
    %29 = vector.load %arg19[%c0_19, %c0_20, %c0_21] : memref<4x8x1xf32, #tpu.memory_space<vmem>>, vector<4x8x1xf32>
    %30 = arith.mulf %25, %29 : vector<4x8x1xf32>
    %cst_22 = arith.constant dense<0.000000e+00> : vector<4x8xf32>
    %31 = vector.multi_reduction <add>, %28, %cst_22 [2] : vector<4x8x8xf32> to vector<4x8xf32>
    %32 = vector.shape_cast %31 : vector<4x8xf32> to vector<4x8x1xf32>
    %33 = arith.addf %30, %32 : vector<4x8x1xf32>
    %c0_23 = arith.constant 0 : index
    %c0_24 = arith.constant 0 : index
    %c0_25 = arith.constant 0 : index
    %34 = vector.load %arg19[%c0_23, %c0_24, %c0_25] : memref<4x8x1xf32, #tpu.memory_space<vmem>>, vector<4x8x1xf32>
    tpu.vector_store %arg19[%c0_23, %c0_24, %c0_25], %33 {strides = array<i32>} : memref<4x8x1xf32, #tpu.memory_space<vmem>>, vector<4x8x1xf32>,
    %c0_26 = arith.constant 0 : index
    %c0_27 = arith.constant 0 : index
    %c0_28 = arith.constant 0 : index
    %35 = vector.load %arg20[%c0_26, %c0_27, %c0_28] : memref<4x8x8xf32, #tpu.memory_space<vmem>>, vector<4x8x8xf32>
    %36 = vector.broadcast %25 : vector<4x8x1xf32> to vector<4x8x8xf32>
    %37 = arith.mulf %36, %35 : vector<4x8x8xf32>
    "tpu.trace_start"() <{level = 10 : i32, message = "hqk,hkd->hqd"}> : () -> ()
    %cst_29 = arith.constant dense<0.000000e+00> : vector<4x8x8xf32>
    %38 = tpu.matmul %28, %11, %cst_29 {dimension_numbers = #tpu.dot_dimension_numbers<[2], [1], [1], [2], [0, 0, 0, 1, 1, 2], [0], [0]>} : vector<4x8x8xf32>, vector<4x8x8xf32>, vector<4x8x8xf32> -> vector<4x8x8xf32>
    "tpu.trace_stop"() : () -> ()
    %39 = arith.addf %37, %38 : vector<4x8x8xf32>
    %c0_30 = arith.constant 0 : index
    %c0_31 = arith.constant 0 : index
    %c0_32 = arith.constant 0 : index
    %40 = vector.load %arg20[%c0_30, %c0_31, %c0_32] : memref<4x8x8xf32, #tpu.memory_space<vmem>>, vector<4x8x8xf32>
    tpu.vector_store %arg20[%c0_30, %c0_31, %c0_32], %39 {strides = array<i32>} : memref<4x8x8xf32, #tpu.memory_space<vmem>>, vector<4x8x8xf32>,
    %c0_33 = arith.constant 0 : index
    %c0_34 = arith.constant 0 : index
    %c0_35 = arith.constant 0 : index
    %41 = vector.load %arg18[%c0_33, %c0_34, %c0_35] : memref<4x8x1xf32, #tpu.memory_space<vmem>>, vector<4x8x1xf32>
    tpu.vector_store %arg18[%c0_33, %c0_34, %c0_35], %22 {strides = array<i32>} : memref<4x8x1xf32, #tpu.memory_space<vmem>>, vector<4x8x1xf32>,
    %c0_i32_36 = arith.constant 0 : i32
    %42 = arith.cmpi eq, %arg2, %c0_i32_36 : i32
    %43 = arith.extui %42 : i1 to i32
    %c0_i32_37 = arith.constant 0 : i32
    %44 = arith.cmpi ne, %43, %c0_i32_37 : i32
    scf.if %44 {
      %c0_38 = arith.constant 0 : index
      %c0_39 = arith.constant 0 : index
      %c0_40 = arith.constant 0 : index
      %45 = vector.load %arg20[%c0_38, %c0_39, %c0_40] : memref<4x8x8xf32, #tpu.memory_space<vmem>>, vector<4x8x8xf32>
      %c0_41 = arith.constant 0 : index
      %c0_42 = arith.constant 0 : index
      %c0_43 = arith.constant 0 : index
      %46 = vector.load %arg19[%c0_41, %c0_42, %c0_43] : memref<4x8x1xf32, #tpu.memory_space<vmem>>, vector<4x8x1xf32>
      %47 = tpu.reciprocal %46 : vector<4x8x1xf32> -> vector<4x8x1xf32>
      %48 = vector.broadcast %47 : vector<4x8x1xf32> to vector<4x8x8xf32>
      %49 = arith.mulf %45, %48 : vector<4x8x8xf32>
      %50 = tpu.transpose %49, [1, 0, 2] : vector<4x8x8xf32> -> vector<8x4x8xf32>
      %51 = vector.shape_cast %50 : vector<8x4x8xf32> to vector<8x32xf32>
      %c0_44 = arith.constant 0 : index
      %c0_45 = arith.constant 0 : index
      %52 = vector.load %arg10[%c0_44, %c0_45] : memref<32x32xf32, #tpu.memory_space<vmem>>, vector<32x32xf32>
      %cst_46 = arith.constant dense<0.000000e+00> : vector<8x32xf32>
      %53 = tpu.matmul %51, %52, %cst_46 {dimension_numbers = #tpu.dot_dimension_numbers<[1], [0], [0], [1], [0, 0, 1, 1], [], []>} : vector<8x32xf32>, vector<32x32xf32>, vector<8x32xf32> -> vector<8x32xf32>
      %c0_47 = arith.constant 0 : index
      %c0_48 = arith.constant 0 : index
      %54 = vector.load %arg11[%c0_47, %c0_48] : memref<1x32xf32, #tpu.memory_space<vmem>>, vector<1x32xf32>
      %55 = vector.shape_cast %54 : vector<1x32xf32> to vector<32xf32>
      %56 = vector.shape_cast %55 : vector<32xf32> to vector<1x32xf32>
      %57 = vector.broadcast %56 : vector<1x32xf32> to vector<8x32xf32>
      %58 = arith.addf %53, %57 : vector<8x32xf32>
      %c0_49 = arith.constant 0 : index
      %c0_50 = arith.constant 0 : index
      %c0_51 = arith.constant 0 : index
      %59 = vector.load %arg3[%c0_49, %c0_50, %c0_51] : memref<1x8x32xf32, #tpu.memory_space<vmem>>, vector<1x8x32xf32>
      %60 = vector.shape_cast %59 : vector<1x8x32xf32> to vector<8x32xf32>
      %61 = arith.addf %58, %60 : vector<8x32xf32>
      %cst_52 = arith.constant dense<0.000000e+00> : vector<8xf32>
      %62 = vector.multi_reduction <add>, %61, %cst_52 [1] : vector<8x32xf32> to vector<8xf32>
      %63 = vector.shape_cast %62 : vector<8xf32> to vector<8x1xf32>
      %cst_53 = arith.constant 3.200000e+01 : f32
      %64 = vector.broadcast %cst_53 : f32 to vector<8x1xf32>
      %65 = arith.divf %63, %64 : vector<8x1xf32>
      %66 = vector.broadcast %65 : vector<8x1xf32> to vector<8x32xf32>
      %67 = arith.subf %61, %66 : vector<8x32xf32>
      %68 = arith.mulf %67, %67 : vector<8x32xf32>
      %cst_54 = arith.constant dense<0.000000e+00> : vector<8xf32>
      %69 = vector.multi_reduction <add>, %68, %cst_54 [1] : vector<8x32xf32> to vector<8xf32>
      %70 = vector.shape_cast %69 : vector<8xf32> to vector<8x1xf32>
      %cst_55 = arith.constant 3.200000e+01 : f32
      %71 = vector.broadcast %cst_55 : f32 to vector<8x1xf32>
      %72 = arith.divf %70, %71 : vector<8x1xf32>
      %73 = vector.broadcast %65 : vector<8x1xf32> to vector<8x32xf32>
      %74 = arith.subf %61, %73 : vector<8x32xf32>
      %cst_56 = arith.constant 9.99999996E-13 : f32
      %75 = vector.broadcast %cst_56 : f32 to vector<8x1xf32>
      %76 = arith.addf %72, %75 : vector<8x1xf32>
      %77 = math.rsqrt %76 : vector<8x1xf32>
      %78 = vector.broadcast %77 : vector<8x1xf32> to vector<8x32xf32>
      %79 = arith.mulf %74, %78 : vector<8x32xf32>
      %c0_57 = arith.constant 0 : index
      %c0_58 = arith.constant 0 : index
      %80 = vector.load %arg12[%c0_57, %c0_58] : memref<1x32xf32, #tpu.memory_space<vmem>>, vector<1x32xf32>
      %81 = vector.shape_cast %80 : vector<1x32xf32> to vector<32xf32>
      %82 = vector.shape_cast %81 : vector<32xf32> to vector<1x32xf32>
      %83 = vector.broadcast %82 : vector<1x32xf32> to vector<8x32xf32>
      %84 = arith.mulf %79, %83 : vector<8x32xf32>
      %c0_59 = arith.constant 0 : index
      %c0_60 = arith.constant 0 : index
      %85 = vector.load %arg13[%c0_59, %c0_60] : memref<1x32xf32, #tpu.memory_space<vmem>>, vector<1x32xf32>
      %86 = vector.shape_cast %85 : vector<1x32xf32> to vector<32xf32>
      %87 = vector.shape_cast %86 : vector<32xf32> to vector<1x32xf32>
      %88 = vector.broadcast %87 : vector<1x32xf32> to vector<8x32xf32>
      %89 = arith.addf %84, %88 : vector<8x32xf32>
      %c0_61 = arith.constant 0 : index
      %c0_62 = arith.constant 0 : index
      %c0_63 = arith.constant 0 : index
      %90 = vector.load %arg14[%c0_61, %c0_62, %c0_63] : memref<1x8x32xf32, #tpu.memory_space<vmem>>, vector<1x8x32xf32>
      %91 = vector.shape_cast %90 : vector<1x8x32xf32> to vector<8x32xf32>
      %92 = vector.shape_cast %89 : vector<8x32xf32> to vector<1x8x32xf32>
      tpu.vector_store %arg14[%c0_61, %c0_62, %c0_63], %92 {strides = array<i32>} : memref<1x8x32xf32, #tpu.memory_space<vmem>>, vector<1x8x32xf32>,
    } else {
    }
    return
  }
  func.func @transform_0(%arg0: i32, %arg1: i32, %arg2: i32) -> (i32, i32, i32) {
    %c0_i32 = arith.constant 0 : i32
    %c0_i32_0 = arith.constant 0 : i32
    return %arg0, %arg1, %c0_i32 : i32, i32, i32
  }
  func.func @transform_1(%arg0: i32, %arg1: i32, %arg2: i32) -> (i32, i32, i32) {
    %c0_i32 = arith.constant 0 : i32
    %0 = arith.cmpi eq, %arg1, %c0_i32 : i32
    %c0_i32_0 = arith.constant 0 : i32
    %1 = arith.select %0, %arg2, %c0_i32_0 : i32
    %c0_i32_1 = arith.constant 0 : i32
    %c0_i32_2 = arith.constant 0 : i32
    return %arg0, %1, %c0_i32_1 : i32, i32, i32
  }
  func.func @transform_2(%arg0: i32, %arg1: i32, %arg2: i32) -> (i32, i32, i32) {
    %c0_i32 = arith.constant 0 : i32
    return %arg0, %arg1, %arg2 : i32, i32, i32
  }
  func.func @transform_3(%arg0: i32, %arg1: i32, %arg2: i32) -> (i32, i32) {
    %c0_i32 = arith.constant 0 : i32
    %c0_i32_0 = arith.constant 0 : i32
    %c0_i32_1 = arith.constant 0 : i32
    return %c0_i32, %c0_i32_0 : i32, i32
  }
  func.func @transform_4(%arg0: i32, %arg1: i32, %arg2: i32) -> (i32, i32) {
    %c0_i32 = arith.constant 0 : i32
    %c0_i32_0 = arith.constant 0 : i32
    %c0_i32_1 = arith.constant 0 : i32
    return %c0_i32, %c0_i32_0 : i32, i32
  }
  func.func @transform_5(%arg0: i32, %arg1: i32, %arg2: i32) -> (i32, i32) {
    %c0_i32 = arith.constant 0 : i32
    %c0_i32_0 = arith.constant 0 : i32
    %c0_i32_1 = arith.constant 0 : i32
    return %c0_i32, %c0_i32_0 : i32, i32
  }
  func.func @transform_6(%arg0: i32, %arg1: i32, %arg2: i32) -> (i32, i32) {
    %c0_i32 = arith.constant 0 : i32
    %c0_i32_0 = arith.constant 0 : i32
    %c0_i32_1 = arith.constant 0 : i32
    return %c0_i32, %c0_i32_0 : i32, i32
  }
  func.func @transform_7(%arg0: i32, %arg1: i32, %arg2: i32) -> (i32, i32) {
    %c0_i32 = arith.constant 0 : i32
    %c0_i32_0 = arith.constant 0 : i32
    %c0_i32_1 = arith.constant 0 : i32
    return %c0_i32, %c0_i32_0 : i32, i32
  }
  func.func @transform_8(%arg0: i32, %arg1: i32, %arg2: i32) -> (i32, i32) {
    %c0_i32 = arith.constant 0 : i32
    %c0_i32_0 = arith.constant 0 : i32
    %c0_i32_1 = arith.constant 0 : i32
    return %c0_i32, %c0_i32_0 : i32, i32
  }
  func.func @transform_9(%arg0: i32, %arg1: i32, %arg2: i32) -> (i32, i32) {
    %c0_i32 = arith.constant 0 : i32
    %c0_i32_0 = arith.constant 0 : i32
    %c0_i32_1 = arith.constant 0 : i32
    return %c0_i32, %c0_i32_0 : i32, i32
  }
  func.func @transform_10(%arg0: i32, %arg1: i32, %arg2: i32) -> (i32, i32) {
    %c0_i32 = arith.constant 0 : i32
    %c0_i32_0 = arith.constant 0 : i32
    %c0_i32_1 = arith.constant 0 : i32
    return %c0_i32, %c0_i32_0 : i32, i32
  }
  func.func @transform_11(%arg0: i32, %arg1: i32, %arg2: i32) -> (i32, i32, i32) {
    %c0_i32 = arith.constant 0 : i32
    %c0_i32_0 = arith.constant 0 : i32
    return %arg0, %arg1, %c0_i32 : i32, i32, i32
  }
}

</mosaic_0001>

<bundles_post_ra>
// kernel: tpu_custom_call.1
= control target key start
LH: loop header
LB: loop body
LE: loop exit
PB: predicated region body
PF: predicated region fallthrough
CT: control target
= control target key end

     0   :  { %s3747_s0 = inlined_call_operand.hbm [shape: f32[2,8,32], index: 0, kind: input, shape index: {}]   ;;  %s3748_s1 = inlined_call_operand.hbm [shape: f32[2,8,32], index: 1, kind: input, shape index: {}]   ;;  %s3749_s2 = inlined_call_operand.hbm [shape: f32[2,8,8], index: 2, kind: input, shape index: {}]   ;;  %s3750_s3 = inlined_call_operand.hbm [shape: f32[32,32], index: 3, kind: input, shape index: {}]   ;;  %s3751_s4 = inlined_call_operand.vmem [shape: f32[1,32], index: 4, kind: input, shape index: {}]   ;;  %s3752_s5 = inlined_call_operand.hbm [shape: f32[32,64], index: 5, kind: input, shape index: {}]   ;;  %s3753_s6 = inlined_call_operand.vmem [shape: f32[1,64], index: 6, kind: input, shape index: {}]   ;;  %s3754_s7 = inlined_call_operand.hbm [shape: f32[32,32], index: 7, kind: input, shape index: {}]   ;;  %s3755_s8 = inlined_call_operand.vmem [shape: f32[1,32], index: 8, kind: input, shape index: {}]   ;;  %s3756_s9 = inlined_call_operand.vmem [shape: f32[1,32], index: 9, kind: input, shape index: {}]   ;;  %s3757_s10 = inlined_call_operand.vmem [shape: f32[1,32], index: 10, kind: input, shape index: {}]   ;;  %s3758_s11 = inlined_call_operand.hbm [shape: f32[2,8,32], index: 11, kind: output, shape index: {}]  }
   0x1   :  { %3785 = sst [smem:[#allocation33_spill]] %s3748_s1 }
   0x2   :  { %3786 = sst [smem:[#allocation34_spill]] %s3750_s3 }
   0x3   :  { %3787 = sst [smem:[#allocation35_spill]] %s3751_s4 }
   0x4   :  { %3788 = sst [smem:[#allocation36_spill]] %s3755_s8 }
   0x5   :  { %3789 = sst [smem:[#allocation37_spill]] %s3756_s9 }
   0x6   :  { %3790 = sst [smem:[#allocation38_spill]] %s3757_s10 }
   0x7   :  { %3791 = sst [smem:[#allocation39_spill]] %s3758_s11 }
   0x8   :  { %16 = vsyncpa [#allocation9], 0 }
   0x9   :  { %18 = vsyncpa [#allocation9 + $0x1], 0 }
   0xa   :  { %19 = vsyncpa [#allocation12], 0 }
   0xb   :  { %21 = vsyncpa [#allocation12 + $0x1], 0 }
   0xc   :  { %22 = vsyncpa [#allocation15], 0 }
   0xd   :  { %23 = vsyncpa [#allocation18], 0 }
   0xe   :  { %24 = vsyncpa [#allocation10], 0 }
   0xf   :  { %26 = vsyncpa [#allocation10 + $0x1], 0  ;;  %s3120_s17 = smov 0   ;;  %s3122_s18 = smov 0  }
  0x10   :  { %s3124_s19 = smov 0   ;;  %s3126_s20 = smov 0  }
  0x11   :  { %s3128_s21 = smov 0   ;;  %s3130_s22 = smov 0  }
  0x12 LB: > { %3792 = sst [smem:[#allocation25_spill]] %s3015_s17  ;;  %s3151_s23 = sadd.s32 4294967295, %s3035_s22   ;;  %s3035_s22 = sphi %s3130_s22, %s32_s22   ;;  %s3031_s21 = sphi %s3128_s21, %s3841_s21   ;;  %s3027_s20 = sphi %s3126_s20, %s3840_s20   ;;  %s3023_s19 = sphi %s3124_s19, %s3844_s19   ;;  %s3019_s18 = sphi %s3122_s18, %s3843_s18   ;;  %s3015_s17 = sphi %s3120_s17, %s3842_s17  }
  0x13   : > { %3793 = sst [smem:[#allocation26_spill]] %s3027_s20  ;;  %s2446_s24 = sadd.s32 4294967294, %s3035_s22  }
  0x14   : > { %3794 = sst [smem:[#allocation27_spill]] %s3031_s21  ;;  %p73_p0 = scmp.ne.s32.totalorder %s3019_s18, %s3015_s17 }
  0x15   : > { %3795 = sst [smem:[#allocation28_spill]] %s3035_s22  ;;  %p3761_p1 = scmp.eq.s32.totalorder %s3151_s23, 0 }
  0x16   : > { %p335_p3 = scmp.eq.s32.totalorder %s2446_s24, 1  ;;  %p2447_p5 = scmp.ge.s32.totalorder %s3035_s22, 1 }
  0x17   : > { %p3160_p4 = por %p3761_p1, %p73_p0  ;;  %p342_p7 = scmp.lt.s32.totalorder %s3035_s22, 3 }
  0x18   : > { %p3165_p6 = por %p335_p3, %p73_p0  ;;  %s3037_s28 = smov [#allocation14]  }
  0x19   : > { %s3796_s25 = scalar_select %p3160_p4, 1, 0 }
  0x1a   : > { %s3797_s26 = scalar_select %p3165_p6, 1, 0 }
  0x1b   : > { %p3170_p8 = pnand %p2447_p5, %p342_p7  ;;  %s354_s29 = sshll.u32 %s3037_s28, 4  ;;  %s355_s29 = int_to_ptr.vmem [resolvable:$true] %s354_s29 }
  0x1c   : > { %3798 = sst [smem:[#allocation29_spill]] %s3797_s26  ;;  %s51_s12 = sadd.s32 1, %s3031_s21 }
  0x1d   : > { %s3799_s27 = scalar_select %p3170_p8, 1, 0 }
  0x1e   : > { %p2640_p9 = pneg %p3170_p8  ;;  %s3801_s3 = sld [smem:[#allocation34_spill]] }
  0x20   : > { %p3179_p11 = pnand %p2640_p9, %p3761_p1 }
  0x22   : > { %s3800_s30 = scalar_select %p3179_p11, 1, 0 }
  0x23   : > { %p3192_p13 = pneg %p3179_p11 }
  0x24   : > { %s2767_s15 = scalar_lea.hbm %s3801_s3, 512 }
  0x25   : > { %p2768_p12 = scmp.ne.s32.totalorder %s3801_s3, %s2767_s15  ;;  %p2774_p5 = scmp.lt.u32.totalorder %s2767_s15, %s3801_s3 }
  0x26   : > { %s3802_s28 = scalar_select %p3192_p13, 1, 0 }
  0x27   : > { %p2770_p0 = pnand %p3192_p13, %p2768_p12 }
  0x29   : > { %p2771_p3 = pneg %p2770_p0 }
  0x2b   : > { %p2776_p7 = pnand %p2774_p5, %p2771_p3 }
  0x2d   : > { %2779 = shalt.err (!%p2776_p7)
}
  0x2e   : > { %s2780_s13 = scalar_lea.vmem %s355_s29, 512  ;;  %p2788_p2 = scmp.lt.s32.totalorder %s355_s29, %s355_s29 }
  0x2f   : > { %p2781_p9 = scmp.ne.s32.totalorder %s355_s29, %s2780_s13  ;;  %p2789_p6 = scmp.lt.s32.totalorder %s2780_s13, %s2780_s13 }
  0x31   : > { %p2783_p10 = pnand %p2781_p9, %p3192_p13  ;;  %p2790_p4 = por %p2789_p6, %p2788_p2 }
  0x33   : > { %p2784_p1 = pneg %p2783_p10 }
  0x35   : > { %p2791_p8 = pnand %p2790_p4, %p2784_p1 }
  0x37   : > { %2794 = shalt.err (!%p2791_p8)
}
  0x38   : > { %s3765_s14 = smov 128   ;;  %s3767_s17 = smov 8  }
  0x39   : > { %2643 = dma.hbm_to_vmem [thread:$0]  (!%p3179_p11), %s3801_s3, 512, %s355_s29, [#allocation15], %s3765_s14, %s3765_s14, %s3767_s17  }
  0x3a   : > { %p53_p1 = scmp.ge.s32.totalorder %s51_s12, 2  ;;  %s60_s16 = sadd.s32 1, %s3023_s19 }
  0x3b   : > { %p67_p2 = scmp.ne.s32.totalorder %s3023_s19, %s3019_s18  ;;  %p68_p4 = scmp.eq.s32.totalorder %s3035_s22, 0 }
  0x3c   : > { %s3846_s12 = smov (%p53_p1, %s51_s12), 0  ;;  %p3804_p8 = scmp.eq.s32.totalorder %s3151_s23, 1 }
  0x3d   : > { %3803 = sst [smem:[#allocation30_spill]] %s3846_s12  ;;  %p69_p6 = por %p68_p4, %p67_p2 }
  0x3e   : > { %p3219_p10 = por %p3804_p8, %p67_p2  ;;  %s55_s13 = ssub.s32 %s3031_s21, %s3846_s12 }
  0x3f   : > { %p2667_p12 = scmp.lt.s32.totalorder %s3035_s22, 2  ;;  %p58_p0 = scmp.eq.s32.totalorder %s55_s13, 0 }
  0x40   : > { %s3805_s24 = scalar_select %p3219_p10, 1, 0 }
  0x41   : > { %s3770_s11 = sand.u32 1, %s3023_s19   ;;  %s3232_s26 = sshll.u32 %s3031_s21, 7 }
  0x42   : > { %3806 = sst [smem:[#allocation31_spill]] %s3805_s24  ;;  %s3229_s29 = sshll.u32 %s3770_s11, 3 }
  0x43   : > { %s3235_s15 = scalar_select %p58_p0, %s3023_s19, %s60_s16  }
  0x44   : > { %p3237_p3 = pnand %p2667_p12, %p69_p6  ;;  %s428_s17 = sand.u32 1, %s3035_s22  }
  0x45   : > { %3807 = sst [smem:[#allocation32_spill]] %s3235_s15  ;;  %s3809_s1 = sld [smem:[#allocation33_spill]] }
  0x46   : > { %s3808_s14 = scalar_select %p3237_p3, 1, 0 }
  0x47   : > { %s432_s11 = scalar_lea.vmem [#allocation11], %s3229_s29  ;;  %s3040_s16 = smov [#allocation16]  }
  0x48   : > { %s442_s21 = sshll.u32 %s432_s11, 4  ;;  %s3251_s15 = sshll.u32 %s3040_s16, 4  ;;  %s3249_s21 = int_to_ptr.vmem [resolvable:$true] %s442_s21  ;;  %s371_s15 = int_to_ptr.vmem [resolvable:$true] %s3251_s15 }
  0x49   : > { %s3253_s10 = scalar_lea.sflag [#allocation12], %s428_s17  ;;  %p3259_p7 = pneg %p3237_p3 }
  0x4b   : > { %s3246_s13 = scalar_lea.hbm %s3809_s1, %s3232_s26  ;;  %s2800_s22 = scalar_lea.hbm %s3809_s1, 256 }
  0x4c   : > { %s2795_s9 = scalar_lea.hbm %s3246_s13, 128  ;;  %p2801_p2 = scmp.lt.u32.totalorder %s3246_s13, %s3809_s1 }
  0x4d   : > { %p2796_p5 = scmp.ne.s32.totalorder %s3246_s13, %s2795_s9  ;;  %p2802_p4 = scmp.lt.u32.totalorder %s2800_s22, %s2795_s9 }
  0x4e   : > { %s3810_s3 = scalar_select %p3259_p7, 1, 0 }
  0x4f   : > { %p2798_p9 = pnand %p3259_p7, %p2796_p5  ;;  %p2803_p6 = por %p2802_p4, %p2801_p2 }
  0x50   : > { %p2804_p8 = scmp.lt.u32.totalorder %s2795_s9, %s3246_s13 }
  0x51   : > { %p2799_p1 = pneg %p2798_p9 }
  0x52   : > { %p2805_p12 = por %p2804_p8, %p2803_p6 }
  0x54   : > { %p2806_p0 = pnand %p2805_p12, %p2799_p1 }
  0x56   : > { %2809 = shalt.err (!%p2806_p0)
}
  0x57   : > { %s2810_s17 = scalar_lea.vmem %s3249_s21, 128  ;;  %s3041_s12 = smov [#allocation11]  }
  0x58   : > { %p2811_p5 = scmp.ne.s32.totalorder %s3249_s21, %s2810_s17  ;;  %s2815_s11 = sshll.u32 %s3041_s12, 4  ;;  %s2816_s11 = int_to_ptr.vmem [resolvable:$false] %s2815_s11 }
  0x59   : > { %s2817_s24 = scalar_lea.vmem %s2816_s11, 256  ;;  %p2818_p11 = scmp.lt.s32.totalorder %s3249_s21, %s2816_s11 }
  0x5a   : > { %p2813_p9 = pnand %p2811_p5, %p3259_p7  ;;  %p2819_p13 = scmp.lt.s32.totalorder %s2817_s24, %s2810_s17 }
  0x5c   : > { %p2814_p10 = pneg %p2813_p9  ;;  %p2820_p2 = por %p2819_p13, %p2818_p11 }
  0x5e   : > { %p2821_p4 = pnand %p2820_p2, %p2814_p10 }
  0x60   : > { %2824 = shalt.err (!%p2821_p4)
}
  0x61   : > { %2656 = dma.hbm_to_vmem [thread:$0]  (!%p3237_p3), %s3246_s13, 128, %s3249_s21, %s3253_s10  }
  0x62   : > { %s2825_s16 = scalar_lea.hbm %s3752_s5, 512  ;;  %p3811_p11 = scmp.ne.s32.totalorder %s3802_s28, 0 }
  0x63   : > { %p2826_p1 = scmp.ne.s32.totalorder %s3752_s5, %s2825_s16  ;;  %p2832_p6 = scmp.lt.u32.totalorder %s2825_s16, %s3752_s5 }
  0x65   : > { %p2828_p13 = pnand %p2826_p1, %p3811_p11 }
  0x67   : > { %p2829_p10 = pneg %p2828_p13 }
  0x69   : > { %p2834_p8 = pnand %p2832_p6, %p2829_p10 }
  0x6b   : > { %2837 = shalt.err (!%p2834_p8)
}
  0x6c   : > { %s2838_s24 = scalar_lea.vmem %s371_s15, 512  ;;  %p2846_p9 = scmp.lt.s32.totalorder %s371_s15, %s371_s15 }
  0x6d   : > { %p2839_p12 = scmp.ne.s32.totalorder %s371_s15, %s2838_s24  ;;  %p2847_p2 = scmp.lt.s32.totalorder %s2838_s24, %s2838_s24 }
  0x6f   : > { %p2841_p0 = pnand %p2839_p12, %p3811_p11  ;;  %p2848_p4 = por %p2847_p2, %p2846_p9 }
  0x71   : > { %p2842_p5 = pneg %p2841_p0 }
  0x73   : > { %p2849_p3 = pnand %p2848_p4, %p2842_p5 }
  0x75   : > { %2852 = shalt.err (!%p2849_p3)
}
  0x76   : > { %p3812_p1 = scmp.ne.s32.totalorder %s3800_s30, 0  ;;  %s3813_s1 = smov 8  }
  0x77   : > { %s3814_s21 = smov 128   ;;  %s3042_s22 = smov [#allocation17]  }
  0x78   : > { %2646 = dma.hbm_to_vmem [thread:$0]  (!%p3812_p1), %s3752_s5, 512, %s371_s15, [#allocation15], %s3814_s21, %s3814_s21, %s3813_s1  }
  0x79   : > { %s386_s16 = sshll.u32 %s3042_s22, 4  ;;  %s2853_s11 = scalar_lea.hbm %s3754_s7, 512  ;;  %s387_s16 = int_to_ptr.vmem [resolvable:$true] %s386_s16 }
  0x7a   : > { %p2854_p3 = scmp.ne.s32.totalorder %s3754_s7, %s2853_s11  ;;  %p2860_p6 = scmp.lt.u32.totalorder %s2853_s11, %s3754_s7 }
  0x7c   : > { %p2856_p13 = pnand %p2854_p3, %p3811_p11 }
  0x7e   : > { %p2857_p10 = pneg %p2856_p13 }
  0x80   : > { %p2862_p8 = pnand %p2860_p6, %p2857_p10 }
  0x82   : > { %2865 = shalt.err (!%p2862_p8)
}
  0x83   : > { %s2866_s15 = scalar_lea.vmem %s387_s16, 512  ;;  %p2874_p9 = scmp.lt.s32.totalorder %s387_s16, %s387_s16 }
  0x84   : > { %p2867_p12 = scmp.ne.s32.totalorder %s387_s16, %s2866_s15  ;;  %p2875_p2 = scmp.lt.s32.totalorder %s2866_s15, %s2866_s15 }
  0x86   : > { %p2869_p0 = pnand %p2867_p12, %p3811_p11  ;;  %p2876_p4 = por %p2875_p2, %p2874_p9 }
  0x88   : > { %p2870_p5 = pneg %p2869_p0 }
  0x8a   : > { %p2877_p7 = pnand %p2876_p4, %p2870_p5 }
  0x8c   : > { %2880 = shalt.err (!%p2877_p7)
}
  0x8d   : > { %2649 = dma.hbm_to_vmem [thread:$0]  (!%p3812_p1), %s3754_s7, 512, %s387_s16, [#allocation18], %s3814_s21, %s3814_s21, %s3813_s1  }
  0x8e   : > { %s3330_s13 = scalar_lea.hbm %s3747_s0, %s3232_s26  ;;  %s413_s30 = scalar_lea.vmem [#allocation8], %s3229_s29 }
  0x8f   : > { %s421_s9 = sshll.u32 %s413_s30, 4  ;;  %s3815_s22 = sand.u32 1, %s3023_s19   ;;  %s422_s9 = int_to_ptr.vmem [resolvable:$true] %s421_s9 }
  0x90   : > { %s410_s12 = scalar_lea.sflag [#allocation9], %s3815_s22  ;;  %s2881_s17 = scalar_lea.hbm %s3330_s13, 128 }
  0x91   : > { %p2882_p7 = scmp.ne.s32.totalorder %s3330_s13, %s2881_s17  ;;  %p3816_p11 = scmp.ne.s32.totalorder %s3810_s3, 0 }
  0x92   : > { %s2886_s16 = scalar_lea.hbm %s3747_s0, 256  ;;  %p2887_p1 = scmp.lt.u32.totalorder %s3330_s13, %s3747_s0 }
  0x93   : > { %p2884_p3 = pnand %p2882_p7, %p3816_p11  ;;  %p2888_p10 = scmp.lt.u32.totalorder %s2886_s16, %s2881_s17 }
  0x94   : > { %p2890_p8 = scmp.lt.u32.totalorder %s2881_s17, %s3330_s13 }
  0x95   : > { %p2885_p13 = pneg %p2884_p3  ;;  %p2889_p6 = por %p2888_p10, %p2887_p1 }
  0x97   : > { %p2891_p12 = por %p2890_p8, %p2889_p6 }
  0x99   : > { %p2892_p0 = pnand %p2891_p12, %p2885_p13 }
  0x9b   : > { %2895 = shalt.err (!%p2892_p0)
}
  0x9c   : > { %s2896_s15 = scalar_lea.vmem %s422_s9, 128  ;;  %s3043_s4 = smov [#allocation8]  }
  0x9d   : > { %p2897_p5 = scmp.ne.s32.totalorder %s422_s9, %s2896_s15  ;;  %s2901_s8 = sshll.u32 %s3043_s4, 4  ;;  %s2902_s8 = int_to_ptr.vmem [resolvable:$false] %s2901_s8 }
  0x9e   : > { %s2903_s20 = scalar_lea.vmem %s2902_s8, 256  ;;  %p2904_p4 = scmp.lt.s32.totalorder %s422_s9, %s2902_s8 }
  0x9f   : > { %p2899_p9 = pnand %p2897_p5, %p3816_p11  ;;  %p2905_p7 = scmp.lt.s32.totalorder %s2903_s20, %s2896_s15 }
  0xa1   : > { %p2900_p2 = pneg %p2899_p9  ;;  %p2906_p3 = por %p2905_p7, %p2904_p4 }
  0xa3   : > { %p2907_p1 = pnand %p2906_p3, %p2900_p2 }
  0xa5   : > { %2910 = shalt.err (!%p2907_p1)
}
  0xa6   : > { %p3817_p10 = scmp.ne.s32.totalorder %s3808_s14, 0  ;;  %s3356_s22 = scalar_lea.hbm %s3749_s2, %s3232_s26 }
  0xa7   : > { %s453_s17 = scalar_lea.vmem [#allocation13], %s3229_s29  ;;  %s2911_s21 = scalar_lea.hbm %s3356_s22, 128 }
  0xa8   : > { %2653 = dma.hbm_to_vmem [thread:$0]  (!%p3817_p10), %s3330_s13, 128, %s422_s9, %s410_s12  }
  0xa9   : > { %s462_s1 = sshll.u32 %s453_s17, 4  ;;  %p2912_p13 = scmp.ne.s32.totalorder %s3356_s22, %s2911_s21  ;;  %s463_s1 = int_to_ptr.vmem [resolvable:$true] %s462_s1 }
  0xaa   : > { %s2916_s13 = scalar_lea.hbm %s3749_s2, 256  ;;  %p2917_p12 = scmp.lt.u32.totalorder %s3356_s22, %s3749_s2 }
  0xab   : > { %p2914_p6 = pnand %p2912_p13, %p3816_p11  ;;  %p2918_p0 = scmp.lt.u32.totalorder %s2916_s13, %s2911_s21 }
  0xac   : > { %p2920_p9 = scmp.lt.u32.totalorder %s2911_s21, %s3356_s22 }
  0xad   : > { %p2915_p8 = pneg %p2914_p6  ;;  %p2919_p5 = por %p2918_p0, %p2917_p12 }
  0xaf   : > { %p2921_p2 = por %p2920_p9, %p2919_p5 }
  0xb1   : > { %p2922_p4 = pnand %p2921_p2, %p2915_p8 }
  0xb3   : > { %2925 = shalt.err (!%p2922_p4)
}
  0xb4   : > { %s2926_s29 = scalar_lea.vmem %s463_s1, 128  ;;  %s3044_s26 = smov [#allocation13]  }
  0xb5   : > { %p2927_p7 = scmp.ne.s32.totalorder %s463_s1, %s2926_s29  ;;  %s2931_s24 = sshll.u32 %s3044_s26, 4  ;;  %s2932_s24 = int_to_ptr.vmem [resolvable:$false] %s2931_s24 }
  0xb6   : > { %s2933_s15 = scalar_lea.vmem %s2932_s24, 256  ;;  %p2934_p13 = scmp.lt.s32.totalorder %s463_s1, %s2932_s24 }
  0xb7   : > { %p2929_p3 = pnand %p2927_p7, %p3816_p11  ;;  %p2935_p6 = scmp.lt.s32.totalorder %s2933_s15, %s2926_s29 }
  0xb9   : > { %p2930_p1 = pneg %p2929_p3  ;;  %p2936_p10 = por %p2935_p6, %p2934_p13 }
  0xbb   : > { %p2937_p0 = pnand %p2936_p10, %p2930_p1 }
  0xbd   : > { %2940 = shalt.err (!%p2937_p0)
}
  0xbe   : > { %p3818_p12 = scmp.ne.s32.totalorder %s3808_s14, 0  ;;  %p3819_p8 = scmp.ne.s32.totalorder %s3799_s27, 0 }
  0xbf   : > { %s3380_s3 = sand.u32 (!%p3819_p8), 1, %s3019_s18   ;;  %p3820_p11 = scmp.ne.s32.totalorder (!%p3819_p8), %s3796_s25, 0 }
  0xc0   : > { %2659 = dma.hbm_to_vmem [thread:$0]  (!%p3818_p12), %s3356_s22, 128, %s463_s1, %s3253_s10  }
  0xc1   : > { %471 = sbr.rel (%p3819_p8) target bundleno = 2072 (0x818), region = 64  ;;  %s3383_s4 = sshll.u32 (!%p3819_p8), %s3380_s3, 3 }
  0xc2   : > { %s474_s8 = scalar_lea.sflag (!%p3819_p8), [#allocation9], %s3380_s3  ;;  %s477_s20 = scalar_lea.vmem (!%p3819_p8), [#allocation8], %s3383_s4 }
  0xc8   : > { %2994 = dma.done.wait (%p3820_p11), %s474_s8, 128  }
  0xc9   : > { %2996 = vsyncadd (%p3820_p11), %s474_s8, 4294967168  ;;  %s482_s10 = sand.u32 1, %s3151_s23   ;;  %s486_s14 = scalar_lea.vmem [#allocation11], %s3383_s4 }
  0xca   : > { %s483_s27 = scalar_lea.sflag [#allocation12], %s482_s10 }
  0xcb   : > { %2998 = dma.done.wait (%p3820_p11), %s483_s27, 256  }
  0xcc   : > { %3000 = vsyncadd (%p3820_p11), %s483_s27, 4294967040  ;;  %s495_s28 = scalar_lea.vmem [#allocation13], %s3383_s4  ;;  %p3821_p10 = scmp.eq.s32.totalorder %s3151_s23, 0 }
  0xce   : > { %3002 = dma.done.wait (%p3821_p10), [#allocation15], 1024   ;;  %p3822_p5 = pmov %p3821_p10 }
  0xd0   : > { %3004 = vsyncadd (%p3822_p5), [#allocation15], 4294966272  ;;  %p3823_p9 = pmov %p3822_p5 }
  0xd1   : > { %p3824_p2 = pmov %p3822_p5 }
  0xd2   : > { %3006 = dma.done.wait (%p3823_p9), [#allocation18], 512  }
  0xd3   : > { %3008 = vsyncadd (%p3824_p2), [#allocation18], 4294966784  ;;  %v3045_v0 = vmov 0.0|0.0   ;;  %vm3046_vm0 = vmmov 0   ;;  %v3047_v1 = vmov 0.0   ;;  %v563_v2 = vld [vmem:[#allocation16] sm:$0xff]  ;;  %v663_v26 = vlaneseq }
  0xd4   : > { %2602 = vmatprep.subr.bf16.mxu0 %v3045_v0  ;;  %2608 = vmatprep.subr.bf16.mxu1 %v3045_v0  ;;  %v564_v3 = vld [vmem:[#allocation16 + $0x8] sm:$0xff]  ;;  %v959_v4 = vld [vmem:[#allocation14] sm:$0xff]  ;;  %v565_v7 = vld [vmem:[#allocation16 + $0x10] sm:$0xff]  ;;  %vm574_vm1 = vcmask 261120   ;;  %vm876_vm2 = vcmask 64512   ;;  %s3825_s17 = sld [smem:[#allocation35_spill]] }
  0xd5   : > { %2537 = vmatprep.mubr.msk.f32.mxu0 %vm3046_vm0, %v3047_v1  ;;  %2548 = vmatprep.mubr.msk.f32.mxu1 %vm3046_vm0, %v3047_v1  ;;  %v2603_v5 = vpack.c.bf16 %v564_v3, %v563_v2  ;;  %v960_v6 = vld [vmem:[#allocation14 + $0x8] sm:$0xff]  ;;  %v566_v8 = vld [vmem:[#allocation16 + $0x18] sm:$0xff]  ;;  %v961_v10 = vld [vmem:[#allocation14 + $0x10] sm:$0xff]  ;;  %1204 = vst.msk [vmem:[#allocation7] sm:$0xff] %vm876_vm2, %v3047_v1  ;;  %s3048_s1 = smov 104   ;;  %s3049_s21 = smov 120  }
  0xd6   : > { %v2609_v9 = vpack.c.bf16 %v960_v6, %v959_v4  ;;  %v962_v11 = vld [vmem:[#allocation14 + $0x18] sm:$0xff]  ;;  %v2606_v12 = vpack.c.bf16 %v566_v8, %v565_v7  ;;  %v562_v14 = vld [vmem:[%s486_s14] sm:$0xff]  ;;  %1205 = vst.msk [vmem:[#allocation7 + $0x8] sm:$0xff] %vm876_vm2, %v3047_v1  ;;  %1206 = vst.msk [vmem:[#allocation7 + $0x10] sm:$0xff] %vm876_vm2, %v3047_v1  ;;  %s3050_s16 = smov 112   ;;  %v664_v30 = vshrl.u32 %v663_v26, 7 }
  0xd7   : > { %2604 = vmatpush3.bf16.msra.mxu0 %v2603_v5  ;;  %v2612_v13 = vpack.c.bf16 %v962_v11, %v961_v10  ;;  %v3418_v15 = vld [vmem:[%s477_s20] sm:$0xff]  ;;  %1207 = vst.msk [vmem:[#allocation7 + $0x18] sm:$0xff] %vm876_vm2, %v3047_v1  ;;  %v3051_v24 = vmov 1983009808   ;;  %v3052_v27 = vmov 1934713408  }
  0xd8   : > { %2605 = vmatprep.subr.bf16.mxu0 %v3045_v0  ;;  %2610 = vmatpush3.bf16.msra.mxu1 %v2609_v9  ;;  %v2466_v16 = vld [vmem:[%s3753_s6] ss:$0 sm:$0xff]  ;;  %v661_v25 = vunpack.c.l.s4 %v3051_v24  ;;  %v693_v28 = vunpack.c.l.s4 %v3052_v27  ;;  %vm1195_vm3 = vcmask 7168   ;;  %s3055_s11 = smov 96   ;;  %s3056_s13 = smov 16   ;;  %vm2142_vm4 = vcmask 130048  }
  0xd9   : > { %2611 = vmatprep.subr.bf16.mxu1 %v3045_v0  ;;  %1200 = vst.msk [vmem:[#allocation6] sm:$0xff] %vm1195_vm3, %v3047_v1  ;;  %1201 = vst.msk [vmem:[#allocation6 + $0x8] sm:$0xff] %vm1195_vm3, %v3047_v1  ;;  %s3057_s9 = smov 8   ;;  %s3058_s12 = smov 24   ;;  %vm2144_vm5 = vcmask 195584  }
  0xda   : > { %v2472_v18 = vld [vmem:[%s3825_s17] ss:$0 sm:$0xff]  ;;  %v662_v29 = vunpack.c.0.s8 %v661_v25  ;;  %v694_v33 = vunpack.c.0.s8 %v693_v28  ;;  %1202 = vst.msk [vmem:[#allocation6 + $0x10] sm:$0xff] %vm1195_vm3, %v3047_v1  ;;  %1203 = vst.msk [vmem:[#allocation6 + $0x18] sm:$0xff] %vm1195_vm3, %v3047_v1  ;;  %s3826_s24 = sld [smem:[#allocation36_spill]]  ;;  %s3828_s8 = sld [smem:[#allocation31_spill]] }
  0xdb   : > { %2607 = vmatpush3.bf16.msra.mxu0 %v2606_v12  ;;  %s3827_s15 = sld [smem:[#allocation26_spill]]  ;;  %s3829_s27 = sld [smem:[#allocation37_spill]] }
  0xdc   : > { %2613 = vmatpush3.bf16.msra.mxu1 %v2612_v13  ;;  %2561 = vmatprep.subr.mxu0 %v3047_v1  ;;  %v3452_v34 = vsub.s32 %v662_v29, %v664_v30  ;;  %v3464_v41 = vsub.s32 %v694_v33, %v664_v30  ;;  %s3830_s23 = sld [smem:[#allocation38_spill]]  ;;  %s555_s30 = scalar_lea.vmem [#allocation19], %s3383_s4 }
  0xdd   : > { %2551 = vmatprep.subr.mxu1 %v3047_v1  ;;  %s2279_s22 = sshll.u32 %s555_s30, 4  ;;  %s3059_s4 = smov [#allocation19]   ;;  %s3699_s22 = int_to_ptr.vmem [resolvable:$true] %s2279_s22 }
  0xde   : > { %2538 = vmatmul.mubr.msk.f32.vlgmr.msra.gmra.mrb[0].mxu0 %vm574_vm1, %v562_v14 }
  0xdf   : > { %2549 = vmatmul.mubr.msk.f32.vlgmr.msra.gmra.mrb[0].mxu1 %vm574_vm1, %v3418_v15  ;;  %2563 = vmatprep.mubr.msk.f32.mxu0 %vm3046_vm0, %v3047_v1 }
  0xe0   : > { %2553 = vmatprep.mubr.msk.f32.mxu1 %vm3046_vm0, %v3047_v1  ;;  %p3833_p7 = scmp.ne.s32.totalorder %s3828_s8, 0 }
  0xe1   : > { %s2495_s25 = sshll.u32 %s3827_s15, 7 }
 0x1b1   : > { %v644_v17 = vpop.f32.mrb[0].mxu0 }
 0x1b2   : > { %v3443_v19 = vadd.f32 %v2466_v16, %v644_v17  ;;  %v2539_v20 = vpop.f32.mrb[1].mxu0  ;;  %v1040_v21 = vpop.f32.mrb[0].mxu1 }
 0x1b3   : > { %v2550_v22 = vpop.f32.mrb[1].mxu1  ;;  %v1041_v23 = vadd.f32 %v2472_v18, %v1040_v21 }
 0x1b4   : > { %655 = vrot.lane.b32.xlu1 %v3443_v19, %s3048_s1  ;;  %649 = vrot.lane.b32.xlu0 %v3443_v19, %s3049_s21 }
 0x1b8   : > { %1045 = vrot.lane.b32.xlu1 %v1041_v23, %s3049_s21  ;;  %652 = vrot.lane.b32.xlu0 %v3443_v19, %s3050_s16  ;;  %s3831_s21 = sld [smem:[#allocation39_spill]] }
 0x1bc   : > { %1051 = vrot.lane.b32.xlu1 %v1041_v23, %s3048_s1  ;;  %1048 = vrot.lane.b32.xlu0 %v1041_v23, %s3050_s16 }
 0x1be   : > { %s3832_s16 = smov %s3831_s21 }
 0x226   : > { %v3448_v31 = vpop.permute.xlu1 %655  ;;  %v3450_v32 = vpop.permute.xlu0 %649 }
 0x227   : > { %v674_v35 = vcombine.low %v3450_v32, %v3448_v31  ;;  %v675_v36 = vcombine.high %v3450_v32, %v3448_v31 }
 0x229   : > { %v682_v42 = vrot.slane %v674_v35, %v3452_v34  ;;  %v689_v43 = vrot.slane %v675_v36, %v3452_v34 }
 0x22a   : > { %v1046_v37 = vpop.permute.xlu1 %1045  ;;  %v3458_v38 = vpop.permute.xlu0 %652 }
 0x22b   : > { %v658_v39 = vcombine.low %v3443_v19, %v3458_v38  ;;  %v659_v40 = vcombine.high %v3443_v19, %v3458_v38 }
 0x22d   : > { %v666_v44 = vrot.slane %v658_v39, %v3452_v34  ;;  %v673_v45 = vrot.slane %v659_v40, %v3452_v34 }
 0x22e   : > { %v1052_v46 = vpop.permute.xlu1 %1051  ;;  %v1049_v47 = vpop.permute.xlu0 %1048 }
 0x22f   : > { %v690_v48 = vcombine.low %v666_v44, %v682_v42  ;;  %v691_v49 = vcombine.high %v666_v44, %v682_v42  ;;  %v706_v50 = vcombine.low %v673_v45, %v689_v43  ;;  %v707_v51 = vcombine.high %v673_v45, %v689_v43 }
 0x230   : > { %v1070_v52 = vcombine.low %v1046_v37, %v1052_v46  ;;  %v1071_v53 = vcombine.high %v1046_v37, %v1052_v46  ;;  %v1054_v54 = vcombine.low %v1041_v23, %v1049_v47  ;;  %v1055_v55 = vcombine.high %v1041_v23, %v1049_v47 }
 0x231   : > { %v698_v56 = vrot.slane %v690_v48, %v3464_v41  ;;  %v705_v57 = vrot.slane %v691_v49, %v3464_v41  ;;  %v714_v58 = vrot.slane %v706_v50, %v3464_v41  ;;  %v721_v59 = vrot.slane %v707_v51, %v3464_v41 }
 0x232   : > { %v1078_v60 = vrot.slane %v1070_v52, %v3452_v34  ;;  %v1085_v61 = vrot.slane %v1071_v53, %v3452_v34  ;;  %v1062_v62 = vrot.slane %v1054_v54, %v3452_v34  ;;  %v1069_v63 = vrot.slane %v1055_v55, %v3452_v34 }
 0x233   : > { %v807_v2 = vcombine.low %v698_v56, %v705_v57  ;;  %v2468_v3 = vcombine.high %v698_v56, %v705_v57  ;;  %v823_v4 = vcombine.low %v714_v58, %v721_v59  ;;  %v2469_v5 = vcombine.high %v714_v58, %v721_v59 }
 0x234   : > { %v1086_v6 = vcombine.low %v1062_v62, %v1078_v60  ;;  %v1087_v7 = vcombine.high %v1062_v62, %v1078_v60  ;;  %v1102_v8 = vcombine.low %v1069_v63, %v1085_v61  ;;  %v1103_v9 = vcombine.high %v1069_v63, %v1085_v61 }
 0x235   : > { %v814_v10 = vrot.slane %v807_v2, %v3452_v34  ;;  %v822_v11 = vrot.slane %v2468_v3, %v3452_v34  ;;  %v830_v12 = vrot.slane %v823_v4, %v3452_v34  ;;  %v838_v13 = vrot.slane %v2469_v5, %v3452_v34  ;;  %v1223_v4 = vld [vmem:[%s495_s28] sm:$0xff] }
 0x236   : > { %v1094_v14 = vrot.slane %v1086_v6, %v3464_v41  ;;  %v1101_v16 = vrot.slane %v1087_v7, %v3464_v41  ;;  %v1110_v17 = vrot.slane %v1102_v8, %v3464_v41  ;;  %v1117_v18 = vrot.slane %v1103_v9, %v3464_v41 }
 0x237   : > { %v839_v20 = vcombine.low %v814_v10, %v822_v11  ;;  %v840_v21 = vcombine.high %v814_v10, %v822_v11  ;;  %v855_v22 = vcombine.low %v830_v12, %v838_v13  ;;  %v856_v23 = vcombine.high %v830_v12, %v838_v13 }
 0x238   : > { %v1122_v24 = vcombine.low %v1094_v14, %v1101_v16  ;;  %v2474_v25 = vcombine.high %v1094_v14, %v1101_v16  ;;  %v1138_v26 = vcombine.low %v1110_v17, %v1117_v18  ;;  %v2475_v27 = vcombine.high %v1110_v17, %v1117_v18 }
 0x239   : > { %v847_v28 = vrot.slane %v839_v20, %v3464_v41  ;;  %v854_v29 = vrot.slane %v840_v21, %v3464_v41  ;;  %v863_v30 = vrot.slane %v855_v22, %v3464_v41  ;;  %v870_v33 = vrot.slane %v856_v23, %v3464_v41 }
 0x23a   : > { %v1129_v35 = vrot.slane %v1122_v24, %v3452_v34  ;;  %v1137_v36 = vrot.slane %v2474_v25, %v3452_v34  ;;  %v1145_v37 = vrot.slane %v1138_v26, %v3452_v34  ;;  %v1153_v39 = vrot.slane %v2475_v27, %v3452_v34 }
 0x23b   : > { %v871_v40 = vcombine.low %v847_v28, %v863_v30  ;;  %v872_v42 = vcombine.high %v847_v28, %v863_v30  ;;  %v873_v43 = vcombine.low %v854_v29, %v870_v33  ;;  %v874_v44 = vcombine.high %v854_v29, %v870_v33 }
 0x23c   : > { %v1154_v45 = vcombine.low %v1129_v35, %v1137_v36  ;;  %v1155_v46 = vcombine.high %v1129_v35, %v1137_v36  ;;  %v1170_v47 = vcombine.low %v1145_v37, %v1153_v39  ;;  %v1171_v48 = vcombine.high %v1145_v37, %v1153_v39 }
 0x23d   : > { %877 = vst.msk [vmem:[#allocation3] sm:$0xff] %vm876_vm2, %v871_v40  ;;  %878 = vst.msk [vmem:[#allocation3 + $0x8] sm:$0xff] %vm876_vm2, %v872_v42  ;;  %v3053_v3 = vmov -inf   ;;  %v3054_v23 = vmov 0  }
 0x23e   : > { %879 = vst.msk [vmem:[#allocation3 + $0x10] sm:$0xff] %vm876_vm2, %v873_v43  ;;  %880 = vst.msk [vmem:[#allocation3 + $0x18] sm:$0xff] %vm876_vm2, %v874_v44  ;;  %v1162_v49 = vrot.slane %v1154_v45, %v3464_v41  ;;  %v1169_v50 = vrot.slane %v1155_v46, %v3464_v41  ;;  %v1178_v51 = vrot.slane %v1170_v47, %v3464_v41  ;;  %2739 = vset.pattern.permute.xlu0 %v3054_v23 }
 0x23f   : > { %v1185_v52 = vrot.slane %v1171_v48, %v3464_v41  ;;  %1196 = vst.msk [vmem:[#allocation5] sm:$0xff] %vm1195_vm3, %v3053_v3  ;;  %1197 = vst.msk [vmem:[#allocation5 + $0x8] sm:$0xff] %vm1195_vm3, %v3053_v3  ;;  %2740 = vset.pattern.permute.xlu1 %v3054_v23 }
 0x240   : > { %v1186_v53 = vcombine.low %v1162_v49, %v1178_v51  ;;  %v1187_v54 = vcombine.high %v1162_v49, %v1178_v51  ;;  %1198 = vst.msk [vmem:[#allocation5 + $0x10] sm:$0xff] %vm1195_vm3, %v3053_v3  ;;  %1199 = vst.msk [vmem:[#allocation5 + $0x18] sm:$0xff] %vm1195_vm3, %v3053_v3 }
 0x241   : > { %v1188_v55 = vcombine.low %v1169_v50, %v1185_v52  ;;  %v1189_v56 = vcombine.high %v1169_v50, %v1185_v52 }
 0x242   : > { %1191 = vst.msk [vmem:[#allocation2] sm:$0xff] %vm876_vm2, %v1186_v53  ;;  %1192 = vst.msk [vmem:[#allocation2 + $0x8] sm:$0xff] %vm876_vm2, %v1187_v54 }
 0x243   : > { %1193 = vst.msk [vmem:[#allocation2 + $0x10] sm:$0xff] %vm876_vm2, %v1188_v55  ;;  %1194 = vst.msk [vmem:[#allocation2 + $0x18] sm:$0xff] %vm876_vm2, %v1189_v56 }
 0x244   : > { %v1210_v57 = vld [vmem:[#allocation3] sm:$0xff]  ;;  %v1211_v61 = vld [vmem:[#allocation3 + $0x8] sm:$0xff] }
 0x245   : > { %v1212_v58 = vld [vmem:[#allocation3 + $0x10] sm:$0xff]  ;;  %2552 = vmatpush3.xpose.msk.msra.mxu1 %vm876_vm2, %v1210_v57  ;;  %v1213_v63 = vld [vmem:[#allocation3 + $0x18] sm:$0xff] }
 0x246   : > { %2562 = vmatpush3.xpose.msk.msra.mxu0 %vm876_vm2, %v1212_v58  ;;  %2556 = vmatprep.subr.mxu1 %v3047_v1  ;;  %v3560_v24 = vld [vmem:[#allocation5] sm:$0xff]  ;;  %v3565_v27 = vld [vmem:[#allocation5 + $0x8] sm:$0xff] }
 0x247   : > { %2571 = vmatprep.subr.mxu0 %v3047_v1  ;;  %v3567_v28 = vld [vmem:[#allocation5 + $0x10] sm:$0xff]  ;;  %v3580_v30 = vld [vmem:[#allocation5 + $0x18] sm:$0xff] }
 0x249   : > { %v1219_v59 = vld [vmem:[#allocation2] sm:$0xff]  ;;  %v1220_v62 = vld [vmem:[#allocation2 + $0x8] sm:$0xff] }
 0x24a   : > { %v1221_v60 = vld [vmem:[#allocation2 + $0x10] sm:$0xff]  ;;  %2554 = vmatmul.mubr.msk.f32.vlgmr.msra.gmra.mrb[2].mxu1 %vm876_vm2, %v1219_v59  ;;  %v1222_v2 = vld [vmem:[#allocation2 + $0x18] sm:$0xff] }
 0x24b   : > { %2564 = vmatmul.mubr.msk.f32.vlgmr.msra.gmra.mrb[2].mxu0 %vm876_vm2, %v1221_v60  ;;  %2557 = vmatpush3.xpose.msk.msra.mxu1 %vm876_vm2, %v1211_v61 }
 0x24c   : > { %2558 = vmatprep.mubr.msk.f32.mxu1 %vm3046_vm0, %v3047_v1  ;;  %2566 = vmatprep.subr.mxu1 %v3047_v1 }
 0x24d   : > { %2573 = vmatprep.mubr.msk.f32.mxu0 %vm3046_vm0, %v3047_v1 }
 0x24e   : > { %2559 = vmatmul.mubr.msk.f32.vlgmr.msra.gmra.mrb[4].mxu1 %vm876_vm2, %v1220_v62 }
 0x24f   : > { %2567 = vmatpush3.xpose.msk.msra.mxu1 %vm876_vm2, %v1213_v63  ;;  %2568 = vmatprep.mubr.msk.f32.mxu1 %vm3046_vm0, %v3047_v1 }
 0x250   : > { %2576 = vmatprep.subr.mxu1 %v3047_v1 }
 0x252   : > { %2569 = vmatmul.mubr.msk.f32.vlgmr.msra.gmra.mrb[6].mxu1 %vm876_vm2, %v1222_v2 }
 0x253   : > { %2578 = vmatprep.mubr.msk.f32.mxu1 %vm3046_vm0, %v3047_v1 }
 0x31d   : > { %v1297_v5 = vpop.f32.mrb[2].mxu1 }
 0x31e   : > { %v1449_v6 = vpop.f32.mrb[2].mxu0  ;;  %v3540_v7 = vadd.f32 %v1297_v5, %v1223_v4  ;;  %v2555_v8 = vpop.f32.mrb[3].mxu1 }
 0x31f   : > { %v2565_v9 = vpop.f32.mrb[3].mxu0  ;;  %v3542_v10 = vadd.f32 %v1449_v6, %v1223_v4 }
 0x320   : > { %v1533_v11 = vsel %vm876_vm2, %v3540_v7, -inf }
 0x321   : > { %1534 = vmax.xlane.f32.xlu0 %v1533_v11  ;;  %v1373_v12 = vpop.f32.mrb[4].mxu1  ;;  %v1539_v17 = vsel %vm876_vm2, %v3542_v10, -inf }
 0x322   : > { %v3546_v13 = vadd.f32 %v1373_v12, %v1223_v4  ;;  %v2560_v14 = vpop.f32.mrb[5].mxu1 }
 0x324   : > { %v1536_v16 = vsel %vm876_vm2, %v3546_v13, -inf }
 0x325   : > { %1537 = vmax.xlane.f32.xlu1 %v1536_v16  ;;  %v1525_v18 = vpop.f32.mrb[6].mxu1  ;;  %1540 = vmax.xlane.f32.xlu0 %v1539_v17 }
 0x326   : > { %v3552_v20 = vadd.f32 %v1525_v18, %v1223_v4  ;;  %v2570_v21 = vpop.f32.mrb[7].mxu1 }
 0x328   : > { %v1542_v22 = vsel %vm876_vm2, %v3552_v20, -inf }
 0x329   : > { %1543 = vmax.xlane.f32.xlu0 %v1542_v22 }
 0x336   : > { %726 = vrot.lane.b32.xlu1 %v3443_v19, %s3055_s11 }
 0x33a   : > { %730 = vrot.lane.b32.xlu1 %v3458_v38, %s3055_s11 }
 0x33e   : > { %732 = vrot.lane.b32.xlu1 %v3448_v31, %s3055_s11 }
 0x33f   : > { %728 = vrot.lane.b32.xlu0 %v3450_v32, %s3055_s11  ;;  %s3697_s11 = scalar_lea.hbm %s3831_s21, %s2495_s25 }
 0x3ae   : > { %v1535_v25 = vpop.xlane.xlu0 %1534 }
 0x3af   : > { %v3563_v26 = vmax.f32 %v3560_v24, %v1535_v25 }
 0x3b1   : > { %v1549_v29 = vsub.f32 %v3560_v24, %v3563_v26  ;;  %1950 = vst.msk [vmem:[#allocation5] sm:$0xff] %vm1195_vm3, %v3563_v26  ;;  %1563 = vperm.xlu0 %2739, %v3563_v26   ;;  %v1593_v26 = vld [vmem:[#allocation6] sm:$0xff] }
 0x3b2   : > { %v1538_v19 = vpop.xlane.xlu1 %1537  ;;  %v1541_v31 = vpop.xlane.xlu0 %1540 }
 0x3b3   : > { %v3575_v32 = vmax.f32 %v3565_v27, %v1538_v19  ;;  %v3578_v38 = vmax.f32 %v3567_v28, %v1541_v31 }
 0x3b5   : > { %v1550_v33 = vsub.f32 %v3565_v27, %v3575_v32  ;;  %1951 = vst.msk [vmem:[#allocation5 + $0x8] sm:$0xff] %vm1195_vm3, %v3575_v32  ;;  %v1551_v35 = vsub.f32 %v3567_v28, %v3578_v38  ;;  %1952 = vst.msk [vmem:[#allocation5 + $0x10] sm:$0xff] %vm1195_vm3, %v3578_v38  ;;  %1568 = vperm.xlu1 %2740, %v3575_v32   ;;  %v1594_v28 = vld [vmem:[#allocation6 + $0x8] sm:$0xff] }
 0x3b6   : > { %v727_v36 = vpop.permute.xlu1 %726  ;;  %v1544_v37 = vpop.xlane.xlu0 %1543 }
 0x3b7   : > { %v3592_v39 = vmax.f32 %v3580_v30, %v1544_v37 }
 0x3b9   : > { %v1552_v40 = vsub.f32 %v3580_v30, %v3592_v39  ;;  %1953 = vst.msk [vmem:[#allocation5 + $0x18] sm:$0xff] %vm1195_vm3, %v3592_v39  ;;  %1573 = vperm.xlu1 %2740, %v3578_v38   ;;  %1578 = vperm.xlu0 %2739, %v3592_v39   ;;  %v1595_v30 = vld [vmem:[#allocation6 + $0x10] sm:$0xff] }
 0x3ba   : > { %v731_v42 = vpop.permute.xlu1 %730  ;;  %v729_v45 = vpop.permute.xlu0 %728 }
 0x3bb   : > { %v738_v43 = vcombine.low %v727_v36, %v731_v42  ;;  %v739_v44 = vcombine.high %v727_v36, %v731_v42 }
 0x3bd   : > { %v746_v49 = vrot.slane %v738_v43, %v3452_v34  ;;  %v753_v50 = vrot.slane %v739_v44, %v3452_v34 }
 0x3be   : > { %v733_v46 = vpop.permute.xlu1 %732 }
 0x3bf   : > { %v754_v47 = vcombine.low %v729_v45, %v733_v46  ;;  %v755_v48 = vcombine.high %v729_v45, %v733_v46 }
 0x3c1   : > { %v762_v51 = vrot.slane %v754_v47, %v3452_v34  ;;  %v769_v52 = vrot.slane %v755_v48, %v3452_v34 }
 0x3c3   : > { %v770_v53 = vcombine.low %v746_v49, %v762_v51  ;;  %v771_v54 = vcombine.high %v746_v49, %v762_v51  ;;  %v786_v55 = vcombine.low %v753_v50, %v769_v52  ;;  %v787_v56 = vcombine.high %v753_v50, %v769_v52 }
 0x3c5   : > { %v778_v57 = vrot.slane %v770_v53, %v3464_v41  ;;  %v785_v58 = vrot.slane %v771_v54, %v3464_v41  ;;  %v794_v59 = vrot.slane %v786_v55, %v3464_v41  ;;  %v801_v60 = vrot.slane %v787_v56, %v3464_v41 }
 0x3c7   : > { %v881_v61 = vcombine.low %v778_v57, %v785_v58  ;;  %v2470_v62 = vcombine.high %v778_v57, %v785_v58  ;;  %v897_v63 = vcombine.low %v794_v59, %v801_v60  ;;  %v2471_v2 = vcombine.high %v794_v59, %v801_v60 }
 0x3c8   : > { %v1555_v58 = vmul.f32 1.442695, %v1550_v33  ;;  %v1553_v59 = vmul.f32 1.442695, %v1549_v29  ;;  %v1557_v60 = vmul.f32 1.442695, %v1551_v35 }
 0x3c9   : > { %v888_v3 = vrot.slane %v881_v61, %v3452_v34  ;;  %v896_v4 = vrot.slane %v2470_v62, %v3452_v34  ;;  %v904_v5 = vrot.slane %v897_v63, %v3452_v34  ;;  %v912_v6 = vrot.slane %v2471_v2, %v3452_v34 }
 0x3ca   : > { %v1559_v61 = vmul.f32 1.442695, %v1552_v40  ;;  %v1596_v40 = vld [vmem:[#allocation6 + $0x18] sm:$0xff] }
 0x3cb   : > { %v913_v8 = vcombine.low %v888_v3, %v896_v4  ;;  %v914_v9 = vcombine.high %v888_v3, %v896_v4  ;;  %v929_v11 = vcombine.low %v904_v5, %v912_v6  ;;  %v930_v12 = vcombine.high %v904_v5, %v912_v6 }
 0x3cd   : > { %v921_v14 = vrot.slane %v913_v8, %v3464_v41  ;;  %v928_v16 = vrot.slane %v914_v9, %v3464_v41  ;;  %v937_v17 = vrot.slane %v929_v11, %v3464_v41  ;;  %v944_v18 = vrot.slane %v930_v12, %v3464_v41 }
 0x3cf   : > { %v945_v21 = vcombine.low %v921_v14, %v937_v17  ;;  %v946_v22 = vcombine.high %v921_v14, %v937_v17  ;;  %v947_v23 = vcombine.low %v928_v16, %v944_v18  ;;  %v948_v25 = vcombine.high %v928_v16, %v944_v18 }
 0x3d1   : > { %950 = vst.msk [vmem:[#allocation4] sm:$0xff] %vm876_vm2, %v945_v21  ;;  %951 = vst.msk [vmem:[#allocation4 + $0x8] sm:$0xff] %vm876_vm2, %v946_v22  ;;  %v2146_v21 = vld [vmem:[#allocation17] sm:$0xff]  ;;  %v2147_v22 = vld [vmem:[#allocation17 + $0x8] sm:$0xff] }
 0x3d2   : > { %952 = vst.msk [vmem:[#allocation4 + $0x10] sm:$0xff] %vm876_vm2, %v947_v23  ;;  %953 = vst.msk [vmem:[#allocation4 + $0x18] sm:$0xff] %vm876_vm2, %v948_v25  ;;  %v2615_v23 = vpack.c.bf16 %v2147_v22, %v2146_v21  ;;  %v1622_v25 = vld [vmem:[#allocation7] sm:$0xff] }
 0x3d8   : > { %v1215_v19 = vld [vmem:[#allocation4] sm:$0xff]  ;;  %v1216_v31 = vld [vmem:[#allocation4 + $0x8] sm:$0xff] }
 0x3d9   : > { %2572 = vmatpush3.msra.mxu0 %v1215_v19  ;;  %2577 = vmatpush3.msra.mxu1 %v1216_v31 }
 0x3da   : > { %2581 = vmatprep.subr.mxu0 %v3047_v1  ;;  %2586 = vmatprep.subr.mxu1 %v3047_v1 }
 0x430   : > { %v1564_v36 = vpop.permute.xlu0 %1563 }
 0x431   : > { %v1581_v37 = vsub.f32 %v3540_v7, %v1564_v36  ;;  %v1217_v7 = vld [vmem:[#allocation4 + $0x10] sm:$0xff] }
 0x433   : > { %v1585_v42 = vmul.f32 1.442695, %v1581_v37  ;;  %v1623_v37 = vld [vmem:[#allocation7 + $0x8] sm:$0xff] }
 0x434   : > { %v1569_v43 = vpop.permute.xlu1 %1568 }
 0x435   : > { %2741 = vpow2.f32 %v1585_v42  ;;  %v1582_v44 = vsub.f32 %v3546_v13, %v1569_v43  ;;  %v1218_v13 = vld [vmem:[#allocation4 + $0x18] sm:$0xff] }
 0x437   : > { %v1587_v45 = vmul.f32 1.442695, %v1582_v44 }
 0x438   : > { %v1574_v46 = vpop.permute.xlu1 %1573  ;;  %v1579_v47 = vpop.permute.xlu0 %1578 }
 0x439   : > { %2743 = vpow2.f32 %v1587_v45  ;;  %v1583_v48 = vsub.f32 %v3542_v10, %v1574_v46  ;;  %v1584_v49 = vsub.f32 %v3552_v20, %v1579_v47  ;;  %v1624_v46 = vld [vmem:[#allocation7 + $0x10] sm:$0xff] }
 0x43b   : > { %v1589_v50 = vmul.f32 1.442695, %v1583_v48  ;;  %v1591_v51 = vmul.f32 1.442695, %v1584_v49  ;;  %v1625_v49 = vld [vmem:[#allocation7 + $0x18] sm:$0xff] }
 0x43d   : > { %2745 = vpow2.f32 %v1589_v50 }
 0x43e   : > { %2747 = vpow2.f32 %v1591_v51 }
 0x43f   : > { %v2742_v52 = vpop.eup %2741  ;;  %2749 = vpow2.f32 %v1555_v58 }
 0x440   : > { %2574 = vmatmul.mubr.msk.f32.vlgmr.msra.gmra.mrb[4].mxu0 %vm876_vm2, %v2742_v52  ;;  %v1601_v53 = vsel %vm876_vm2, %v2742_v52, 0.0  ;;  %2751 = vpow2.f32 %v1553_v59 }
 0x441   : > { %2582 = vmatpush3.msra.mxu0 %v1217_v7  ;;  %1602 = vadd.xlane.f32.xlu1 %v1601_v53  ;;  %2753 = vpow2.f32 %v1557_v60 }
 0x442   : > { %2583 = vmatprep.mubr.msk.f32.mxu0 %vm3046_vm0, %v3047_v1  ;;  %2614 = vmatprep.subr.bf16.mxu0 %v3045_v0  ;;  %2755 = vpow2.f32 %v1559_v61 }
 0x443   : > { %v2744_v10 = vpop.eup %2743 }
 0x444   : > { %2579 = vmatmul.mubr.msk.f32.vlgmr.msra.gmra.mrb[8].mxu1 %vm876_vm2, %v2744_v10  ;;  %v1604_v20 = vsel %vm876_vm2, %v2744_v10, 0.0 }
 0x445   : > { %2587 = vmatpush3.msra.mxu1 %v1218_v13  ;;  %1605 = vadd.xlane.f32.xlu0 %v1604_v20 }
 0x446   : > { %2588 = vmatprep.mubr.msk.f32.mxu1 %vm3046_vm0, %v3047_v1 }
 0x447   : > { %v2746_v54 = vpop.eup %2745 }
 0x448   : > { %v2748_v55 = vpop.eup %2747  ;;  %2584 = vmatmul.mubr.msk.f32.vlgmr.msra.gmra.mrb[6].mxu0 %vm876_vm2, %v2746_v54  ;;  %v1607_v56 = vsel %vm876_vm2, %v2746_v54, 0.0 }
 0x449   : > { %2589 = vmatmul.mubr.msk.f32.vlgmr.msra.gmra.mrb[10].mxu1 %vm876_vm2, %v2748_v55  ;;  %1608 = vadd.xlane.f32.xlu0 %v1607_v56  ;;  %v1610_v57 = vsel %vm876_vm2, %v2748_v55, 0.0 }
 0x44a   : > { %1611 = vadd.xlane.f32.xlu1 %v1610_v57  ;;  %2599 = vmatprep.mubr.msk.f32.mxu0 %vm3046_vm0, %v3047_v1  ;;  %v2750_v1 = vpop.eup %2749 }
 0x44b   : > { %v2752_v27 = vpop.eup %2751  ;;  %v1598_v35 = vmul.f32 %v2750_v1, %v1594_v28  ;;  %2616 = vmatpush3.bf16.msra.mxu0 %v2615_v23 }
 0x44c   : > { %v2754_v32 = vpop.eup %2753  ;;  %v1597_v29 = vmul.f32 %v2752_v27, %v1593_v26  ;;  %2617 = vmatprep.subr.bf16.mxu0 %v3045_v0 }
 0x44d   : > { %v2756_v24 = vpop.eup %2755  ;;  %v1599_v63 = vmul.f32 %v2754_v32, %v1595_v30 }
 0x44e   : > { %v1600_v2 = vmul.f32 %v2756_v24, %v1596_v40 }
 0x45b   : > { %1633 = vperm.xlu1 %2740, %v2750_v1  }
 0x45f   : > { %1638 = vperm.xlu1 %2740, %v2754_v32   ;;  %1628 = vperm.xlu0 %2739, %v2752_v27  }
 0x463   : > { %1643 = vperm.xlu0 %2739, %v2756_v24  }
 0x4ce   : > { %v1603_v33 = vpop.xlane.xlu1 %1602 }
 0x4cf   : > { %v1613_v38 = vadd.f32 %v1603_v33, %v1597_v29 }
 0x4d1   : > { %1618 = vst.msk [vmem:[#allocation6] sm:$0xff] %vm1195_vm3, %v1613_v38 }
 0x4d2   : > { %v1606_v62 = vpop.xlane.xlu0 %1605 }
 0x4d3   : > { %v1614_v39 = vadd.f32 %v1606_v62, %v1598_v35 }
 0x4d5   : > { %1619 = vst.msk [vmem:[#allocation6 + $0x8] sm:$0xff] %vm1195_vm3, %v1614_v39 }
 0x4d6   : > { %v1609_v3 = vpop.xlane.xlu0 %1608 }
 0x4d7   : > { %v1612_v4 = vpop.xlane.xlu1 %1611  ;;  %v1615_v5 = vadd.f32 %v1609_v3, %v1599_v63 }
 0x4d8   : > { %v1616_v6 = vadd.f32 %v1612_v4, %v1600_v2  ;;  %v1961_v8 = vld [vmem:[#allocation6] sm:$0xff] }
 0x4d9   : > { %1620 = vst.msk [vmem:[#allocation6 + $0x10] sm:$0xff] %vm1195_vm3, %v1615_v5  ;;  %2757 = vrcp.f32 %v1961_v8  ;;  %v2148_v5 = vld [vmem:[#allocation17 + $0x10] sm:$0xff] }
 0x4da   : > { %1621 = vst.msk [vmem:[#allocation6 + $0x18] sm:$0xff] %vm1195_vm3, %v1616_v6  ;;  %v2149_v6 = vld [vmem:[#allocation17 + $0x18] sm:$0xff] }
 0x4db   : > { %v1634_v31 = vpop.permute.xlu1 %1633 }
 0x4dc   : > { %v1962_v9 = vld [vmem:[#allocation6 + $0x8] sm:$0xff]  ;;  %v1647_v45 = vmul.f32 %v1634_v31, %v1623_v37 }
 0x4dd   : > { %2759 = vrcp.f32 %v1962_v9 }
 0x4de   : > { %v1629_v19 = vpop.permute.xlu0 %1628 }
 0x4df   : > { %v1646_v36 = vmul.f32 %v1629_v19, %v1622_v25  ;;  %v1639_v47 = vpop.permute.xlu1 %1638 }
 0x4e0   : > { %v1963_v11 = vld [vmem:[#allocation6 + $0x10] sm:$0xff]  ;;  %v1648_v7 = vmul.f32 %v1639_v47, %v1624_v46 }
 0x4e1   : > { %v1964_v12 = vld [vmem:[#allocation6 + $0x18] sm:$0xff]  ;;  %2761 = vrcp.f32 %v1963_v11 }
 0x4e2   : > { %2763 = vrcp.f32 %v1964_v12  ;;  %v1644_v50 = vpop.permute.xlu0 %1643 }
 0x4e3   : > { %v2758_v14 = vpop.eup %2757  ;;  %v1649_v0 = vmul.f32 %v1644_v50, %v1625_v49 }
 0x4e4   : > { %1971 = vperm.xlu1 %2740, %v2758_v14   ;;  %v2618_v14 = vpack.c.bf16 %v2149_v6, %v2148_v5 }
 0x4e6   : > { %2619 = vmatpush3.bf16.msra.mxu0 %v2618_v14 }
 0x4e7   : > { %v2760_v16 = vpop.eup %2759 }
 0x4e8   : > { %1976 = vperm.xlu0 %2739, %v2760_v16  }
 0x4eb   : > { %v2762_v17 = vpop.eup %2761 }
 0x4ec   : > { %v2764_v18 = vpop.eup %2763  ;;  %1981 = vperm.xlu1 %2740, %v2762_v17  }
 0x4ed   : > { %1986 = vperm.xlu0 %2739, %v2764_v18  }
 0x513   : > { %v1719_v42 = vpop.f32.mrb[4].mxu0 }
 0x514   : > { %v1942_v43 = vadd.f32 %v1719_v42, %v1646_v36  ;;  %v2575_v44 = vpop.f32.mrb[5].mxu0 }
 0x516   : > { %1946 = vst.msk [vmem:[#allocation7] sm:$0xff] %vm876_vm2, %v1942_v43 }
 0x517   : > { %v1792_v48 = vpop.f32.mrb[8].mxu1 }
 0x518   : > { %v1943_v51 = vadd.f32 %v1792_v48, %v1647_v45  ;;  %v2580_v52 = vpop.f32.mrb[9].mxu1 }
 0x51a   : > { %1947 = vst.msk [vmem:[#allocation7 + $0x8] sm:$0xff] %vm876_vm2, %v1943_v51 }
 0x51b   : > { %v1865_v53 = vpop.f32.mrb[6].mxu0 }
 0x51c   : > { %v1944_v10 = vadd.f32 %v1865_v53, %v1648_v7  ;;  %v1938_v13 = vpop.f32.mrb[10].mxu1  ;;  %v2585_v20 = vpop.f32.mrb[7].mxu0 }
 0x51d   : > { %v1945_v54 = vadd.f32 %v1938_v13, %v1649_v0  ;;  %v2590_v55 = vpop.f32.mrb[11].mxu1  ;;  %v1957_v58 = vld [vmem:[#allocation7] sm:$0xff] }
 0x51e   : > { %1948 = vst.msk [vmem:[#allocation7 + $0x10] sm:$0xff] %vm876_vm2, %v1944_v10 }
 0x51f   : > { %1949 = vst.msk [vmem:[#allocation7 + $0x18] sm:$0xff] %vm876_vm2, %v1945_v54 }
 0x521   : > { %v1958_v1 = vld [vmem:[#allocation7 + $0x8] sm:$0xff] }
 0x525   : > { %v1959_v60 = vld [vmem:[#allocation7 + $0x10] sm:$0xff] }
 0x526   : > { %v1960_v32 = vld [vmem:[#allocation7 + $0x18] sm:$0xff] }
 0x563   : > { %v1972_v56 = vpop.permute.xlu1 %1971 }
 0x564   : > { %v1989_v61 = vmul.f32 %v1972_v56, %v1957_v58 }
 0x567   : > { %v1977_v57 = vpop.permute.xlu0 %1976 }
 0x568   : > { %v1990_v26 = vmul.f32 %v1977_v57, %v1958_v1 }
 0x56b   : > { %v1982_v59 = vpop.permute.xlu1 %1981 }
 0x56c   : > { %v1991_v27 = vmul.f32 %v1982_v59, %v1959_v60  ;;  %v1987_v24 = vpop.permute.xlu0 %1986 }
 0x56d   : > { %v1992_v29 = vmul.f32 %v1987_v24, %v1960_v32 }
 0x56e   : > { %v1993_v33 = vcombine.low %v1989_v61, %v1991_v27  ;;  %v1994_v28 = vcombine.high %v1989_v61, %v1991_v27 }
 0x56f   : > { %v2009_v38 = vcombine.low %v1990_v26, %v1992_v29  ;;  %v2010_v35 = vcombine.high %v1990_v26, %v1992_v29  ;;  %v2493_v26 = vld [vmem:[%s3830_s23] ss:$0 sm:$0xff] }
 0x570   : > { %v2001_v62 = vrot.slane %v1993_v33, %v3452_v34  ;;  %v2008_v30 = vrot.slane %v1994_v28, %v3452_v34 }
 0x571   : > { %v2017_v39 = vrot.slane %v2009_v38, %v3452_v34  ;;  %v2024_v40 = vrot.slane %v2010_v35, %v3452_v34 }
 0x573   : > { %v2025_v63 = vcombine.low %v2001_v62, %v2017_v39  ;;  %v2026_v2 = vcombine.high %v2001_v62, %v2017_v39  ;;  %v2041_v3 = vcombine.low %v2008_v30, %v2024_v40  ;;  %v2042_v4 = vcombine.high %v2008_v30, %v2024_v40 }
 0x575   : > { %v2033_v8 = vrot.slane %v2025_v63, %v3464_v41  ;;  %v2040_v9 = vrot.slane %v2026_v2, %v3464_v41  ;;  %v2049_v11 = vrot.slane %v2041_v3, %v3464_v41  ;;  %v2056_v12 = vrot.slane %v2042_v4, %v3464_v41 }
 0x577   : > { %v2061_v16 = vcombine.low %v2033_v8, %v2040_v9  ;;  %v2488_v17 = vcombine.high %v2033_v8, %v2040_v9  ;;  %v2077_v18 = vcombine.low %v2049_v11, %v2056_v12  ;;  %v2489_v21 = vcombine.high %v2049_v11, %v2056_v12 }
 0x579   : > { %v2068_v22 = vrot.slane %v2061_v16, %v3452_v34  ;;  %v2076_v23 = vrot.slane %v2488_v17, %v3452_v34  ;;  %v2084_v25 = vrot.slane %v2077_v18, %v3452_v34  ;;  %v2092_v19 = vrot.slane %v2489_v21, %v3452_v34 }
 0x57b   : > { %v2094_v31 = vcombine.high %v2068_v22, %v2076_v23  ;;  %v2110_v36 = vcombine.high %v2084_v25, %v2092_v19  ;;  %v2093_v37 = vcombine.low %v2068_v22, %v2076_v23  ;;  %v2109_v42 = vcombine.low %v2084_v25, %v2092_v19 }
 0x57d   : > { %v2108_v43 = vrot.slane %v2094_v31, %v3464_v41  ;;  %v2124_v44 = vrot.slane %v2110_v36, %v3464_v41  ;;  %v2101_v45 = vrot.slane %v2093_v37, %v3464_v41  ;;  %v2117_v46 = vrot.slane %v2109_v42, %v3464_v41  ;;  %v2490_v41 = vld [vmem:[%s3826_s24] ss:$0 sm:$0xff] }
 0x57f   : > { %v2127_v47 = vcombine.low %v2108_v43, %v2124_v44  ;;  %v2126_v48 = vcombine.high %v2101_v45, %v2117_v46  ;;  %v2125_v49 = vcombine.low %v2101_v45, %v2117_v46  ;;  %v2128_v34 = vcombine.high %v2108_v43, %v2124_v44 }
 0x581   : > { %2134 = vrot.lane.b32.xlu0 %v2127_v47, %s3056_s13  ;;  %2130 = vrot.lane.b32.xlu1 %v2126_v48, %s3057_s9  ;;  %s2265_s13 = scalar_lea.sflag [#allocation10], %s3380_s3  ;;  %s2941_s9 = scalar_lea.vmem %s3699_s22, 128 }
 0x582   : > { %p2942_p4 = scmp.ne.s32.totalorder %s3699_s22, %s2941_s9 }
 0x584   : > { %p2943_p3 = pnand %p2942_p4, %p3833_p7 }
 0x585   : > { %2138 = vrot.lane.b32.xlu1 %v2128_v34, %s3058_s12  ;;  %s2945_s12 = sshll.u32 %s3059_s4, 4  ;;  %s2946_s12 = int_to_ptr.vmem [resolvable:$false] %s2945_s12 }
 0x586   : > { %p2944_p1 = pneg %p2943_p3  ;;  %s2947_s29 = scalar_lea.vmem %s2946_s12, 256 }
 0x587   : > { %p2948_p13 = scmp.lt.s32.totalorder %s3699_s22, %s2946_s12  ;;  %p2949_p6 = scmp.lt.s32.totalorder %s2947_s29, %s2941_s9 }
 0x589   : > { %p2950_p0 = por %p2949_p6, %p2948_p13 }
 0x58b   : > { %p2951_p12 = pnand %p2950_p0, %p2944_p1 }
 0x5f3   : > { %v2131_v50 = vpop.permute.xlu1 %2130  ;;  %v2135_v51 = vpop.permute.xlu0 %2134 }
 0x5f4   : > { %v2141_v52 = vsel %vm876_vm2, %v2125_v49, %v2131_v50 }
 0x5f5   : > { %v2143_v0 = vsel %vm2142_vm4, %v2141_v52, %v2135_v51 }
 0x5f7   : > { %v2139_v7 = vpop.permute.xlu1 %2138 }
 0x5f8   : > { %v2145_v53 = vsel %vm2144_vm5, %v2143_v0, %v2139_v7 }
 0x5f9   : > { %2600 = vmatmul.mubr.msk.f32.vlgmr.msra.gmra.mrb[8].mxu0 %vm574_vm1, %v2145_v53 }
 0x6cc   : > { %v2227_v10 = vpop.f32.mrb[8].mxu0 }
 0x6cd   : > { %v2228_v13 = vadd.f32 %v2490_v41, %v2227_v10  ;;  %v2601_v20 = vpop.f32.mrb[9].mxu0 }
 0x6cf   : > { %v2232_v54 = vadd.f32 %v2228_v13, %v3418_v15  ;;  %v2492_v15 = vld [vmem:[%s3829_s27] ss:$0 sm:$0xff] }
 0x6d1   : > { %v2233_v55 = vsel %vm574_vm1, %v2232_v54, 0.0 }
 0x6d2   : > { %2234 = vadd.xlane.f32.xlu0 %v2233_v55 }
 0x75f   : > { %v2235_v56 = vpop.xlane.xlu0 %2234 }
 0x760   : > { %v2237_v57 = vmul.f32 0.03125, %v2235_v56 }
 0x762   : > { %v2238_v58 = vsub.f32 %v2232_v54, %v2237_v57 }
 0x764   : > { %v2239_v59 = vmul.f32 %v2238_v58, %v2238_v58 }
 0x766   : > { %v2240_v60 = vsel %vm574_vm1, %v2239_v59, 0.0 }
 0x767   : > { %2241 = vadd.xlane.f32.xlu1 %v2240_v60 }
 0x7f4   : > { %v2242_v61 = vpop.xlane.xlu1 %2241 }
 0x7f5   : > { %v2243_v1 = vmul.f32 0.03125, %v2242_v61 }
 0x7f7   : > { %v2244_v27 = vadd.f32 1e-12, %v2243_v1 }
 0x7f9   : > { %2765 = vrsqrt.f32 %v2244_v27 }
 0x803   : > { %v2766_v32 = vpop.eup %2765 }
 0x804   : > { %v2246_v24 = vmul.f32 %v2766_v32, %v2238_v58 }
 0x806   : > { %v2254_v29 = vmul.f32 %v2492_v15, %v2246_v24 }
 0x808   : > { %v2262_v33 = vadd.f32 %v2493_v26, %v2254_v29 }
 0x80a   : > { %2263 = vst.msk [vmem:[%s555_s30] sm:$0xff] %vm574_vm1, %v2262_v33 }
 0x80b   : > { %2954 = shalt.err (!%p2951_p12)
}
 0x80c   : > { %s2955_s3 = scalar_lea.hbm %s3697_s11, 128  ;;  %s2959_s15 = scalar_lea.hbm %s3832_s16, 256 }
 0x80d   : > { %p2956_p8 = scmp.ne.s32.totalorder %s3697_s11, %s2955_s3  ;;  %p2960_p5 = scmp.lt.u32.totalorder %s3697_s11, %s3832_s16 }
 0x80e   : > { %p2961_p9 = scmp.lt.u32.totalorder %s2959_s15, %s2955_s3  ;;  %p2963_p4 = scmp.lt.u32.totalorder %s2955_s3, %s3697_s11 }
 0x80f   : > { %p2957_p11 = pnand %p2956_p8, %p3833_p7 }
 0x810   : > { %p2962_p2 = por %p2961_p9, %p2960_p5 }
 0x811   : > { %p2958_p10 = pneg %p2957_p11 }
 0x812   : > { %p2964_p3 = por %p2963_p4, %p2962_p2 }
 0x814   : > { %p2965_p1 = pnand %p2964_p3, %p2958_p10 }
 0x816   : > { %2968 = shalt.err (!%p2965_p1)
}
 0x817   : > { %2638 = dma.vmem_to_hbm [thread:$0]  (%p3833_p7), %s3699_s22, 128, %s3697_s11, %s2265_s13  }
 0x818 PF: > { %s3834_s27 = sld [smem:[#allocation25_spill]]  ;;  %s3835_s14 = sld [smem:[#allocation29_spill]] }
 0x819   : > { %s3836_s28 = sld [smem:[#allocation28_spill]] }
 0x81e   : > { %s2291_s23 = sand.u32 1, %s3834_s27   ;;  %p3837_p13 = scmp.ne.s32.totalorder %s3835_s14, 0 }
 0x81f   : > { %p3838_p6 = scmp.ge.s32.totalorder %s3836_s28, 2  ;;  %s2292_s25 = scalar_lea.sflag [#allocation10], %s2291_s23 }
 0x821   : > { %p2661_p0 = pnand %p3838_p6, %p3837_p13 }
 0x823   : > { %3010 = dma.done.wait (!%p2661_p0), %s2292_s25, 128  }
 0x824   : > { %3012 = vsyncadd (!%p2661_p0), %s2292_s25, 4294967168  ;;  %s32_s22 = sadd.s32 1, %s3836_s28   ;;  %s3839_s8 = sld [smem:[#allocation32_spill]] }
 0x825   : > { %p29_p12 = scmp.ge.s32.totalorder %s32_s22, 4   ;;  %s3840_s20 = sld [smem:[#allocation27_spill]] }
 0x826   : > { %s3841_s21 = sld [smem:[#allocation30_spill]]  ;;  %s3842_s17 = smov %s3019_s18 }
 0x827   : > { %s3843_s18 = smov %s3023_s19  ;;  %31 = sbr.rel (!%p29_p12) target bundleno = 18 (0x12), region = 161 }
 0x82a   : > { %s3844_s19 = smov %s3839_s8 }
 0x82e   :  { %2297 = vsyncpa [#allocation9], 1 }
 0x82f   :  { %2299 = vsyncpa [#allocation9 + $0x1], 1 }
 0x830   :  { %2300 = vsyncpa [#allocation12], 1 }
 0x831   :  { %2302 = vsyncpa [#allocation12 + $0x1], 1 }
 0x832   :  { %2303 = vsyncpa [#allocation15], 1 }
 0x833   :  { %2304 = vsyncpa [#allocation18], 1 }
 0x834   :  { %2305 = vsyncpa [#allocation10], 1 }
 0x835   :  { %2307 = vsyncpa [#allocation10 + $0x1], 1 }

// kernel: tpu_custom_call.1
= control target key start
LH: loop header
LB: loop body
LE: loop exit
PB: predicated region body
PF: predicated region fallthrough
CT: control target
= control target key end

     0   :  { %s3747_s0 = inlined_call_operand.hbm [shape: f32[2,8,32], index: 0, kind: input, shape index: {}]   ;;  %s3748_s1 = inlined_call_operand.hbm [shape: f32[2,8,32], index: 1, kind: input, shape index: {}]   ;;  %s3749_s2 = inlined_call_operand.hbm [shape: f32[2,8,8], index: 2, kind: input, shape index: {}]   ;;  %s3750_s3 = inlined_call_operand.hbm [shape: f32[32,32], index: 3, kind: input, shape index: {}]   ;;  %s3751_s4 = inlined_call_operand.vmem [shape: f32[1,32], index: 4, kind: input, shape index: {}]   ;;  %s3752_s5 = inlined_call_operand.hbm [shape: f32[32,64], index: 5, kind: input, shape index: {}]   ;;  %s3753_s6 = inlined_call_operand.vmem [shape: f32[1,64], index: 6, kind: input, shape index: {}]   ;;  %s3754_s7 = inlined_call_operand.hbm [shape: f32[32,32], index: 7, kind: input, shape index: {}]   ;;  %s3755_s8 = inlined_call_operand.vmem [shape: f32[1,32], index: 8, kind: input, shape index: {}]   ;;  %s3756_s9 = inlined_call_operand.vmem [shape: f32[1,32], index: 9, kind: input, shape index: {}]   ;;  %s3757_s10 = inlined_call_operand.vmem [shape: f32[1,32], index: 10, kind: input, shape index: {}]   ;;  %s3758_s11 = inlined_call_operand.hbm [shape: f32[2,8,32], index: 11, kind: output, shape index: {}]  }
   0x1   :  { %3785 = sst [smem:[#allocation33_spill]] %s3748_s1 }
   0x2   :  { %3786 = sst [smem:[#allocation34_spill]] %s3750_s3 }
   0x3   :  { %3787 = sst [smem:[#allocation35_spill]] %s3751_s4 }
   0x4   :  { %3788 = sst [smem:[#allocation36_spill]] %s3755_s8 }
   0x5   :  { %3789 = sst [smem:[#allocation37_spill]] %s3756_s9 }
   0x6   :  { %3790 = sst [smem:[#allocation38_spill]] %s3757_s10 }
   0x7   :  { %3791 = sst [smem:[#allocation39_spill]] %s3758_s11 }
   0x8   :  { %16 = vsyncpa [#allocation9], 0 }
   0x9   :  { %18 = vsyncpa [#allocation9 + $0x1], 0 }
   0xa   :  { %19 = vsyncpa [#allocation12], 0 }
   0xb   :  { %21 = vsyncpa [#allocation12 + $0x1], 0 }
   0xc   :  { %22 = vsyncpa [#allocation15], 0 }
   0xd   :  { %23 = vsyncpa [#allocation18], 0 }
   0xe   :  { %24 = vsyncpa [#allocation10], 0 }
   0xf   :  { %26 = vsyncpa [#allocation10 + $0x1], 0  ;;  %s3120_s17 = smov 0   ;;  %s3122_s18 = smov 0  }
  0x10   :  { %s3124_s19 = smov 0   ;;  %s3126_s20 = smov 0  }
  0x11   :  { %s3128_s21 = smov 0   ;;  %s3130_s22 = smov 0  }
  0x12 LB: > { %3792 = sst [smem:[#allocation25_spill]] %s3015_s17  ;;  %s3151_s23 = sadd.s32 4294967295, %s3035_s22   ;;  %s3035_s22 = sphi %s3130_s22, %s32_s22   ;;  %s3031_s21 = sphi %s3128_s21, %s3841_s21   ;;  %s3027_s20 = sphi %s3126_s20, %s3840_s20   ;;  %s3023_s19 = sphi %s3124_s19, %s3844_s19   ;;  %s3019_s18 = sphi %s3122_s18, %s3843_s18   ;;  %s3015_s17 = sphi %s3120_s17, %s3842_s17  }
  0x13   : > { %3793 = sst [smem:[#allocation26_spill]] %s3027_s20  ;;  %s2446_s24 = sadd.s32 4294967294, %s3035_s22  }
  0x14   : > { %3794 = sst [smem:[#allocation27_spill]] %s3031_s21  ;;  %p73_p0 = scmp.ne.s32.totalorder %s3019_s18, %s3015_s17 }
  0x15   : > { %3795 = sst [smem:[#allocation28_spill]] %s3035_s22  ;;  %p3761_p1 = scmp.eq.s32.totalorder %s3151_s23, 0 }
  0x16   : > { %p335_p3 = scmp.eq.s32.totalorder %s2446_s24, 1  ;;  %p2447_p5 = scmp.ge.s32.totalorder %s3035_s22, 1 }
  0x17   : > { %p3160_p4 = por %p3761_p1, %p73_p0  ;;  %p342_p7 = scmp.lt.s32.totalorder %s3035_s22, 3 }
  0x18   : > { %p3165_p6 = por %p335_p3, %p73_p0  ;;  %s3037_s28 = smov [#allocation14]  }
  0x19   : > { %s3796_s25 = scalar_select %p3160_p4, 1, 0 }
  0x1a   : > { %s3797_s26 = scalar_select %p3165_p6, 1, 0 }
  0x1b   : > { %p3170_p8 = pnand %p2447_p5, %p342_p7  ;;  %s354_s29 = sshll.u32 %s3037_s28, 4  ;;  %s355_s29 = int_to_ptr.vmem [resolvable:$true] %s354_s29 }
  0x1c   : > { %3798 = sst [smem:[#allocation29_spill]] %s3797_s26  ;;  %s51_s12 = sadd.s32 1, %s3031_s21 }
  0x1d   : > { %s3799_s27 = scalar_select %p3170_p8, 1, 0 }
  0x1e   : > { %p2640_p9 = pneg %p3170_p8  ;;  %s3801_s3 = sld [smem:[#allocation34_spill]] }
  0x20   : > { %p3179_p11 = pnand %p2640_p9, %p3761_p1 }
  0x22   : > { %s3800_s30 = scalar_select %p3179_p11, 1, 0 }
  0x23   : > { %p3192_p13 = pneg %p3179_p11 }
  0x24   : > { %s2767_s15 = scalar_lea.hbm %s3801_s3, 512 }
  0x25   : > { %p2768_p12 = scmp.ne.s32.totalorder %s3801_s3, %s2767_s15  ;;  %p2774_p5 = scmp.lt.u32.totalorder %s2767_s15, %s3801_s3 }
  0x26   : > { %s3802_s28 = scalar_select %p3192_p13, 1, 0 }
  0x27   : > { %p2770_p0 = pnand %p3192_p13, %p2768_p12 }
  0x29   : > { %p2771_p3 = pneg %p2770_p0 }
  0x2b   : > { %p2776_p7 = pnand %p2774_p5, %p2771_p3 }
  0x2d   : > { %2779 = shalt.err (!%p2776_p7)
}
  0x2e   : > { %s2780_s13 = scalar_lea.vmem %s355_s29, 512  ;;  %p2788_p2 = scmp.lt.s32.totalorder %s355_s29, %s355_s29 }
  0x2f   : > { %p2781_p9 = scmp.ne.s32.totalorder %s355_s29, %s2780_s13  ;;  %p2789_p6 = scmp.lt.s32.totalorder %s2780_s13, %s2780_s13 }
  0x31   : > { %p2783_p10 = pnand %p2781_p9, %p3192_p13  ;;  %p2790_p4 = por %p2789_p6, %p2788_p2 }
  0x33   : > { %p2784_p1 = pneg %p2783_p10 }
  0x35   : > { %p2791_p8 = pnand %p2790_p4, %p2784_p1 }
  0x37   : > { %2794 = shalt.err (!%p2791_p8)
}
  0x38   : > { %s3765_s14 = smov 128   ;;  %s3767_s17 = smov 8  }
  0x39   : > { %2643 = dma.hbm_to_vmem [thread:$0]  (!%p3179_p11), %s3801_s3, 512, %s355_s29, [#allocation15], %s3765_s14, %s3765_s14, %s3767_s17  }
  0x3a   : > { %p53_p1 = scmp.ge.s32.totalorder %s51_s12, 2  ;;  %s60_s16 = sadd.s32 1, %s3023_s19 }
  0x3b   : > { %p67_p2 = scmp.ne.s32.totalorder %s3023_s19, %s3019_s18  ;;  %p68_p4 = scmp.eq.s32.totalorder %s3035_s22, 0 }
  0x3c   : > { %s3846_s12 = smov (%p53_p1, %s51_s12), 0  ;;  %p3804_p8 = scmp.eq.s32.totalorder %s3151_s23, 1 }
  0x3d   : > { %3803 = sst [smem:[#allocation30_spill]] %s3846_s12  ;;  %p69_p6 = por %p68_p4, %p67_p2 }
  0x3e   : > { %p3219_p10 = por %p3804_p8, %p67_p2  ;;  %s55_s13 = ssub.s32 %s3031_s21, %s3846_s12 }
  0x3f   : > { %p2667_p12 = scmp.lt.s32.totalorder %s3035_s22, 2  ;;  %p58_p0 = scmp.eq.s32.totalorder %s55_s13, 0 }
  0x40   : > { %s3805_s24 = scalar_select %p3219_p10, 1, 0 }
  0x41   : > { %s3770_s11 = sand.u32 1, %s3023_s19   ;;  %s3232_s26 = sshll.u32 %s3031_s21, 7 }
  0x42   : > { %3806 = sst [smem:[#allocation31_spill]] %s3805_s24  ;;  %s3229_s29 = sshll.u32 %s3770_s11, 3 }
  0x43   : > { %s3235_s15 = scalar_select %p58_p0, %s3023_s19, %s60_s16  }
  0x44   : > { %p3237_p3 = pnand %p2667_p12, %p69_p6  ;;  %s428_s17 = sand.u32 1, %s3035_s22  }
  0x45   : > { %3807 = sst [smem:[#allocation32_spill]] %s3235_s15  ;;  %s3809_s1 = sld [smem:[#allocation33_spill]] }
  0x46   : > { %s3808_s14 = scalar_select %p3237_p3, 1, 0 }
  0x47   : > { %s432_s11 = scalar_lea.vmem [#allocation11], %s3229_s29  ;;  %s3040_s16 = smov [#allocation16]  }
  0x48   : > { %s442_s21 = sshll.u32 %s432_s11, 4  ;;  %s3251_s15 = sshll.u32 %s3040_s16, 4  ;;  %s3249_s21 = int_to_ptr.vmem [resolvable:$true] %s442_s21  ;;  %s371_s15 = int_to_ptr.vmem [resolvable:$true] %s3251_s15 }
  0x49   : > { %s3253_s10 = scalar_lea.sflag [#allocation12], %s428_s17  ;;  %p3259_p7 = pneg %p3237_p3 }
  0x4b   : > { %s3246_s13 = scalar_lea.hbm %s3809_s1, %s3232_s26  ;;  %s2800_s22 = scalar_lea.hbm %s3809_s1, 256 }
  0x4c   : > { %s2795_s9 = scalar_lea.hbm %s3246_s13, 128  ;;  %p2801_p2 = scmp.lt.u32.totalorder %s3246_s13, %s3809_s1 }
  0x4d   : > { %p2796_p5 = scmp.ne.s32.totalorder %s3246_s13, %s2795_s9  ;;  %p2802_p4 = scmp.lt.u32.totalorder %s2800_s22, %s2795_s9 }
  0x4e   : > { %s3810_s3 = scalar_select %p3259_p7, 1, 0 }
  0x4f   : > { %p2798_p9 = pnand %p3259_p7, %p2796_p5  ;;  %p2803_p6 = por %p2802_p4, %p2801_p2 }
  0x50   : > { %p2804_p8 = scmp.lt.u32.totalorder %s2795_s9, %s3246_s13 }
  0x51   : > { %p2799_p1 = pneg %p2798_p9 }
  0x52   : > { %p2805_p12 = por %p2804_p8, %p2803_p6 }
  0x54   : > { %p2806_p0 = pnand %p2805_p12, %p2799_p1 }
  0x56   : > { %2809 = shalt.err (!%p2806_p0)
}
  0x57   : > { %s2810_s17 = scalar_lea.vmem %s3249_s21, 128  ;;  %s3041_s12 = smov [#allocation11]  }
  0x58   : > { %p2811_p5 = scmp.ne.s32.totalorder %s3249_s21, %s2810_s17  ;;  %s2815_s11 = sshll.u32 %s3041_s12, 4  ;;  %s2816_s11 = int_to_ptr.vmem [resolvable:$false] %s2815_s11 }
  0x59   : > { %s2817_s24 = scalar_lea.vmem %s2816_s11, 256  ;;  %p2818_p11 = scmp.lt.s32.totalorder %s3249_s21, %s2816_s11 }
  0x5a   : > { %p2813_p9 = pnand %p2811_p5, %p3259_p7  ;;  %p2819_p13 = scmp.lt.s32.totalorder %s2817_s24, %s2810_s17 }
  0x5c   : > { %p2814_p10 = pneg %p2813_p9  ;;  %p2820_p2 = por %p2819_p13, %p2818_p11 }
  0x5e   : > { %p2821_p4 = pnand %p2820_p2, %p2814_p10 }
  0x60   : > { %2824 = shalt.err (!%p2821_p4)
}
  0x61   : > { %2656 = dma.hbm_to_vmem [thread:$0]  (!%p3237_p3), %s3246_s13, 128, %s3249_s21, %s3253_s10  }
  0x62   : > { %s2825_s16 = scalar_lea.hbm %s3752_s5, 512  ;;  %p3811_p11 = scmp.ne.s32.totalorder %s3802_s28, 0 }
  0x63   : > { %p2826_p1 = scmp.ne.s32.totalorder %s3752_s5, %s2825_s16  ;;  %p2832_p6 = scmp.lt.u32.totalorder %s2825_s16, %s3752_s5 }
  0x65   : > { %p2828_p13 = pnand %p2826_p1, %p3811_p11 }
  0x67   : > { %p2829_p10 = pneg %p2828_p13 }
  0x69   : > { %p2834_p8 = pnand %p2832_p6, %p2829_p10 }
  0x6b   : > { %2837 = shalt.err (!%p2834_p8)
}
  0x6c   : > { %s2838_s24 = scalar_lea.vmem %s371_s15, 512  ;;  %p2846_p9 = scmp.lt.s32.totalorder %s371_s15, %s371_s15 }
  0x6d   : > { %p2839_p12 = scmp.ne.s32.totalorder %s371_s15, %s2838_s24  ;;  %p2847_p2 = scmp.lt.s32.totalorder %s2838_s24, %s2838_s24 }
  0x6f   : > { %p2841_p0 = pnand %p2839_p12, %p3811_p11  ;;  %p2848_p4 = por %p2847_p2, %p2846_p9 }
  0x71   : > { %p2842_p5 = pneg %p2841_p0 }
  0x73   : > { %p2849_p3 = pnand %p2848_p4, %p2842_p5 }
  0x75   : > { %2852 = shalt.err (!%p2849_p3)
}
  0x76   : > { %p3812_p1 = scmp.ne.s32.totalorder %s3800_s30, 0  ;;  %s3813_s1 = smov 8  }
  0x77   : > { %s3814_s21 = smov 128   ;;  %s3042_s22 = smov [#allocation17]  }
  0x78   : > { %2646 = dma.hbm_to_vmem [thread:$0]  (!%p3812_p1), %s3752_s5, 512, %s371_s15, [#allocation15], %s3814_s21, %s3814_s21, %s3813_s1  }
  0x79   : > { %s386_s16 = sshll.u32 %s3042_s22, 4  ;;  %s2853_s11 = scalar_lea.hbm %s3754_s7, 512  ;;  %s387_s16 = int_to_ptr.vmem [resolvable:$true] %s386_s16 }
  0x7a   : > { %p2854_p3 = scmp.ne.s32.totalorder %s3754_s7, %s2853_s11  ;;  %p2860_p6 = scmp.lt.u32.totalorder %s2853_s11, %s3754_s7 }
  0x7c   : > { %p2856_p13 = pnand %p2854_p3, %p3811_p11 }
  0x7e   : > { %p2857_p10 = pneg %p2856_p13 }
  0x80   : > { %p2862_p8 = pnand %p2860_p6, %p2857_p10 }
  0x82   : > { %2865 = shalt.err (!%p2862_p8)
}
  0x83   : > { %s2866_s15 = scalar_lea.vmem %s387_s16, 512  ;;  %p2874_p9 = scmp.lt.s32.totalorder %s387_s16, %s387_s16 }
  0x84   : > { %p2867_p12 = scmp.ne.s32.totalorder %s387_s16, %s2866_s15  ;;  %p2875_p2 = scmp.lt.s32.totalorder %s2866_s15, %s2866_s15 }
  0x86   : > { %p2869_p0 = pnand %p2867_p12, %p3811_p11  ;;  %p2876_p4 = por %p2875_p2, %p2874_p9 }
  0x88   : > { %p2870_p5 = pneg %p2869_p0 }
  0x8a   : > { %p2877_p7 = pnand %p2876_p4, %p2870_p5 }
  0x8c   : > { %2880 = shalt.err (!%p2877_p7)
}
  0x8d   : > { %2649 = dma.hbm_to_vmem [thread:$0]  (!%p3812_p1), %s3754_s7, 512, %s387_s16, [#allocation18], %s3814_s21, %s3814_s21, %s3813_s1  }
  0x8e   : > { %s3330_s13 = scalar_lea.hbm %s3747_s0, %s3232_s26  ;;  %s413_s30 = scalar_lea.vmem [#allocation8], %s3229_s29 }
  0x8f   : > { %s421_s9 = sshll.u32 %s413_s30, 4  ;;  %s3815_s22 = sand.u32 1, %s3023_s19   ;;  %s422_s9 = int_to_ptr.vmem [resolvable:$true] %s421_s9 }
  0x90   : > { %s410_s12 = scalar_lea.sflag [#allocation9], %s3815_s22  ;;  %s2881_s17 = scalar_lea.hbm %s3330_s13, 128 }
  0x91   : > { %p2882_p7 = scmp.ne.s32.totalorder %s3330_s13, %s2881_s17  ;;  %p3816_p11 = scmp.ne.s32.totalorder %s3810_s3, 0 }
  0x92   : > { %s2886_s16 = scalar_lea.hbm %s3747_s0, 256  ;;  %p2887_p1 = scmp.lt.u32.totalorder %s3330_s13, %s3747_s0 }
  0x93   : > { %p2884_p3 = pnand %p2882_p7, %p3816_p11  ;;  %p2888_p10 = scmp.lt.u32.totalorder %s2886_s16, %s2881_s17 }
  0x94   : > { %p2890_p8 = scmp.lt.u32.totalorder %s2881_s17, %s3330_s13 }
  0x95   : > { %p2885_p13 = pneg %p2884_p3  ;;  %p2889_p6 = por %p2888_p10, %p2887_p1 }
  0x97   : > { %p2891_p12 = por %p2890_p8, %p2889_p6 }
  0x99   : > { %p2892_p0 = pnand %p2891_p12, %p2885_p13 }
  0x9b   : > { %2895 = shalt.err (!%p2892_p0)
}
  0x9c   : > { %s2896_s15 = scalar_lea.vmem %s422_s9, 128  ;;  %s3043_s4 = smov [#allocation8]  }
  0x9d   : > { %p2897_p5 = scmp.ne.s32.totalorder %s422_s9, %s2896_s15  ;;  %s2901_s8 = sshll.u32 %s3043_s4, 4  ;;  %s2902_s8 = int_to_ptr.vmem [resolvable:$false] %s2901_s8 }
  0x9e   : > { %s2903_s20 = scalar_lea.vmem %s2902_s8, 256  ;;  %p2904_p4 = scmp.lt.s32.totalorder %s422_s9, %s2902_s8 }
  0x9f   : > { %p2899_p9 = pnand %p2897_p5, %p3816_p11  ;;  %p2905_p7 = scmp.lt.s32.totalorder %s2903_s20, %s2896_s15 }
  0xa1   : > { %p2900_p2 = pneg %p2899_p9  ;;  %p2906_p3 = por %p2905_p7, %p2904_p4 }
  0xa3   : > { %p2907_p1 = pnand %p2906_p3, %p2900_p2 }
  0xa5   : > { %2910 = shalt.err (!%p2907_p1)
}
  0xa6   : > { %p3817_p10 = scmp.ne.s32.totalorder %s3808_s14, 0  ;;  %s3356_s22 = scalar_lea.hbm %s3749_s2, %s3232_s26 }
  0xa7   : > { %s453_s17 = scalar_lea.vmem [#allocation13], %s3229_s29  ;;  %s2911_s21 = scalar_lea.hbm %s3356_s22, 128 }
  0xa8   : > { %2653 = dma.hbm_to_vmem [thread:$0]  (!%p3817_p10), %s3330_s13, 128, %s422_s9, %s410_s12  }
  0xa9   : > { %s462_s1 = sshll.u32 %s453_s17, 4  ;;  %p2912_p13 = scmp.ne.s32.totalorder %s3356_s22, %s2911_s21  ;;  %s463_s1 = int_to_ptr.vmem [resolvable:$true] %s462_s1 }
  0xaa   : > { %s2916_s13 = scalar_lea.hbm %s3749_s2, 256  ;;  %p2917_p12 = scmp.lt.u32.totalorder %s3356_s22, %s3749_s2 }
  0xab   : > { %p2914_p6 = pnand %p2912_p13, %p3816_p11  ;;  %p2918_p0 = scmp.lt.u32.totalorder %s2916_s13, %s2911_s21 }
  0xac   : > { %p2920_p9 = scmp.lt.u32.totalorder %s2911_s21, %s3356_s22 }
  0xad   : > { %p2915_p8 = pneg %p2914_p6  ;;  %p2919_p5 = por %p2918_p0, %p2917_p12 }
  0xaf   : > { %p2921_p2 = por %p2920_p9, %p2919_p5 }
  0xb1   : > { %p2922_p4 = pnand %p2921_p2, %p2915_p8 }
  0xb3   : > { %2925 = shalt.err (!%p2922_p4)
}
  0xb4   : > { %s2926_s29 = scalar_lea.vmem %s463_s1, 128  ;;  %s3044_s26 = smov [#allocation13]  }
  0xb5   : > { %p2927_p7 = scmp.ne.s32.totalorder %s463_s1, %s2926_s29  ;;  %s2931_s24 = sshll.u32 %s3044_s26, 4  ;;  %s2932_s24 = int_to_ptr.vmem [resolvable:$false] %s2931_s24 }
  0xb6   : > { %s2933_s15 = scalar_lea.vmem %s2932_s24, 256  ;;  %p2934_p13 = scmp.lt.s32.totalorder %s463_s1, %s2932_s24 }
  0xb7   : > { %p2929_p3 = pnand %p2927_p7, %p3816_p11  ;;  %p2935_p6 = scmp.lt.s32.totalorder %s2933_s15, %s2926_s29 }
  0xb9   : > { %p2930_p1 = pneg %p2929_p3  ;;  %p2936_p10 = por %p2935_p6, %p2934_p13 }
  0xbb   : > { %p2937_p0 = pnand %p2936_p10, %p2930_p1 }
  0xbd   : > { %2940 = shalt.err (!%p2937_p0)
}
  0xbe   : > { %p3818_p12 = scmp.ne.s32.totalorder %s3808_s14, 0  ;;  %p3819_p8 = scmp.ne.s32.totalorder %s3799_s27, 0 }
  0xbf   : > { %s3380_s3 = sand.u32 (!%p3819_p8), 1, %s3019_s18   ;;  %p3820_p11 = scmp.ne.s32.totalorder (!%p3819_p8), %s3796_s25, 0 }
  0xc0   : > { %2659 = dma.hbm_to_vmem [thread:$0]  (!%p3818_p12), %s3356_s22, 128, %s463_s1, %s3253_s10  }
  0xc1   : > { %471 = sbr.rel (%p3819_p8) target bundleno = 2072 (0x818), region = 64  ;;  %s3383_s4 = sshll.u32 (!%p3819_p8), %s3380_s3, 3 }
  0xc2   : > { %s474_s8 = scalar_lea.sflag (!%p3819_p8), [#allocation9], %s3380_s3  ;;  %s477_s20 = scalar_lea.vmem (!%p3819_p8), [#allocation8], %s3383_s4 }
  0xc8   : > { %2994 = dma.done.wait (%p3820_p11), %s474_s8, 128  }
  0xc9   : > { %2996 = vsyncadd (%p3820_p11), %s474_s8, 4294967168  ;;  %s482_s10 = sand.u32 1, %s3151_s23   ;;  %s486_s14 = scalar_lea.vmem [#allocation11], %s3383_s4 }
  0xca   : > { %s483_s27 = scalar_lea.sflag [#allocation12], %s482_s10 }
  0xcb   : > { %2998 = dma.done.wait (%p3820_p11), %s483_s27, 256  }
  0xcc   : > { %3000 = vsyncadd (%p3820_p11), %s483_s27, 4294967040  ;;  %s495_s28 = scalar_lea.vmem [#allocation13], %s3383_s4  ;;  %p3821_p10 = scmp.eq.s32.totalorder %s3151_s23, 0 }
  0xce   : > { %3002 = dma.done.wait (%p3821_p10), [#allocation15], 1024   ;;  %p3822_p5 = pmov %p3821_p10 }
  0xd0   : > { %3004 = vsyncadd (%p3822_p5), [#allocation15], 4294966272  ;;  %p3823_p9 = pmov %p3822_p5 }
  0xd1   : > { %p3824_p2 = pmov %p3822_p5 }
  0xd2   : > { %3006 = dma.done.wait (%p3823_p9), [#allocation18], 512  }
  0xd3   : > { %3008 = vsyncadd (%p3824_p2), [#allocation18], 4294966784  ;;  %v3045_v0 = vmov 0.0|0.0   ;;  %vm3046_vm0 = vmmov 0   ;;  %v3047_v1 = vmov 0.0   ;;  %v563_v2 = vld [vmem:[#allocation16] sm:$0xff]  ;;  %v663_v26 = vlaneseq }
  0xd4   : > { %2602 = vmatprep.subr.bf16.mxu0 %v3045_v0  ;;  %2608 = vmatprep.subr.bf16.mxu1 %v3045_v0  ;;  %v564_v3 = vld [vmem:[#allocation16 + $0x8] sm:$0xff]  ;;  %v959_v4 = vld [vmem:[#allocation14] sm:$0xff]  ;;  %v565_v7 = vld [vmem:[#allocation16 + $0x10] sm:$0xff]  ;;  %vm574_vm1 = vcmask 261120   ;;  %vm876_vm2 = vcmask 64512   ;;  %s3825_s17 = sld [smem:[#allocation35_spill]] }
  0xd5   : > { %2537 = vmatprep.mubr.msk.f32.mxu0 %vm3046_vm0, %v3047_v1  ;;  %2548 = vmatprep.mubr.msk.f32.mxu1 %vm3046_vm0, %v3047_v1  ;;  %v2603_v5 = vpack.c.bf16 %v564_v3, %v563_v2  ;;  %v960_v6 = vld [vmem:[#allocation14 + $0x8] sm:$0xff]  ;;  %v566_v8 = vld [vmem:[#allocation16 + $0x18] sm:$0xff]  ;;  %v961_v10 = vld [vmem:[#allocation14 + $0x10] sm:$0xff]  ;;  %1204 = vst.msk [vmem:[#allocation7] sm:$0xff] %vm876_vm2, %v3047_v1  ;;  %s3048_s1 = smov 104   ;;  %s3049_s21 = smov 120  }
  0xd6   : > { %v2609_v9 = vpack.c.bf16 %v960_v6, %v959_v4  ;;  %v962_v11 = vld [vmem:[#allocation14 + $0x18] sm:$0xff]  ;;  %v2606_v12 = vpack.c.bf16 %v566_v8, %v565_v7  ;;  %v562_v14 = vld [vmem:[%s486_s14] sm:$0xff]  ;;  %1205 = vst.msk [vmem:[#allocation7 + $0x8] sm:$0xff] %vm876_vm2, %v3047_v1  ;;  %1206 = vst.msk [vmem:[#allocation7 + $0x10] sm:$0xff] %vm876_vm2, %v3047_v1  ;;  %s3050_s16 = smov 112   ;;  %v664_v30 = vshrl.u32 %v663_v26, 7 }
  0xd7   : > { %2604 = vmatpush3.bf16.msra.mxu0 %v2603_v5  ;;  %v2612_v13 = vpack.c.bf16 %v962_v11, %v961_v10  ;;  %v3418_v15 = vld [vmem:[%s477_s20] sm:$0xff]  ;;  %1207 = vst.msk [vmem:[#allocation7 + $0x18] sm:$0xff] %vm876_vm2, %v3047_v1  ;;  %v3051_v24 = vmov 1983009808   ;;  %v3052_v27 = vmov 1934713408  }
  0xd8   : > { %2605 = vmatprep.subr.bf16.mxu0 %v3045_v0  ;;  %2610 = vmatpush3.bf16.msra.mxu1 %v2609_v9  ;;  %v2466_v16 = vld [vmem:[%s3753_s6] ss:$0 sm:$0xff]  ;;  %v661_v25 = vunpack.c.l.s4 %v3051_v24  ;;  %v693_v28 = vunpack.c.l.s4 %v3052_v27  ;;  %vm1195_vm3 = vcmask 7168   ;;  %s3055_s11 = smov 96   ;;  %s3056_s13 = smov 16   ;;  %vm2142_vm4 = vcmask 130048  }
  0xd9   : > { %2611 = vmatprep.subr.bf16.mxu1 %v3045_v0  ;;  %1200 = vst.msk [vmem:[#allocation6] sm:$0xff] %vm1195_vm3, %v3047_v1  ;;  %1201 = vst.msk [vmem:[#allocation6 + $0x8] sm:$0xff] %vm1195_vm3, %v3047_v1  ;;  %s3057_s9 = smov 8   ;;  %s3058_s12 = smov 24   ;;  %vm2144_vm5 = vcmask 195584  }
  0xda   : > { %v2472_v18 = vld [vmem:[%s3825_s17] ss:$0 sm:$0xff]  ;;  %v662_v29 = vunpack.c.0.s8 %v661_v25  ;;  %v694_v33 = vunpack.c.0.s8 %v693_v28  ;;  %1202 = vst.msk [vmem:[#allocation6 + $0x10] sm:$0xff] %vm1195_vm3, %v3047_v1  ;;  %1203 = vst.msk [vmem:[#allocation6 + $0x18] sm:$0xff] %vm1195_vm3, %v3047_v1  ;;  %s3826_s24 = sld [smem:[#allocation36_spill]]  ;;  %s3828_s8 = sld [smem:[#allocation31_spill]] }
  0xdb   : > { %2607 = vmatpush3.bf16.msra.mxu0 %v2606_v12  ;;  %s3827_s15 = sld [smem:[#allocation26_spill]]  ;;  %s3829_s27 = sld [smem:[#allocation37_spill]] }
  0xdc   : > { %2613 = vmatpush3.bf16.msra.mxu1 %v2612_v13  ;;  %2561 = vmatprep.subr.mxu0 %v3047_v1  ;;  %v3452_v34 = vsub.s32 %v662_v29, %v664_v30  ;;  %v3464_v41 = vsub.s32 %v694_v33, %v664_v30  ;;  %s3830_s23 = sld [smem:[#allocation38_spill]]  ;;  %s555_s30 = scalar_lea.vmem [#allocation19], %s3383_s4 }
  0xdd   : > { %2551 = vmatprep.subr.mxu1 %v3047_v1  ;;  %s2279_s22 = sshll.u32 %s555_s30, 4  ;;  %s3059_s4 = smov [#allocation19]   ;;  %s3699_s22 = int_to_ptr.vmem [resolvable:$true] %s2279_s22 }
  0xde   : > { %2538 = vmatmul.mubr.msk.f32.vlgmr.msra.gmra.mrb[0].mxu0 %vm574_vm1, %v562_v14 }
  0xdf   : > { %2549 = vmatmul.mubr.msk.f32.vlgmr.msra.gmra.mrb[0].mxu1 %vm574_vm1, %v3418_v15  ;;  %2563 = vmatprep.mubr.msk.f32.mxu0 %vm3046_vm0, %v3047_v1 }
  0xe0   : > { %2553 = vmatprep.mubr.msk.f32.mxu1 %vm3046_vm0, %v3047_v1  ;;  %p3833_p7 = scmp.ne.s32.totalorder %s3828_s8, 0 }
  0xe1   : > { %s2495_s25 = sshll.u32 %s3827_s15, 7 }
 0x1b1   : > { %v644_v17 = vpop.f32.mrb[0].mxu0 }
 0x1b2   : > { %v3443_v19 = vadd.f32 %v2466_v16, %v644_v17  ;;  %v2539_v20 = vpop.f32.mrb[1].mxu0  ;;  %v1040_v21 = vpop.f32.mrb[0].mxu1 }
 0x1b3   : > { %v2550_v22 = vpop.f32.mrb[1].mxu1  ;;  %v1041_v23 = vadd.f32 %v2472_v18, %v1040_v21 }
 0x1b4   : > { %655 = vrot.lane.b32.xlu1 %v3443_v19, %s3048_s1  ;;  %649 = vrot.lane.b32.xlu0 %v3443_v19, %s3049_s21 }
 0x1b8   : > { %1045 = vrot.lane.b32.xlu1 %v1041_v23, %s3049_s21  ;;  %652 = vrot.lane.b32.xlu0 %v3443_v19, %s3050_s16  ;;  %s3831_s21 = sld [smem:[#allocation39_spill]] }
 0x1bc   : > { %1051 = vrot.lane.b32.xlu1 %v1041_v23, %s3048_s1  ;;  %1048 = vrot.lane.b32.xlu0 %v1041_v23, %s3050_s16 }
 0x1be   : > { %s3832_s16 = smov %s3831_s21 }
 0x226   : > { %v3448_v31 = vpop.permute.xlu1 %655  ;;  %v3450_v32 = vpop.permute.xlu0 %649 }
 0x227   : > { %v674_v35 = vcombine.low %v3450_v32, %v3448_v31  ;;  %v675_v36 = vcombine.high %v3450_v32, %v3448_v31 }
 0x229   : > { %v682_v42 = vrot.slane %v674_v35, %v3452_v34  ;;  %v689_v43 = vrot.slane %v675_v36, %v3452_v34 }
 0x22a   : > { %v1046_v37 = vpop.permute.xlu1 %1045  ;;  %v3458_v38 = vpop.permute.xlu0 %652 }
 0x22b   : > { %v658_v39 = vcombine.low %v3443_v19, %v3458_v38  ;;  %v659_v40 = vcombine.high %v3443_v19, %v3458_v38 }
 0x22d   : > { %v666_v44 = vrot.slane %v658_v39, %v3452_v34  ;;  %v673_v45 = vrot.slane %v659_v40, %v3452_v34 }
 0x22e   : > { %v1052_v46 = vpop.permute.xlu1 %1051  ;;  %v1049_v47 = vpop.permute.xlu0 %1048 }
 0x22f   : > { %v690_v48 = vcombine.low %v666_v44, %v682_v42  ;;  %v691_v49 = vcombine.high %v666_v44, %v682_v42  ;;  %v706_v50 = vcombine.low %v673_v45, %v689_v43  ;;  %v707_v51 = vcombine.high %v673_v45, %v689_v43 }
 0x230   : > { %v1070_v52 = vcombine.low %v1046_v37, %v1052_v46  ;;  %v1071_v53 = vcombine.high %v1046_v37, %v1052_v46  ;;  %v1054_v54 = vcombine.low %v1041_v23, %v1049_v47  ;;  %v1055_v55 = vcombine.high %v1041_v23, %v1049_v47 }
 0x231   : > { %v698_v56 = vrot.slane %v690_v48, %v3464_v41  ;;  %v705_v57 = vrot.slane %v691_v49, %v3464_v41  ;;  %v714_v58 = vrot.slane %v706_v50, %v3464_v41  ;;  %v721_v59 = vrot.slane %v707_v51, %v3464_v41 }
 0x232   : > { %v1078_v60 = vrot.slane %v1070_v52, %v3452_v34  ;;  %v1085_v61 = vrot.slane %v1071_v53, %v3452_v34  ;;  %v1062_v62 = vrot.slane %v1054_v54, %v3452_v34  ;;  %v1069_v63 = vrot.slane %v1055_v55, %v3452_v34 }
 0x233   : > { %v807_v2 = vcombine.low %v698_v56, %v705_v57  ;;  %v2468_v3 = vcombine.high %v698_v56, %v705_v57  ;;  %v823_v4 = vcombine.low %v714_v58, %v721_v59  ;;  %v2469_v5 = vcombine.high %v714_v58, %v721_v59 }
 0x234   : > { %v1086_v6 = vcombine.low %v1062_v62, %v1078_v60  ;;  %v1087_v7 = vcombine.high %v1062_v62, %v1078_v60  ;;  %v1102_v8 = vcombine.low %v1069_v63, %v1085_v61  ;;  %v1103_v9 = vcombine.high %v1069_v63, %v1085_v61 }
 0x235   : > { %v814_v10 = vrot.slane %v807_v2, %v3452_v34  ;;  %v822_v11 = vrot.slane %v2468_v3, %v3452_v34  ;;  %v830_v12 = vrot.slane %v823_v4, %v3452_v34  ;;  %v838_v13 = vrot.slane %v2469_v5, %v3452_v34  ;;  %v1223_v4 = vld [vmem:[%s495_s28] sm:$0xff] }
 0x236   : > { %v1094_v14 = vrot.slane %v1086_v6, %v3464_v41  ;;  %v1101_v16 = vrot.slane %v1087_v7, %v3464_v41  ;;  %v1110_v17 = vrot.slane %v1102_v8, %v3464_v41  ;;  %v1117_v18 = vrot.slane %v1103_v9, %v3464_v41 }
 0x237   : > { %v839_v20 = vcombine.low %v814_v10, %v822_v11  ;;  %v840_v21 = vcombine.high %v814_v10, %v822_v11  ;;  %v855_v22 = vcombine.low %v830_v12, %v838_v13  ;;  %v856_v23 = vcombine.high %v830_v12, %v838_v13 }
 0x238   : > { %v1122_v24 = vcombine.low %v1094_v14, %v1101_v16  ;;  %v2474_v25 = vcombine.high %v1094_v14, %v1101_v16  ;;  %v1138_v26 = vcombine.low %v1110_v17, %v1117_v18  ;;  %v2475_v27 = vcombine.high %v1110_v17, %v1117_v18 }
 0x239   : > { %v847_v28 = vrot.slane %v839_v20, %v3464_v41  ;;  %v854_v29 = vrot.slane %v840_v21, %v3464_v41  ;;  %v863_v30 = vrot.slane %v855_v22, %v3464_v41  ;;  %v870_v33 = vrot.slane %v856_v23, %v3464_v41 }
 0x23a   : > { %v1129_v35 = vrot.slane %v1122_v24, %v3452_v34  ;;  %v1137_v36 = vrot.slane %v2474_v25, %v3452_v34  ;;  %v1145_v37 = vrot.slane %v1138_v26, %v3452_v34  ;;  %v1153_v39 = vrot.slane %v2475_v27, %v3452_v34 }
 0x23b   : > { %v871_v40 = vcombine.low %v847_v28, %v863_v30  ;;  %v872_v42 = vcombine.high %v847_v28, %v863_v30  ;;  %v873_v43 = vcombine.low %v854_v29, %v870_v33  ;;  %v874_v44 = vcombine.high %v854_v29, %v870_v33 }
 0x23c   : > { %v1154_v45 = vcombine.low %v1129_v35, %v1137_v36  ;;  %v1155_v46 = vcombine.high %v1129_v35, %v1137_v36  ;;  %v1170_v47 = vcombine.low %v1145_v37, %v1153_v39  ;;  %v1171_v48 = vcombine.high %v1145_v37, %v1153_v39 }
 0x23d   : > { %877 = vst.msk [vmem:[#allocation3] sm:$0xff] %vm876_vm2, %v871_v40  ;;  %878 = vst.msk [vmem:[#allocation3 + $0x8] sm:$0xff] %vm876_vm2, %v872_v42  ;;  %v3053_v3 = vmov -inf   ;;  %v3054_v23 = vmov 0  }
 0x23e   : > { %879 = vst.msk [vmem:[#allocation3 + $0x10] sm:$0xff] %vm876_vm2, %v873_v43  ;;  %880 = vst.msk [vmem:[#allocation3 + $0x18] sm:$0xff] %vm876_vm2, %v874_v44  ;;  %v1162_v49 = vrot.slane %v1154_v45, %v3464_v41  ;;  %v1169_v50 = vrot.slane %v1155_v46, %v3464_v41  ;;  %v1178_v51 = vrot.slane %v1170_v47, %v3464_v41  ;;  %2739 = vset.pattern.permute.xlu0 %v3054_v23 }
 0x23f   : > { %v1185_v52 = vrot.slane %v1171_v48, %v3464_v41  ;;  %1196 = vst.msk [vmem:[#allocation5] sm:$0xff] %vm1195_vm3, %v3053_v3  ;;  %1197 = vst.msk [vmem:[#allocation5 + $0x8] sm:$0xff] %vm1195_vm3, %v3053_v3  ;;  %2740 = vset.pattern.permute.xlu1 %v3054_v23 }
 0x240   : > { %v1186_v53 = vcombine.low %v1162_v49, %v1178_v51  ;;  %v1187_v54 = vcombine.high %v1162_v49, %v1178_v51  ;;  %1198 = vst.msk [vmem:[#allocation5 + $0x10] sm:$0xff] %vm1195_vm3, %v3053_v3  ;;  %1199 = vst.msk [vmem:[#allocation5 + $0x18] sm:$0xff] %vm1195_vm3, %v3053_v3 }
 0x241   : > { %v1188_v55 = vcombine.low %v1169_v50, %v1185_v52  ;;  %v1189_v56 = vcombine.high %v1169_v50, %v1185_v52 }
 0x242   : > { %1191 = vst.msk [vmem:[#allocation2] sm:$0xff] %vm876_vm2, %v1186_v53  ;;  %1192 = vst.msk [vmem:[#allocation2 + $0x8] sm:$0xff] %vm876_vm2, %v1187_v54 }
 0x243   : > { %1193 = vst.msk [vmem:[#allocation2 + $0x10] sm:$0xff] %vm876_vm2, %v1188_v55  ;;  %1194 = vst.msk [vmem:[#allocation2 + $0x18] sm:$0xff] %vm876_vm2, %v1189_v56 }
 0x244   : > { %v1210_v57 = vld [vmem:[#allocation3] sm:$0xff]  ;;  %v1211_v61 = vld [vmem:[#allocation3 + $0x8] sm:$0xff] }
 0x245   : > { %v1212_v58 = vld [vmem:[#allocation3 + $0x10] sm:$0xff]  ;;  %2552 = vmatpush3.xpose.msk.msra.mxu1 %vm876_vm2, %v1210_v57  ;;  %v1213_v63 = vld [vmem:[#allocation3 + $0x18] sm:$0xff] }
 0x246   : > { %2562 = vmatpush3.xpose.msk.msra.mxu0 %vm876_vm2, %v1212_v58  ;;  %2556 = vmatprep.subr.mxu1 %v3047_v1  ;;  %v3560_v24 = vld [vmem:[#allocation5] sm:$0xff]  ;;  %v3565_v27 = vld [vmem:[#allocation5 + $0x8] sm:$0xff] }
 0x247   : > { %2571 = vmatprep.subr.mxu0 %v3047_v1  ;;  %v3567_v28 = vld [vmem:[#allocation5 + $0x10] sm:$0xff]  ;;  %v3580_v30 = vld [vmem:[#allocation5 + $0x18] sm:$0xff] }
 0x249   : > { %v1219_v59 = vld [vmem:[#allocation2] sm:$0xff]  ;;  %v1220_v62 = vld [vmem:[#allocation2 + $0x8] sm:$0xff] }
 0x24a   : > { %v1221_v60 = vld [vmem:[#allocation2 + $0x10] sm:$0xff]  ;;  %2554 = vmatmul.mubr.msk.f32.vlgmr.msra.gmra.mrb[2].mxu1 %vm876_vm2, %v1219_v59  ;;  %v1222_v2 = vld [vmem:[#allocation2 + $0x18] sm:$0xff] }
 0x24b   : > { %2564 = vmatmul.mubr.msk.f32.vlgmr.msra.gmra.mrb[2].mxu0 %vm876_vm2, %v1221_v60  ;;  %2557 = vmatpush3.xpose.msk.msra.mxu1 %vm876_vm2, %v1211_v61 }
 0x24c   : > { %2558 = vmatprep.mubr.msk.f32.mxu1 %vm3046_vm0, %v3047_v1  ;;  %2566 = vmatprep.subr.mxu1 %v3047_v1 }
 0x24d   : > { %2573 = vmatprep.mubr.msk.f32.mxu0 %vm3046_vm0, %v3047_v1 }
 0x24e   : > { %2559 = vmatmul.mubr.msk.f32.vlgmr.msra.gmra.mrb[4].mxu1 %vm876_vm2, %v1220_v62 }
 0x24f   : > { %2567 = vmatpush3.xpose.msk.msra.mxu1 %vm876_vm2, %v1213_v63  ;;  %2568 = vmatprep.mubr.msk.f32.mxu1 %vm3046_vm0, %v3047_v1 }
 0x250   : > { %2576 = vmatprep.subr.mxu1 %v3047_v1 }
 0x252   : > { %2569 = vmatmul.mubr.msk.f32.vlgmr.msra.gmra.mrb[6].mxu1 %vm876_vm2, %v1222_v2 }
 0x253   : > { %2578 = vmatprep.mubr.msk.f32.mxu1 %vm3046_vm0, %v3047_v1 }
 0x31d   : > { %v1297_v5 = vpop.f32.mrb[2].mxu1 }
 0x31e   : > { %v1449_v6 = vpop.f32.mrb[2].mxu0  ;;  %v3540_v7 = vadd.f32 %v1297_v5, %v1223_v4  ;;  %v2555_v8 = vpop.f32.mrb[3].mxu1 }
 0x31f   : > { %v2565_v9 = vpop.f32.mrb[3].mxu0  ;;  %v3542_v10 = vadd.f32 %v1449_v6, %v1223_v4 }
 0x320   : > { %v1533_v11 = vsel %vm876_vm2, %v3540_v7, -inf }
 0x321   : > { %1534 = vmax.xlane.f32.xlu0 %v1533_v11  ;;  %v1373_v12 = vpop.f32.mrb[4].mxu1  ;;  %v1539_v17 = vsel %vm876_vm2, %v3542_v10, -inf }
 0x322   : > { %v3546_v13 = vadd.f32 %v1373_v12, %v1223_v4  ;;  %v2560_v14 = vpop.f32.mrb[5].mxu1 }
 0x324   : > { %v1536_v16 = vsel %vm876_vm2, %v3546_v13, -inf }
 0x325   : > { %1537 = vmax.xlane.f32.xlu1 %v1536_v16  ;;  %v1525_v18 = vpop.f32.mrb[6].mxu1  ;;  %1540 = vmax.xlane.f32.xlu0 %v1539_v17 }
 0x326   : > { %v3552_v20 = vadd.f32 %v1525_v18, %v1223_v4  ;;  %v2570_v21 = vpop.f32.mrb[7].mxu1 }
 0x328   : > { %v1542_v22 = vsel %vm876_vm2, %v3552_v20, -inf }
 0x329   : > { %1543 = vmax.xlane.f32.xlu0 %v1542_v22 }
 0x336   : > { %726 = vrot.lane.b32.xlu1 %v3443_v19, %s3055_s11 }
 0x33a   : > { %730 = vrot.lane.b32.xlu1 %v3458_v38, %s3055_s11 }
 0x33e   : > { %732 = vrot.lane.b32.xlu1 %v3448_v31, %s3055_s11 }
 0x33f   : > { %728 = vrot.lane.b32.xlu0 %v3450_v32, %s3055_s11  ;;  %s3697_s11 = scalar_lea.hbm %s3831_s21, %s2495_s25 }
 0x3ae   : > { %v1535_v25 = vpop.xlane.xlu0 %1534 }
 0x3af   : > { %v3563_v26 = vmax.f32 %v3560_v24, %v1535_v25 }
 0x3b1   : > { %v1549_v29 = vsub.f32 %v3560_v24, %v3563_v26  ;;  %1950 = vst.msk [vmem:[#allocation5] sm:$0xff] %vm1195_vm3, %v3563_v26  ;;  %1563 = vperm.xlu0 %2739, %v3563_v26   ;;  %v1593_v26 = vld [vmem:[#allocation6] sm:$0xff] }
 0x3b2   : > { %v1538_v19 = vpop.xlane.xlu1 %1537  ;;  %v1541_v31 = vpop.xlane.xlu0 %1540 }
 0x3b3   : > { %v3575_v32 = vmax.f32 %v3565_v27, %v1538_v19  ;;  %v3578_v38 = vmax.f32 %v3567_v28, %v1541_v31 }
 0x3b5   : > { %v1550_v33 = vsub.f32 %v3565_v27, %v3575_v32  ;;  %1951 = vst.msk [vmem:[#allocation5 + $0x8] sm:$0xff] %vm1195_vm3, %v3575_v32  ;;  %v1551_v35 = vsub.f32 %v3567_v28, %v3578_v38  ;;  %1952 = vst.msk [vmem:[#allocation5 + $0x10] sm:$0xff] %vm1195_vm3, %v3578_v38  ;;  %1568 = vperm.xlu1 %2740, %v3575_v32   ;;  %v1594_v28 = vld [vmem:[#allocation6 + $0x8] sm:$0xff] }
 0x3b6   : > { %v727_v36 = vpop.permute.xlu1 %726  ;;  %v1544_v37 = vpop.xlane.xlu0 %1543 }
 0x3b7   : > { %v3592_v39 = vmax.f32 %v3580_v30, %v1544_v37 }
 0x3b9   : > { %v1552_v40 = vsub.f32 %v3580_v30, %v3592_v39  ;;  %1953 = vst.msk [vmem:[#allocation5 + $0x18] sm:$0xff] %vm1195_vm3, %v3592_v39  ;;  %1573 = vperm.xlu1 %2740, %v3578_v38   ;;  %1578 = vperm.xlu0 %2739, %v3592_v39   ;;  %v1595_v30 = vld [vmem:[#allocation6 + $0x10] sm:$0xff] }
 0x3ba   : > { %v731_v42 = vpop.permute.xlu1 %730  ;;  %v729_v45 = vpop.permute.xlu0 %728 }
 0x3bb   : > { %v738_v43 = vcombine.low %v727_v36, %v731_v42  ;;  %v739_v44 = vcombine.high %v727_v36, %v731_v42 }
 0x3bd   : > { %v746_v49 = vrot.slane %v738_v43, %v3452_v34  ;;  %v753_v50 = vrot.slane %v739_v44, %v3452_v34 }
 0x3be   : > { %v733_v46 = vpop.permute.xlu1 %732 }
 0x3bf   : > { %v754_v47 = vcombine.low %v729_v45, %v733_v46  ;;  %v755_v48 = vcombine.high %v729_v45, %v733_v46 }
 0x3c1   : > { %v762_v51 = vrot.slane %v754_v47, %v3452_v34  ;;  %v769_v52 = vrot.slane %v755_v48, %v3452_v34 }
 0x3c3   : > { %v770_v53 = vcombine.low %v746_v49, %v762_v51  ;;  %v771_v54 = vcombine.high %v746_v49, %v762_v51  ;;  %v786_v55 = vcombine.low %v753_v50, %v769_v52  ;;  %v787_v56 = vcombine.high %v753_v50, %v769_v52 }
 0x3c5   : > { %v778_v57 = vrot.slane %v770_v53, %v3464_v41  ;;  %v785_v58 = vrot.slane %v771_v54, %v3464_v41  ;;  %v794_v59 = vrot.slane %v786_v55, %v3464_v41  ;;  %v801_v60 = vrot.slane %v787_v56, %v3464_v41 }
 0x3c7   : > { %v881_v61 = vcombine.low %v778_v57, %v785_v58  ;;  %v2470_v62 = vcombine.high %v778_v57, %v785_v58  ;;  %v897_v63 = vcombine.low %v794_v59, %v801_v60  ;;  %v2471_v2 = vcombine.high %v794_v59, %v801_v60 }
 0x3c8   : > { %v1555_v58 = vmul.f32 1.442695, %v1550_v33  ;;  %v1553_v59 = vmul.f32 1.442695, %v1549_v29  ;;  %v1557_v60 = vmul.f32 1.442695, %v1551_v35 }
 0x3c9   : > { %v888_v3 = vrot.slane %v881_v61, %v3452_v34  ;;  %v896_v4 = vrot.slane %v2470_v62, %v3452_v34  ;;  %v904_v5 = vrot.slane %v897_v63, %v3452_v34  ;;  %v912_v6 = vrot.slane %v2471_v2, %v3452_v34 }
 0x3ca   : > { %v1559_v61 = vmul.f32 1.442695, %v1552_v40  ;;  %v1596_v40 = vld [vmem:[#allocation6 + $0x18] sm:$0xff] }
 0x3cb   : > { %v913_v8 = vcombine.low %v888_v3, %v896_v4  ;;  %v914_v9 = vcombine.high %v888_v3, %v896_v4  ;;  %v929_v11 = vcombine.low %v904_v5, %v912_v6  ;;  %v930_v12 = vcombine.high %v904_v5, %v912_v6 }
 0x3cd   : > { %v921_v14 = vrot.slane %v913_v8, %v3464_v41  ;;  %v928_v16 = vrot.slane %v914_v9, %v3464_v41  ;;  %v937_v17 = vrot.slane %v929_v11, %v3464_v41  ;;  %v944_v18 = vrot.slane %v930_v12, %v3464_v41 }
 0x3cf   : > { %v945_v21 = vcombine.low %v921_v14, %v937_v17  ;;  %v946_v22 = vcombine.high %v921_v14, %v937_v17  ;;  %v947_v23 = vcombine.low %v928_v16, %v944_v18  ;;  %v948_v25 = vcombine.high %v928_v16, %v944_v18 }
 0x3d1   : > { %950 = vst.msk [vmem:[#allocation4] sm:$0xff] %vm876_vm2, %v945_v21  ;;  %951 = vst.msk [vmem:[#allocation4 + $0x8] sm:$0xff] %vm876_vm2, %v946_v22  ;;  %v2146_v21 = vld [vmem:[#allocation17] sm:$0xff]  ;;  %v2147_v22 = vld [vmem:[#allocation17 + $0x8] sm:$0xff] }
 0x3d2   : > { %952 = vst.msk [vmem:[#allocation4 + $0x10] sm:$0xff] %vm876_vm2, %v947_v23  ;;  %953 = vst.msk [vmem:[#allocation4 + $0x18] sm:$0xff] %vm876_vm2, %v948_v25  ;;  %v2615_v23 = vpack.c.bf16 %v2147_v22, %v2146_v21  ;;  %v1622_v25 = vld [vmem:[#allocation7] sm:$0xff] }
 0x3d8   : > { %v1215_v19 = vld [vmem:[#allocation4] sm:$0xff]  ;;  %v1216_v31 = vld [vmem:[#allocation4 + $0x8] sm:$0xff] }
 0x3d9   : > { %2572 = vmatpush3.msra.mxu0 %v1215_v19  ;;  %2577 = vmatpush3.msra.mxu1 %v1216_v31 }
 0x3da   : > { %2581 = vmatprep.subr.mxu0 %v3047_v1  ;;  %2586 = vmatprep.subr.mxu1 %v3047_v1 }
 0x430   : > { %v1564_v36 = vpop.permute.xlu0 %1563 }
 0x431   : > { %v1581_v37 = vsub.f32 %v3540_v7, %v1564_v36  ;;  %v1217_v7 = vld [vmem:[#allocation4 + $0x10] sm:$0xff] }
 0x433   : > { %v1585_v42 = vmul.f32 1.442695, %v1581_v37  ;;  %v1623_v37 = vld [vmem:[#allocation7 + $0x8] sm:$0xff] }
 0x434   : > { %v1569_v43 = vpop.permute.xlu1 %1568 }
 0x435   : > { %2741 = vpow2.f32 %v1585_v42  ;;  %v1582_v44 = vsub.f32 %v3546_v13, %v1569_v43  ;;  %v1218_v13 = vld [vmem:[#allocation4 + $0x18] sm:$0xff] }
 0x437   : > { %v1587_v45 = vmul.f32 1.442695, %v1582_v44 }
 0x438   : > { %v1574_v46 = vpop.permute.xlu1 %1573  ;;  %v1579_v47 = vpop.permute.xlu0 %1578 }
 0x439   : > { %2743 = vpow2.f32 %v1587_v45  ;;  %v1583_v48 = vsub.f32 %v3542_v10, %v1574_v46  ;;  %v1584_v49 = vsub.f32 %v3552_v20, %v1579_v47  ;;  %v1624_v46 = vld [vmem:[#allocation7 + $0x10] sm:$0xff] }
 0x43b   : > { %v1589_v50 = vmul.f32 1.442695, %v1583_v48  ;;  %v1591_v51 = vmul.f32 1.442695, %v1584_v49  ;;  %v1625_v49 = vld [vmem:[#allocation7 + $0x18] sm:$0xff] }
 0x43d   : > { %2745 = vpow2.f32 %v1589_v50 }
 0x43e   : > { %2747 = vpow2.f32 %v1591_v51 }
 0x43f   : > { %v2742_v52 = vpop.eup %2741  ;;  %2749 = vpow2.f32 %v1555_v58 }
 0x440   : > { %2574 = vmatmul.mubr.msk.f32.vlgmr.msra.gmra.mrb[4].mxu0 %vm876_vm2, %v2742_v52  ;;  %v1601_v53 = vsel %vm876_vm2, %v2742_v52, 0.0  ;;  %2751 = vpow2.f32 %v1553_v59 }
 0x441   : > { %2582 = vmatpush3.msra.mxu0 %v1217_v7  ;;  %1602 = vadd.xlane.f32.xlu1 %v1601_v53  ;;  %2753 = vpow2.f32 %v1557_v60 }
 0x442   : > { %2583 = vmatprep.mubr.msk.f32.mxu0 %vm3046_vm0, %v3047_v1  ;;  %2614 = vmatprep.subr.bf16.mxu0 %v3045_v0  ;;  %2755 = vpow2.f32 %v1559_v61 }
 0x443   : > { %v2744_v10 = vpop.eup %2743 }
 0x444   : > { %2579 = vmatmul.mubr.msk.f32.vlgmr.msra.gmra.mrb[8].mxu1 %vm876_vm2, %v2744_v10  ;;  %v1604_v20 = vsel %vm876_vm2, %v2744_v10, 0.0 }
 0x445   : > { %2587 = vmatpush3.msra.mxu1 %v1218_v13  ;;  %1605 = vadd.xlane.f32.xlu0 %v1604_v20 }
 0x446   : > { %2588 = vmatprep.mubr.msk.f32.mxu1 %vm3046_vm0, %v3047_v1 }
 0x447   : > { %v2746_v54 = vpop.eup %2745 }
 0x448   : > { %v2748_v55 = vpop.eup %2747  ;;  %2584 = vmatmul.mubr.msk.f32.vlgmr.msra.gmra.mrb[6].mxu0 %vm876_vm2, %v2746_v54  ;;  %v1607_v56 = vsel %vm876_vm2, %v2746_v54, 0.0 }
 0x449   : > { %2589 = vmatmul.mubr.msk.f32.vlgmr.msra.gmra.mrb[10].mxu1 %vm876_vm2, %v2748_v55  ;;  %1608 = vadd.xlane.f32.xlu0 %v1607_v56  ;;  %v1610_v57 = vsel %vm876_vm2, %v2748_v55, 0.0 }
 0x44a   : > { %1611 = vadd.xlane.f32.xlu1 %v1610_v57  ;;  %2599 = vmatprep.mubr.msk.f32.mxu0 %vm3046_vm0, %v3047_v1  ;;  %v2750_v1 = vpop.eup %2749 }
 0x44b   : > { %v2752_v27 = vpop.eup %2751  ;;  %v1598_v35 = vmul.f32 %v2750_v1, %v1594_v28  ;;  %2616 = vmatpush3.bf16.msra.mxu0 %v2615_v23 }
 0x44c   : > { %v2754_v32 = vpop.eup %2753  ;;  %v1597_v29 = vmul.f32 %v2752_v27, %v1593_v26  ;;  %2617 = vmatprep.subr.bf16.mxu0 %v3045_v0 }
 0x44d   : > { %v2756_v24 = vpop.eup %2755  ;;  %v1599_v63 = vmul.f32 %v2754_v32, %v1595_v30 }
 0x44e   : > { %v1600_v2 = vmul.f32 %v2756_v24, %v1596_v40 }
 0x45b   : > { %1633 = vperm.xlu1 %2740, %v2750_v1  }
 0x45f   : > { %1638 = vperm.xlu1 %2740, %v2754_v32   ;;  %1628 = vperm.xlu0 %2739, %v2752_v27  }
 0x463   : > { %1643 = vperm.xlu0 %2739, %v2756_v24  }
 0x4ce   : > { %v1603_v33 = vpop.xlane.xlu1 %1602 }
 0x4cf   : > { %v1613_v38 = vadd.f32 %v1603_v33, %v1597_v29 }
 0x4d1   : > { %1618 = vst.msk [vmem:[#allocation6] sm:$0xff] %vm1195_vm3, %v1613_v38 }
 0x4d2   : > { %v1606_v62 = vpop.xlane.xlu0 %1605 }
 0x4d3   : > { %v1614_v39 = vadd.f32 %v1606_v62, %v1598_v35 }
 0x4d5   : > { %1619 = vst.msk [vmem:[#allocation6 + $0x8] sm:$0xff] %vm1195_vm3, %v1614_v39 }
 0x4d6   : > { %v1609_v3 = vpop.xlane.xlu0 %1608 }
 0x4d7   : > { %v1612_v4 = vpop.xlane.xlu1 %1611  ;;  %v1615_v5 = vadd.f32 %v1609_v3, %v1599_v63 }
 0x4d8   : > { %v1616_v6 = vadd.f32 %v1612_v4, %v1600_v2  ;;  %v1961_v8 = vld [vmem:[#allocation6] sm:$0xff] }
 0x4d9   : > { %1620 = vst.msk [vmem:[#allocation6 + $0x10] sm:$0xff] %vm1195_vm3, %v1615_v5  ;;  %2757 = vrcp.f32 %v1961_v8  ;;  %v2148_v5 = vld [vmem:[#allocation17 + $0x10] sm:$0xff] }
 0x4da   : > { %1621 = vst.msk [vmem:[#allocation6 + $0x18] sm:$0xff] %vm1195_vm3, %v1616_v6  ;;  %v2149_v6 = vld [vmem:[#allocation17 + $0x18] sm:$0xff] }
 0x4db   : > { %v1634_v31 = vpop.permute.xlu1 %1633 }
 0x4dc   : > { %v1962_v9 = vld [vmem:[#allocation6 + $0x8] sm:$0xff]  ;;  %v1647_v45 = vmul.f32 %v1634_v31, %v1623_v37 }
 0x4dd   : > { %2759 = vrcp.f32 %v1962_v9 }
 0x4de   : > { %v1629_v19 = vpop.permute.xlu0 %1628 }
 0x4df   : > { %v1646_v36 = vmul.f32 %v1629_v19, %v1622_v25  ;;  %v1639_v47 = vpop.permute.xlu1 %1638 }
 0x4e0   : > { %v1963_v11 = vld [vmem:[#allocation6 + $0x10] sm:$0xff]  ;;  %v1648_v7 = vmul.f32 %v1639_v47, %v1624_v46 }
 0x4e1   : > { %v1964_v12 = vld [vmem:[#allocation6 + $0x18] sm:$0xff]  ;;  %2761 = vrcp.f32 %v1963_v11 }
 0x4e2   : > { %2763 = vrcp.f32 %v1964_v12  ;;  %v1644_v50 = vpop.permute.xlu0 %1643 }
 0x4e3   : > { %v2758_v14 = vpop.eup %2757  ;;  %v1649_v0 = vmul.f32 %v1644_v50, %v1625_v49 }
 0x4e4   : > { %1971 = vperm.xlu1 %2740, %v2758_v14   ;;  %v2618_v14 = vpack.c.bf16 %v2149_v6, %v2148_v5 }
 0x4e6   : > { %2619 = vmatpush3.bf16.msra.mxu0 %v2618_v14 }
 0x4e7   : > { %v2760_v16 = vpop.eup %2759 }
 0x4e8   : > { %1976 = vperm.xlu0 %2739, %v2760_v16  }
 0x4eb   : > { %v2762_v17 = vpop.eup %2761 }
 0x4ec   : > { %v2764_v18 = vpop.eup %2763  ;;  %1981 = vperm.xlu1 %2740, %v2762_v17  }
 0x4ed   : > { %1986 = vperm.xlu0 %2739, %v2764_v18  }
 0x513   : > { %v1719_v42 = vpop.f32.mrb[4].mxu0 }
 0x514   : > { %v1942_v43 = vadd.f32 %v1719_v42, %v1646_v36  ;;  %v2575_v44 = vpop.f32.mrb[5].mxu0 }
 0x516   : > { %1946 = vst.msk [vmem:[#allocation7] sm:$0xff] %vm876_vm2, %v1942_v43 }
 0x517   : > { %v1792_v48 = vpop.f32.mrb[8].mxu1 }
 0x518   : > { %v1943_v51 = vadd.f32 %v1792_v48, %v1647_v45  ;;  %v2580_v52 = vpop.f32.mrb[9].mxu1 }
 0x51a   : > { %1947 = vst.msk [vmem:[#allocation7 + $0x8] sm:$0xff] %vm876_vm2, %v1943_v51 }
 0x51b   : > { %v1865_v53 = vpop.f32.mrb[6].mxu0 }
 0x51c   : > { %v1944_v10 = vadd.f32 %v1865_v53, %v1648_v7  ;;  %v1938_v13 = vpop.f32.mrb[10].mxu1  ;;  %v2585_v20 = vpop.f32.mrb[7].mxu0 }
 0x51d   : > { %v1945_v54 = vadd.f32 %v1938_v13, %v1649_v0  ;;  %v2590_v55 = vpop.f32.mrb[11].mxu1  ;;  %v1957_v58 = vld [vmem:[#allocation7] sm:$0xff] }
 0x51e   : > { %1948 = vst.msk [vmem:[#allocation7 + $0x10] sm:$0xff] %vm876_vm2, %v1944_v10 }
 0x51f   : > { %1949 = vst.msk [vmem:[#allocation7 + $0x18] sm:$0xff] %vm876_vm2, %v1945_v54 }
 0x521   : > { %v1958_v1 = vld [vmem:[#allocation7 + $0x8] sm:$0xff] }
 0x525   : > { %v1959_v60 = vld [vmem:[#allocation7 + $0x10] sm:$0xff] }
 0x526   : > { %v1960_v32 = vld [vmem:[#allocation7 + $0x18] sm:$0xff] }
 0x563   : > { %v1972_v56 = vpop.permute.xlu1 %1971 }
 0x564   : > { %v1989_v61 = vmul.f32 %v1972_v56, %v1957_v58 }
 0x567   : > { %v1977_v57 = vpop.permute.xlu0 %1976 }
 0x568   : > { %v1990_v26 = vmul.f32 %v1977_v57, %v1958_v1 }
 0x56b   : > { %v1982_v59 = vpop.permute.xlu1 %1981 }
 0x56c   : > { %v1991_v27 = vmul.f32 %v1982_v59, %v1959_v60  ;;  %v1987_v24 = vpop.permute.xlu0 %1986 }
 0x56d   : > { %v1992_v29 = vmul.f32 %v1987_v24, %v1960_v32 }
 0x56e   : > { %v1993_v33 = vcombine.low %v1989_v61, %v1991_v27  ;;  %v1994_v28 = vcombine.high %v1989_v61, %v1991_v27 }
 0x56f   : > { %v2009_v38 = vcombine.low %v1990_v26, %v1992_v29  ;;  %v2010_v35 = vcombine.high %v1990_v26, %v1992_v29  ;;  %v2493_v26 = vld [vmem:[%s3830_s23] ss:$0 sm:$0xff] }
 0x570   : > { %v2001_v62 = vrot.slane %v1993_v33, %v3452_v34  ;;  %v2008_v30 = vrot.slane %v1994_v28, %v3452_v34 }
 0x571   : > { %v2017_v39 = vrot.slane %v2009_v38, %v3452_v34  ;;  %v2024_v40 = vrot.slane %v2010_v35, %v3452_v34 }
 0x573   : > { %v2025_v63 = vcombine.low %v2001_v62, %v2017_v39  ;;  %v2026_v2 = vcombine.high %v2001_v62, %v2017_v39  ;;  %v2041_v3 = vcombine.low %v2008_v30, %v2024_v40  ;;  %v2042_v4 = vcombine.high %v2008_v30, %v2024_v40 }
 0x575   : > { %v2033_v8 = vrot.slane %v2025_v63, %v3464_v41  ;;  %v2040_v9 = vrot.slane %v2026_v2, %v3464_v41  ;;  %v2049_v11 = vrot.slane %v2041_v3, %v3464_v41  ;;  %v2056_v12 = vrot.slane %v2042_v4, %v3464_v41 }
 0x577   : > { %v2061_v16 = vcombine.low %v2033_v8, %v2040_v9  ;;  %v2488_v17 = vcombine.high %v2033_v8, %v2040_v9  ;;  %v2077_v18 = vcombine.low %v2049_v11, %v2056_v12  ;;  %v2489_v21 = vcombine.high %v2049_v11, %v2056_v12 }
 0x579   : > { %v2068_v22 = vrot.slane %v2061_v16, %v3452_v34  ;;  %v2076_v23 = vrot.slane %v2488_v17, %v3452_v34  ;;  %v2084_v25 = vrot.slane %v2077_v18, %v3452_v34  ;;  %v2092_v19 = vrot.slane %v2489_v21, %v3452_v34 }
 0x57b   : > { %v2094_v31 = vcombine.high %v2068_v22, %v2076_v23  ;;  %v2110_v36 = vcombine.high %v2084_v25, %v2092_v19  ;;  %v2093_v37 = vcombine.low %v2068_v22, %v2076_v23  ;;  %v2109_v42 = vcombine.low %v2084_v25, %v2092_v19 }
 0x57d   : > { %v2108_v43 = vrot.slane %v2094_v31, %v3464_v41  ;;  %v2124_v44 = vrot.slane %v2110_v36, %v3464_v41  ;;  %v2101_v45 = vrot.slane %v2093_v37, %v3464_v41  ;;  %v2117_v46 = vrot.slane %v2109_v42, %v3464_v41  ;;  %v2490_v41 = vld [vmem:[%s3826_s24] ss:$0 sm:$0xff] }
 0x57f   : > { %v2127_v47 = vcombine.low %v2108_v43, %v2124_v44  ;;  %v2126_v48 = vcombine.high %v2101_v45, %v2117_v46  ;;  %v2125_v49 = vcombine.low %v2101_v45, %v2117_v46  ;;  %v2128_v34 = vcombine.high %v2108_v43, %v2124_v44 }
 0x581   : > { %2134 = vrot.lane.b32.xlu0 %v2127_v47, %s3056_s13  ;;  %2130 = vrot.lane.b32.xlu1 %v2126_v48, %s3057_s9  ;;  %s2265_s13 = scalar_lea.sflag [#allocation10], %s3380_s3  ;;  %s2941_s9 = scalar_lea.vmem %s3699_s22, 128 }
 0x582   : > { %p2942_p4 = scmp.ne.s32.totalorder %s3699_s22, %s2941_s9 }
 0x584   : > { %p2943_p3 = pnand %p2942_p4, %p3833_p7 }
 0x585   : > { %2138 = vrot.lane.b32.xlu1 %v2128_v34, %s3058_s12  ;;  %s2945_s12 = sshll.u32 %s3059_s4, 4  ;;  %s2946_s12 = int_to_ptr.vmem [resolvable:$false] %s2945_s12 }
 0x586   : > { %p2944_p1 = pneg %p2943_p3  ;;  %s2947_s29 = scalar_lea.vmem %s2946_s12, 256 }
 0x587   : > { %p2948_p13 = scmp.lt.s32.totalorder %s3699_s22, %s2946_s12  ;;  %p2949_p6 = scmp.lt.s32.totalorder %s2947_s29, %s2941_s9 }
 0x589   : > { %p2950_p0 = por %p2949_p6, %p2948_p13 }
 0x58b   : > { %p2951_p12 = pnand %p2950_p0, %p2944_p1 }
 0x5f3   : > { %v2131_v50 = vpop.permute.xlu1 %2130  ;;  %v2135_v51 = vpop.permute.xlu0 %2134 }
 0x5f4   : > { %v2141_v52 = vsel %vm876_vm2, %v2125_v49, %v2131_v50 }
 0x5f5   : > { %v2143_v0 = vsel %vm2142_vm4, %v2141_v52, %v2135_v51 }
 0x5f7   : > { %v2139_v7 = vpop.permute.xlu1 %2138 }
 0x5f8   : > { %v2145_v53 = vsel %vm2144_vm5, %v2143_v0, %v2139_v7 }
 0x5f9   : > { %2600 = vmatmul.mubr.msk.f32.vlgmr.msra.gmra.mrb[8].mxu0 %vm574_vm1, %v2145_v53 }
 0x6cc   : > { %v2227_v10 = vpop.f32.mrb[8].mxu0 }
 0x6cd   : > { %v2228_v13 = vadd.f32 %v2490_v41, %v2227_v10  ;;  %v2601_v20 = vpop.f32.mrb[9].mxu0 }
 0x6cf   : > { %v2232_v54 = vadd.f32 %v2228_v13, %v3418_v15  ;;  %v2492_v15 = vld [vmem:[%s3829_s27] ss:$0 sm:$0xff] }
 0x6d1   : > { %v2233_v55 = vsel %vm574_vm1, %v2232_v54, 0.0 }
 0x6d2   : > { %2234 = vadd.xlane.f32.xlu0 %v2233_v55 }
 0x75f   : > { %v2235_v56 = vpop.xlane.xlu0 %2234 }
 0x760   : > { %v2237_v57 = vmul.f32 0.03125, %v2235_v56 }
 0x762   : > { %v2238_v58 = vsub.f32 %v2232_v54, %v2237_v57 }
 0x764   : > { %v2239_v59 = vmul.f32 %v2238_v58, %v2238_v58 }
 0x766   : > { %v2240_v60 = vsel %vm574_vm1, %v2239_v59, 0.0 }
 0x767   : > { %2241 = vadd.xlane.f32.xlu1 %v2240_v60 }
 0x7f4   : > { %v2242_v61 = vpop.xlane.xlu1 %2241 }
 0x7f5   : > { %v2243_v1 = vmul.f32 0.03125, %v2242_v61 }
 0x7f7   : > { %v2244_v27 = vadd.f32 1e-12, %v2243_v1 }
 0x7f9   : > { %2765 = vrsqrt.f32 %v2244_v27 }
 0x803   : > { %v2766_v32 = vpop.eup %2765 }
 0x804   : > { %v2246_v24 = vmul.f32 %v2766_v32, %v2238_v58 }
 0x806   : > { %v2254_v29 = vmul.f32 %v2492_v15, %v2246_v24 }
 0x808   : > { %v2262_v33 = vadd.f32 %v2493_v26, %v2254_v29 }
 0x80a   : > { %2263 = vst.msk [vmem:[%s555_s30] sm:$0xff] %vm574_vm1, %v2262_v33 }
 0x80b   : > { %2954 = shalt.err (!%p2951_p12)
}
 0x80c   : > { %s2955_s3 = scalar_lea.hbm %s3697_s11, 128  ;;  %s2959_s15 = scalar_lea.hbm %s3832_s16, 256 }
 0x80d   : > { %p2956_p8 = scmp.ne.s32.totalorder %s3697_s11, %s2955_s3  ;;  %p2960_p5 = scmp.lt.u32.totalorder %s3697_s11, %s3832_s16 }
 0x80e   : > { %p2961_p9 = scmp.lt.u32.totalorder %s2959_s15, %s2955_s3  ;;  %p2963_p4 = scmp.lt.u32.totalorder %s2955_s3, %s3697_s11 }
 0x80f   : > { %p2957_p11 = pnand %p2956_p8, %p3833_p7 }
 0x810   : > { %p2962_p2 = por %p2961_p9, %p2960_p5 }
 0x811   : > { %p2958_p10 = pneg %p2957_p11 }
 0x812   : > { %p2964_p3 = por %p2963_p4, %p2962_p2 }
 0x814   : > { %p2965_p1 = pnand %p2964_p3, %p2958_p10 }
 0x816   : > { %2968 = shalt.err (!%p2965_p1)
}
 0x817   : > { %2638 = dma.vmem_to_hbm [thread:$0]  (%p3833_p7), %s3699_s22, 128, %s3697_s11, %s2265_s13  }
 0x818 PF: > { %s3834_s27 = sld [smem:[#allocation25_spill]]  ;;  %s3835_s14 = sld [smem:[#allocation29_spill]] }
 0x819   : > { %s3836_s28 = sld [smem:[#allocation28_spill]] }
 0x81e   : > { %s2291_s23 = sand.u32 1, %s3834_s27   ;;  %p3837_p13 = scmp.ne.s32.totalorder %s3835_s14, 0 }
 0x81f   : > { %p3838_p6 = scmp.ge.s32.totalorder %s3836_s28, 2  ;;  %s2292_s25 = scalar_lea.sflag [#allocation10], %s2291_s23 }
 0x821   : > { %p2661_p0 = pnand %p3838_p6, %p3837_p13 }
 0x823   : > { %3010 = dma.done.wait (!%p2661_p0), %s2292_s25, 128  }
 0x824   : > { %3012 = vsyncadd (!%p2661_p0), %s2292_s25, 4294967168  ;;  %s32_s22 = sadd.s32 1, %s3836_s28   ;;  %s3839_s8 = sld [smem:[#allocation32_spill]] }
 0x825   : > { %p29_p12 = scmp.ge.s32.totalorder %s32_s22, 4   ;;  %s3840_s20 = sld [smem:[#allocation27_spill]] }
 0x826   : > { %s3841_s21 = sld [smem:[#allocation30_spill]]  ;;  %s3842_s17 = smov %s3019_s18 }
 0x827   : > { %s3843_s18 = smov %s3023_s19  ;;  %31 = sbr.rel (!%p29_p12) target bundleno = 18 (0x12), region = 161 }
 0x82a   : > { %s3844_s19 = smov %s3839_s8 }
 0x82e   :  { %2297 = vsyncpa [#allocation9], 1 }
 0x82f   :  { %2299 = vsyncpa [#allocation9 + $0x1], 1 }
 0x830   :  { %2300 = vsyncpa [#allocation12], 1 }
 0x831   :  { %2302 = vsyncpa [#allocation12 + $0x1], 1 }
 0x832   :  { %2303 = vsyncpa [#allocation15], 1 }
 0x833   :  { %2304 = vsyncpa [#allocation18], 1 }
 0x834   :  { %2305 = vsyncpa [#allocation10], 1 }
 0x835   :  { %2307 = vsyncpa [#allocation10 + $0x1], 1 }

</bundles_post_ra>
